<compile_context>
chip_gen: v7x
topology: tpu7x:2x2x1
jax: 0.10.0
libtpu: 0.0.40
codegen_flags: <defaults>
</compile_context>

<pallas_src>
import functools

import jax
import jax.numpy as jnp
from jax.experimental import pallas as pl
from jax.experimental.pallas import tpu as pltpu

LANE = 128      # lane width: output last dims padded to a multiple of this
SUBLANE = 8     # sublane height: batch tile rounded to a multiple of this
TM_MAX = 256    # max batch tile: MXU height on v6e/v7x (2x v5e's 128)

IN_FEATURES = 784
HIDDEN = 500
OUT_FEATURES = 10

K_PAD = 896     # 7 * 128: lane-aligned first-layer contraction dim
H_PAD = 512     # 500 -> 512
O_PAD = 128     # 10  -> 128


def _round_up(n, m):
    return (n + m - 1) // m * m


# ----------------------------------------------------------------------------
# Fused Pallas kernel: whole MLP per batch tile, weights VMEM-resident.
# ----------------------------------------------------------------------------
def _fnn_kernel(x_ref, w1_ref, b1_ref, w2_ref, b2_ref, w3_ref, b3_ref,
                w4_ref, b4_ref, o_ref):
    """o = relu(relu(relu(x@W1+b1)@W2+b2)@W3+b3)@W4 + b4

    Padded shapes: x:(TM, 896) W1:(896,512) W2,W3:(512,512) W4:(512,128),
    biases:(1, N). Weights are bf16, accumulation f32, epilogues f32. All
    intermediates stay in vregs/VMEM; nothing round-trips through HBM between
    layers.
    """
    h = jnp.dot(x_ref[...].astype(jnp.bfloat16), w1_ref[...],
                preferred_element_type=jnp.float32)
    h = jnp.maximum(h + b1_ref[...], 0.0)
    h = jnp.dot(h.astype(jnp.bfloat16), w2_ref[...],
                preferred_element_type=jnp.float32)
    h = jnp.maximum(h + b2_ref[...], 0.0)
    h = jnp.dot(h.astype(jnp.bfloat16), w3_ref[...],
                preferred_element_type=jnp.float32)
    h = jnp.maximum(h + b3_ref[...], 0.0)
    o = jnp.dot(h.astype(jnp.bfloat16), w4_ref[...],
                preferred_element_type=jnp.float32) + b4_ref[...]
    o_ref[...] = o.astype(o_ref.dtype)


# ----------------------------------------------------------------------------
# Parameter init (PyTorch nn.Linear layout/init) + one-time kernel layout prep.
# ----------------------------------------------------------------------------
def init_fnn_params(key):
    """Weights stored PyTorch-style: W:(out, in), b:(out,), U(-1/sqrt(in), ..)."""
    ks = jax.random.split(key, 8)

    def linear(kw, kb, fan_in, fan_out):
        bound = 1.0 / jnp.sqrt(jnp.float32(fan_in))
        w = jax.random.uniform(kw, (fan_out, fan_in), jnp.float32, -bound, bound)
        b = jax.random.uniform(kb, (fan_out,), jnp.float32, -bound, bound)
        return w, b

    w1, b1 = linear(ks[0], ks[1], IN_FEATURES, HIDDEN)
    w2, b2 = linear(ks[2], ks[3], HIDDEN, HIDDEN)
    w3, b3 = linear(ks[4], ks[5], HIDDEN, HIDDEN)
    w4, b4 = linear(ks[6], ks[7], HIDDEN, OUT_FEATURES)
    return {"fc1_w": w1, "fc1_b": b1, "fc2_w": w2, "fc2_b": b2,
            "fc3_w": w3, "fc3_b": b3, "fc4_w": w4, "fc4_b": b4}


def prep_params_for_kernel(params):
    """One-time layout prep: transpose to (K, N), zero-pad K/N to lane-aligned
    sizes (784->896, 500->512, 10->128), cast weights to bf16 (halves HBM
    weight traffic, native MXU rate on v6e/v7x). Biases stay f32 for the f32
    epilogue. Zero padding => padded lanes stay exactly 0 through ReLU and
    never contaminate later layers."""
    def prep(w, b, k_pad, n_pad):
        n, k = w.shape
        wt = jnp.zeros((k_pad, n_pad), jnp.float32).at[:k, :n].set(w.T)
        bp = jnp.zeros((1, n_pad), jnp.float32).at[0, :n].set(b)
        return wt.astype(jnp.bfloat16), bp

    w1, b1 = prep(params["fc1_w"], params["fc1_b"], K_PAD, H_PAD)
    w2, b2 = prep(params["fc2_w"], params["fc2_b"], H_PAD, H_PAD)
    w3, b3 = prep(params["fc3_w"], params["fc3_b"], H_PAD, H_PAD)
    w4, b4 = prep(params["fc4_w"], params["fc4_b"], H_PAD, O_PAD)
    return {"w1": w1, "b1": b1, "w2": w2, "b2": b2,
            "w3": w3, "b3": b3, "w4": w4, "b4": b4}


# ----------------------------------------------------------------------------
# Forward wrappers
# ----------------------------------------------------------------------------
@functools.partial(jax.jit, static_argnames=("single_buffer_weights",))
def fnn_forward(padded_params, x, *, single_buffer_weights=True):
    """x: (B, ...) flattened to (B, 784), returns (B, 10)."""
    B = x.shape[0]
    x2 = x.reshape(B, -1).astype(jnp.float32)            # mirror torch .view
    assert x2.shape[1] == IN_FEATURES, x2.shape

    # Batch tile: up to 256 rows (MXU-height aligned), 8-sublane aligned for
    # tiny batches. m_pad is a multiple of the tile so the grid divides evenly.
    tm = min(TM_MAX, _round_up(max(B, SUBLANE), SUBLANE))
    m_pad = _round_up(B, tm)
    x2 = jnp.pad(x2, ((0, m_pad - B), (0, K_PAD - IN_FEATURES)))

    w1, b1 = padded_params["w1"], padded_params["b1"]
    w2, b2 = padded_params["w2"], padded_params["b2"]
    w3, b3 = padded_params["w3"], padded_params["b3"]
    w4, b4 = padded_params["w4"], padded_params["b4"]

    def resident_spec(shape):
        # Constant block index across the M grid -> Pallas keeps it VMEM
        # resident and never re-DMAs it. Single buffering saves the second
        # (useless) buffer for these invariant operands.
        idx = lambda i: (0,) * len(shape)
        if single_buffer_weights:
            return pl.BlockSpec(shape, idx,
                                pipeline_mode=pl.Buffered(buffer_count=1))
        return pl.BlockSpec(shape, idx)

    grid = (m_pad // tm,)

    out = pl.pallas_call(
        _fnn_kernel,
        out_shape=jax.ShapeDtypeStruct((m_pad, O_PAD), jnp.float32),
        grid=grid,
        in_specs=[
            pl.BlockSpec((tm, K_PAD), lambda i: (i, 0)),   # x tile, pipelined
            resident_spec(w1.shape), resident_spec(b1.shape),
            resident_spec(w2.shape), resident_spec(b2.shape),
            resident_spec(w3.shape), resident_spec(b3.shape),
            resident_spec(w4.shape), resident_spec(b4.shape),
        ],
        out_specs=pl.BlockSpec((tm, O_PAD), lambda i: (i, 0)),
        compiler_params=pltpu.CompilerParams(
            dimension_semantics=("parallel",),             # v7x dual-TC sharding
            vmem_limit_bytes=32 * 1024 * 1024,             # fits v5e/v6e/v7x
        ),
    )(x2, w1, b1, w2, b2, w3, b3, w4, b4)

    return out[:B, :OUT_FEATURES]


# Pure-JAX reference (exact PyTorch semantics, f32) for the correctness check.
def fnn_forward_ref(params, x):
    o = x.reshape(x.shape[0], -1).astype(jnp.float32)
    o = jax.nn.relu(o @ params["fc1_w"].T + params["fc1_b"])
    o = jax.nn.relu(o @ params["fc2_w"].T + params["fc2_b"])
    o = jax.nn.relu(o @ params["fc3_w"].T + params["fc3_b"])
    return o @ params["fc4_w"].T + params["fc4_b"]


if __name__ == "__main__":
    key = jax.random.PRNGKey(0)
    k_param, k_x = jax.random.split(key)

    params = init_fnn_params(k_param)
    padded_params = prep_params_for_kernel(params)   # one-time layout prep

    # MNIST-shaped input: 1x28x28 = 784 features, required by the first Linear.
    x = jax.random.normal(k_x, (2, 1, 28, 28), dtype=jnp.float32)

    try:
        out = jax.block_until_ready(
            fnn_forward(padded_params, x, single_buffer_weights=True))
    except Exception:
        # Fallback if this JAX build rejects pipeline_mode=pl.Buffered(1) on
        # the invariant weight/bias specs; everything else is unchanged.
        out = jax.block_until_ready(
            fnn_forward(padded_params, x, single_buffer_weights=False))

    ref = jax.block_until_ready(fnn_forward_ref(params, x))

    assert out.shape == (2, OUT_FEATURES), out.shape
    # bf16 weights vs. f32 reference -> loosened tolerance (per review).
    assert jnp.allclose(out, ref, rtol=5e-2, atol=5e-2), "mismatch vs reference"
    print("KERNEL_OK")
</pallas_src>

<mosaic_0001>
module attributes {stable_mosaic.version = 11 : i64} {
  func.func @_fnn_kernel(%arg0: i32, %arg1: memref<8x896xf32, #tpu.memory_space<vmem>>, %arg2: memref<896x512xbf16, #tpu.memory_space<vmem>>, %arg3: memref<1x512xf32, #tpu.memory_space<vmem>>, %arg4: memref<512x512xbf16, #tpu.memory_space<vmem>>, %arg5: memref<1x512xf32, #tpu.memory_space<vmem>>, %arg6: memref<512x512xbf16, #tpu.memory_space<vmem>>, %arg7: memref<1x512xf32, #tpu.memory_space<vmem>>, %arg8: memref<512x128xbf16, #tpu.memory_space<vmem>>, %arg9: memref<1x128xf32, #tpu.memory_space<vmem>>, %arg10: memref<8x128xf32, #tpu.memory_space<vmem>>) attributes {dimension_semantics = [#tpu.dimension_semantics<parallel>], iteration_bounds = array<i64: 1>, scalar_prefetch = 0 : i64, scratch_operands = 0 : i64, tpu.core_type = #tpu.core_type<tc>, window_params = [{transform_indices = @transform_0, window_bounds = array<i64: 8, 896>}, {pipeline_mode = #tpu.pipeline_mode<synchronous>, transform_indices = @transform_1, window_bounds = array<i64: 896, 512>}, {pipeline_mode = #tpu.pipeline_mode<synchronous>, transform_indices = @transform_2, window_bounds = array<i64: 1, 512>}, {pipeline_mode = #tpu.pipeline_mode<synchronous>, transform_indices = @transform_3, window_bounds = array<i64: 512, 512>}, {pipeline_mode = #tpu.pipeline_mode<synchronous>, transform_indices = @transform_4, window_bounds = array<i64: 1, 512>}, {pipeline_mode = #tpu.pipeline_mode<synchronous>, transform_indices = @transform_5, window_bounds = array<i64: 512, 512>}, {pipeline_mode = #tpu.pipeline_mode<synchronous>, transform_indices = @transform_6, window_bounds = array<i64: 1, 512>}, {pipeline_mode = #tpu.pipeline_mode<synchronous>, transform_indices = @transform_7, window_bounds = array<i64: 512, 128>}, {pipeline_mode = #tpu.pipeline_mode<synchronous>, transform_indices = @transform_8, window_bounds = array<i64: 1, 128>}, {transform_indices = @transform_9, window_bounds = array<i64: 8, 128>}]} {
    %c0 = arith.constant 0 : index
    %c0_0 = arith.constant 0 : index
    %0 = vector.load %arg1[%c0, %c0_0] : memref<8x896xf32, #tpu.memory_space<vmem>>, vector<8x896xf32>
    %1 = arith.truncf %0 : vector<8x896xf32> to vector<8x896xbf16>
    %c0_1 = arith.constant 0 : index
    %c0_2 = arith.constant 0 : index
    %2 = vector.load %arg2[%c0_1, %c0_2] : memref<896x512xbf16, #tpu.memory_space<vmem>>, vector<896x512xbf16>
    %cst = arith.constant dense<0.000000e+00> : vector<8x512xf32>
    %3 = tpu.matmul %1, %2, %cst {dimension_numbers = #tpu.dot_dimension_numbers<[1], [0], [0], [1], [0, 0, 1, 1], [], []>} : vector<8x896xbf16>, vector<896x512xbf16>, vector<8x512xf32> -> vector<8x512xf32>
    %c0_3 = arith.constant 0 : index
    %c0_4 = arith.constant 0 : index
    %4 = vector.load %arg3[%c0_3, %c0_4] : memref<1x512xf32, #tpu.memory_space<vmem>>, vector<1x512xf32>
    %5 = vector.broadcast %4 : vector<1x512xf32> to vector<8x512xf32>
    %6 = arith.addf %3, %5 : vector<8x512xf32>
    %cst_5 = arith.constant 0.000000e+00 : f32
    %7 = vector.broadcast %cst_5 : f32 to vector<8x512xf32>
    %8 = arith.maximumf %6, %7 : vector<8x512xf32>
    %9 = arith.truncf %8 : vector<8x512xf32> to vector<8x512xbf16>
    %c0_6 = arith.constant 0 : index
    %c0_7 = arith.constant 0 : index
    %10 = vector.load %arg4[%c0_6, %c0_7] : memref<512x512xbf16, #tpu.memory_space<vmem>>, vector<512x512xbf16>
    %cst_8 = arith.constant dense<0.000000e+00> : vector<8x512xf32>
    %11 = tpu.matmul %9, %10, %cst_8 {dimension_numbers = #tpu.dot_dimension_numbers<[1], [0], [0], [1], [0, 0, 1, 1], [], []>} : vector<8x512xbf16>, vector<512x512xbf16>, vector<8x512xf32> -> vector<8x512xf32>
    %c0_9 = arith.constant 0 : index
    %c0_10 = arith.constant 0 : index
    %12 = vector.load %arg5[%c0_9, %c0_10] : memref<1x512xf32, #tpu.memory_space<vmem>>, vector<1x512xf32>
    %13 = vector.broadcast %12 : vector<1x512xf32> to vector<8x512xf32>
    %14 = arith.addf %11, %13 : vector<8x512xf32>
    %cst_11 = arith.constant 0.000000e+00 : f32
    %15 = vector.broadcast %cst_11 : f32 to vector<8x512xf32>
    %16 = arith.maximumf %14, %15 : vector<8x512xf32>
    %17 = arith.truncf %16 : vector<8x512xf32> to vector<8x512xbf16>
    %c0_12 = arith.constant 0 : index
    %c0_13 = arith.constant 0 : index
    %18 = vector.load %arg6[%c0_12, %c0_13] : memref<512x512xbf16, #tpu.memory_space<vmem>>, vector<512x512xbf16>
    %cst_14 = arith.constant dense<0.000000e+00> : vector<8x512xf32>
    %19 = tpu.matmul %17, %18, %cst_14 {dimension_numbers = #tpu.dot_dimension_numbers<[1], [0], [0], [1], [0, 0, 1, 1], [], []>} : vector<8x512xbf16>, vector<512x512xbf16>, vector<8x512xf32> -> vector<8x512xf32>
    %c0_15 = arith.constant 0 : index
    %c0_16 = arith.constant 0 : index
    %20 = vector.load %arg7[%c0_15, %c0_16] : memref<1x512xf32, #tpu.memory_space<vmem>>, vector<1x512xf32>
    %21 = vector.broadcast %20 : vector<1x512xf32> to vector<8x512xf32>
    %22 = arith.addf %19, %21 : vector<8x512xf32>
    %cst_17 = arith.constant 0.000000e+00 : f32
    %23 = vector.broadcast %cst_17 : f32 to vector<8x512xf32>
    %24 = arith.maximumf %22, %23 : vector<8x512xf32>
    %25 = arith.truncf %24 : vector<8x512xf32> to vector<8x512xbf16>
    %c0_18 = arith.constant 0 : index
    %c0_19 = arith.constant 0 : index
    %26 = vector.load %arg8[%c0_18, %c0_19] : memref<512x128xbf16, #tpu.memory_space<vmem>>, vector<512x128xbf16>
    %cst_20 = arith.constant dense<0.000000e+00> : vector<8x128xf32>
    %27 = tpu.matmul %25, %26, %cst_20 {dimension_numbers = #tpu.dot_dimension_numbers<[1], [0], [0], [1], [0, 0, 1, 1], [], []>} : vector<8x512xbf16>, vector<512x128xbf16>, vector<8x128xf32> -> vector<8x128xf32>
    %c0_21 = arith.constant 0 : index
    %c0_22 = arith.constant 0 : index
    %28 = vector.load %arg9[%c0_21, %c0_22] : memref<1x128xf32, #tpu.memory_space<vmem>>, vector<1x128xf32>
    %29 = vector.broadcast %28 : vector<1x128xf32> to vector<8x128xf32>
    %30 = arith.addf %27, %29 : vector<8x128xf32>
    %c0_23 = arith.constant 0 : index
    %c0_24 = arith.constant 0 : index
    %31 = vector.load %arg10[%c0_23, %c0_24] : memref<8x128xf32, #tpu.memory_space<vmem>>, vector<8x128xf32>
    tpu.vector_store %arg10[%c0_23, %c0_24], %30 {strides = array<i32>} : memref<8x128xf32, #tpu.memory_space<vmem>>, vector<8x128xf32>,
    return
  }
  func.func @transform_0(%arg0: i32) -> (i32, i32) {
    %c0_i32 = arith.constant 0 : i32
    %c0_i32_0 = arith.constant 0 : i32
    return %arg0, %c0_i32 : i32, i32
  }
  func.func @transform_1(%arg0: i32) -> (i32, i32) {
    %c0_i32 = arith.constant 0 : i32
    %c0_i32_0 = arith.constant 0 : i32
    %c0_i32_1 = arith.constant 0 : i32
    return %c0_i32, %c0_i32_0 : i32, i32
  }
  func.func @transform_2(%arg0: i32) -> (i32, i32) {
    %c0_i32 = arith.constant 0 : i32
    %c0_i32_0 = arith.constant 0 : i32
    %c0_i32_1 = arith.constant 0 : i32
    return %c0_i32, %c0_i32_0 : i32, i32
  }
  func.func @transform_3(%arg0: i32) -> (i32, i32) {
    %c0_i32 = arith.constant 0 : i32
    %c0_i32_0 = arith.constant 0 : i32
    %c0_i32_1 = arith.constant 0 : i32
    return %c0_i32, %c0_i32_0 : i32, i32
  }
  func.func @transform_4(%arg0: i32) -> (i32, i32) {
    %c0_i32 = arith.constant 0 : i32
    %c0_i32_0 = arith.constant 0 : i32
    %c0_i32_1 = arith.constant 0 : i32
    return %c0_i32, %c0_i32_0 : i32, i32
  }
  func.func @transform_5(%arg0: i32) -> (i32, i32) {
    %c0_i32 = arith.constant 0 : i32
    %c0_i32_0 = arith.constant 0 : i32
    %c0_i32_1 = arith.constant 0 : i32
    return %c0_i32, %c0_i32_0 : i32, i32
  }
  func.func @transform_6(%arg0: i32) -> (i32, i32) {
    %c0_i32 = arith.constant 0 : i32
    %c0_i32_0 = arith.constant 0 : i32
    %c0_i32_1 = arith.constant 0 : i32
    return %c0_i32, %c0_i32_0 : i32, i32
  }
  func.func @transform_7(%arg0: i32) -> (i32, i32) {
    %c0_i32 = arith.constant 0 : i32
    %c0_i32_0 = arith.constant 0 : i32
    %c0_i32_1 = arith.constant 0 : i32
    return %c0_i32, %c0_i32_0 : i32, i32
  }
  func.func @transform_8(%arg0: i32) -> (i32, i32) {
    %c0_i32 = arith.constant 0 : i32
    %c0_i32_0 = arith.constant 0 : i32
    %c0_i32_1 = arith.constant 0 : i32
    return %c0_i32, %c0_i32_0 : i32, i32
  }
  func.func @transform_9(%arg0: i32) -> (i32, i32) {
    %c0_i32 = arith.constant 0 : i32
    %c0_i32_0 = arith.constant 0 : i32
    return %arg0, %c0_i32 : i32, i32
  }
}

module attributes {stable_mosaic.version = 11 : i64} {
  func.func @_fnn_kernel(%arg0: i32, %arg1: memref<8x896xf32, #tpu.memory_space<vmem>>, %arg2: memref<896x512xbf16, #tpu.memory_space<vmem>>, %arg3: memref<1x512xf32, #tpu.memory_space<vmem>>, %arg4: memref<512x512xbf16, #tpu.memory_space<vmem>>, %arg5: memref<1x512xf32, #tpu.memory_space<vmem>>, %arg6: memref<512x512xbf16, #tpu.memory_space<vmem>>, %arg7: memref<1x512xf32, #tpu.memory_space<vmem>>, %arg8: memref<512x128xbf16, #tpu.memory_space<vmem>>, %arg9: memref<1x128xf32, #tpu.memory_space<vmem>>, %arg10: memref<8x128xf32, #tpu.memory_space<vmem>>) attributes {dimension_semantics = [#tpu.dimension_semantics<parallel>], iteration_bounds = array<i64: 1>, scalar_prefetch = 0 : i64, scratch_operands = 0 : i64, tpu.core_type = #tpu.core_type<tc>, window_params = [{transform_indices = @transform_0, window_bounds = array<i64: 8, 896>}, {pipeline_mode = #tpu.pipeline_mode<synchronous>, transform_indices = @transform_1, window_bounds = array<i64: 896, 512>}, {pipeline_mode = #tpu.pipeline_mode<synchronous>, transform_indices = @transform_2, window_bounds = array<i64: 1, 512>}, {pipeline_mode = #tpu.pipeline_mode<synchronous>, transform_indices = @transform_3, window_bounds = array<i64: 512, 512>}, {pipeline_mode = #tpu.pipeline_mode<synchronous>, transform_indices = @transform_4, window_bounds = array<i64: 1, 512>}, {pipeline_mode = #tpu.pipeline_mode<synchronous>, transform_indices = @transform_5, window_bounds = array<i64: 512, 512>}, {pipeline_mode = #tpu.pipeline_mode<synchronous>, transform_indices = @transform_6, window_bounds = array<i64: 1, 512>}, {pipeline_mode = #tpu.pipeline_mode<synchronous>, transform_indices = @transform_7, window_bounds = array<i64: 512, 128>}, {pipeline_mode = #tpu.pipeline_mode<synchronous>, transform_indices = @transform_8, window_bounds = array<i64: 1, 128>}, {transform_indices = @transform_9, window_bounds = array<i64: 8, 128>}]} {
    %c0 = arith.constant 0 : index
    %c0_0 = arith.constant 0 : index
    %0 = vector.load %arg1[%c0, %c0_0] : memref<8x896xf32, #tpu.memory_space<vmem>>, vector<8x896xf32>
    %1 = arith.truncf %0 : vector<8x896xf32> to vector<8x896xbf16>
    %c0_1 = arith.constant 0 : index
    %c0_2 = arith.constant 0 : index
    %2 = vector.load %arg2[%c0_1, %c0_2] : memref<896x512xbf16, #tpu.memory_space<vmem>>, vector<896x512xbf16>
    %cst = arith.constant dense<0.000000e+00> : vector<8x512xf32>
    %3 = tpu.matmul %1, %2, %cst {dimension_numbers = #tpu.dot_dimension_numbers<[1], [0], [0], [1], [0, 0, 1, 1], [], []>} : vector<8x896xbf16>, vector<896x512xbf16>, vector<8x512xf32> -> vector<8x512xf32>
    %c0_3 = arith.constant 0 : index
    %c0_4 = arith.constant 0 : index
    %4 = vector.load %arg3[%c0_3, %c0_4] : memref<1x512xf32, #tpu.memory_space<vmem>>, vector<1x512xf32>
    %5 = vector.broadcast %4 : vector<1x512xf32> to vector<8x512xf32>
    %6 = arith.addf %3, %5 : vector<8x512xf32>
    %cst_5 = arith.constant 0.000000e+00 : f32
    %7 = vector.broadcast %cst_5 : f32 to vector<8x512xf32>
    %8 = arith.maximumf %6, %7 : vector<8x512xf32>
    %9 = arith.truncf %8 : vector<8x512xf32> to vector<8x512xbf16>
    %c0_6 = arith.constant 0 : index
    %c0_7 = arith.constant 0 : index
    %10 = vector.load %arg4[%c0_6, %c0_7] : memref<512x512xbf16, #tpu.memory_space<vmem>>, vector<512x512xbf16>
    %cst_8 = arith.constant dense<0.000000e+00> : vector<8x512xf32>
    %11 = tpu.matmul %9, %10, %cst_8 {dimension_numbers = #tpu.dot_dimension_numbers<[1], [0], [0], [1], [0, 0, 1, 1], [], []>} : vector<8x512xbf16>, vector<512x512xbf16>, vector<8x512xf32> -> vector<8x512xf32>
    %c0_9 = arith.constant 0 : index
    %c0_10 = arith.constant 0 : index
    %12 = vector.load %arg5[%c0_9, %c0_10] : memref<1x512xf32, #tpu.memory_space<vmem>>, vector<1x512xf32>
    %13 = vector.broadcast %12 : vector<1x512xf32> to vector<8x512xf32>
    %14 = arith.addf %11, %13 : vector<8x512xf32>
    %cst_11 = arith.constant 0.000000e+00 : f32
    %15 = vector.broadcast %cst_11 : f32 to vector<8x512xf32>
    %16 = arith.maximumf %14, %15 : vector<8x512xf32>
    %17 = arith.truncf %16 : vector<8x512xf32> to vector<8x512xbf16>
    %c0_12 = arith.constant 0 : index
    %c0_13 = arith.constant 0 : index
    %18 = vector.load %arg6[%c0_12, %c0_13] : memref<512x512xbf16, #tpu.memory_space<vmem>>, vector<512x512xbf16>
    %cst_14 = arith.constant dense<0.000000e+00> : vector<8x512xf32>
    %19 = tpu.matmul %17, %18, %cst_14 {dimension_numbers = #tpu.dot_dimension_numbers<[1], [0], [0], [1], [0, 0, 1, 1], [], []>} : vector<8x512xbf16>, vector<512x512xbf16>, vector<8x512xf32> -> vector<8x512xf32>
    %c0_15 = arith.constant 0 : index
    %c0_16 = arith.constant 0 : index
    %20 = vector.load %arg7[%c0_15, %c0_16] : memref<1x512xf32, #tpu.memory_space<vmem>>, vector<1x512xf32>
    %21 = vector.broadcast %20 : vector<1x512xf32> to vector<8x512xf32>
    %22 = arith.addf %19, %21 : vector<8x512xf32>
    %cst_17 = arith.constant 0.000000e+00 : f32
    %23 = vector.broadcast %cst_17 : f32 to vector<8x512xf32>
    %24 = arith.maximumf %22, %23 : vector<8x512xf32>
    %25 = arith.truncf %24 : vector<8x512xf32> to vector<8x512xbf16>
    %c0_18 = arith.constant 0 : index
    %c0_19 = arith.constant 0 : index
    %26 = vector.load %arg8[%c0_18, %c0_19] : memref<512x128xbf16, #tpu.memory_space<vmem>>, vector<512x128xbf16>
    %cst_20 = arith.constant dense<0.000000e+00> : vector<8x128xf32>
    %27 = tpu.matmul %25, %26, %cst_20 {dimension_numbers = #tpu.dot_dimension_numbers<[1], [0], [0], [1], [0, 0, 1, 1], [], []>} : vector<8x512xbf16>, vector<512x128xbf16>, vector<8x128xf32> -> vector<8x128xf32>
    %c0_21 = arith.constant 0 : index
    %c0_22 = arith.constant 0 : index
    %28 = vector.load %arg9[%c0_21, %c0_22] : memref<1x128xf32, #tpu.memory_space<vmem>>, vector<1x128xf32>
    %29 = vector.broadcast %28 : vector<1x128xf32> to vector<8x128xf32>
    %30 = arith.addf %27, %29 : vector<8x128xf32>
    %c0_23 = arith.constant 0 : index
    %c0_24 = arith.constant 0 : index
    %31 = vector.load %arg10[%c0_23, %c0_24] : memref<8x128xf32, #tpu.memory_space<vmem>>, vector<8x128xf32>
    tpu.vector_store %arg10[%c0_23, %c0_24], %30 {strides = array<i32>} : memref<8x128xf32, #tpu.memory_space<vmem>>, vector<8x128xf32>,
    return
  }
  func.func @transform_0(%arg0: i32) -> (i32, i32) {
    %c0_i32 = arith.constant 0 : i32
    %c0_i32_0 = arith.constant 0 : i32
    return %arg0, %c0_i32 : i32, i32
  }
  func.func @transform_1(%arg0: i32) -> (i32, i32) {
    %c0_i32 = arith.constant 0 : i32
    %c0_i32_0 = arith.constant 0 : i32
    %c0_i32_1 = arith.constant 0 : i32
    return %c0_i32, %c0_i32_0 : i32, i32
  }
  func.func @transform_2(%arg0: i32) -> (i32, i32) {
    %c0_i32 = arith.constant 0 : i32
    %c0_i32_0 = arith.constant 0 : i32
    %c0_i32_1 = arith.constant 0 : i32
    return %c0_i32, %c0_i32_0 : i32, i32
  }
  func.func @transform_3(%arg0: i32) -> (i32, i32) {
    %c0_i32 = arith.constant 0 : i32
    %c0_i32_0 = arith.constant 0 : i32
    %c0_i32_1 = arith.constant 0 : i32
    return %c0_i32, %c0_i32_0 : i32, i32
  }
  func.func @transform_4(%arg0: i32) -> (i32, i32) {
    %c0_i32 = arith.constant 0 : i32
    %c0_i32_0 = arith.constant 0 : i32
    %c0_i32_1 = arith.constant 0 : i32
    return %c0_i32, %c0_i32_0 : i32, i32
  }
  func.func @transform_5(%arg0: i32) -> (i32, i32) {
    %c0_i32 = arith.constant 0 : i32
    %c0_i32_0 = arith.constant 0 : i32
    %c0_i32_1 = arith.constant 0 : i32
    return %c0_i32, %c0_i32_0 : i32, i32
  }
  func.func @transform_6(%arg0: i32) -> (i32, i32) {
    %c0_i32 = arith.constant 0 : i32
    %c0_i32_0 = arith.constant 0 : i32
    %c0_i32_1 = arith.constant 0 : i32
    return %c0_i32, %c0_i32_0 : i32, i32
  }
  func.func @transform_7(%arg0: i32) -> (i32, i32) {
    %c0_i32 = arith.constant 0 : i32
    %c0_i32_0 = arith.constant 0 : i32
    %c0_i32_1 = arith.constant 0 : i32
    return %c0_i32, %c0_i32_0 : i32, i32
  }
  func.func @transform_8(%arg0: i32) -> (i32, i32) {
    %c0_i32 = arith.constant 0 : i32
    %c0_i32_0 = arith.constant 0 : i32
    %c0_i32_1 = arith.constant 0 : i32
    return %c0_i32, %c0_i32_0 : i32, i32
  }
  func.func @transform_9(%arg0: i32) -> (i32, i32) {
    %c0_i32 = arith.constant 0 : i32
    %c0_i32_0 = arith.constant 0 : i32
    return %arg0, %c0_i32 : i32, i32
  }
}

</mosaic_0001>

<bundles_post_ra>
// kernel: fnn_forward.1
= control target key start
LH: loop header
LB: loop body
LE: loop exit
PB: predicated region body
PF: predicated region fallthrough
CT: control target
= control target key end

     0   :  { %14 = vsyncpa [#allocation3], 0  ;;  %s5785_s0 = inlined_call_operand.vmem [shape: f32[8,896], index: 0, kind: input, shape index: {}]   ;;  %s5786_s1 = inlined_call_operand.hbm [shape: bf16[896,512], index: 1, kind: input, shape index: {}]   ;;  %s5787_s2 = inlined_call_operand.vmem [shape: f32[1,512], index: 2, kind: input, shape index: {}]   ;;  %s5788_s3 = inlined_call_operand.hbm [shape: bf16[512,512], index: 3, kind: input, shape index: {}]   ;;  %s5789_s4 = inlined_call_operand.vmem [shape: f32[1,512], index: 4, kind: input, shape index: {}]   ;;  %s5790_s5 = inlined_call_operand.hbm [shape: bf16[512,512], index: 5, kind: input, shape index: {}]   ;;  %s5791_s6 = inlined_call_operand.vmem [shape: f32[1,512], index: 6, kind: input, shape index: {}]   ;;  %s5792_s7 = inlined_call_operand.vmem [shape: bf16[512,128], index: 7, kind: input, shape index: {}]   ;;  %s5793_s8 = inlined_call_operand.vmem [shape: f32[1,128], index: 8, kind: input, shape index: {}]   ;;  %s5794_s9 = inlined_call_operand.vmem [shape: f32[8,128], index: 9, kind: output, shape index: {}]  }
   0x1   :  { %15 = vsyncpa [#allocation5], 0  ;;  %s5501_s30 = smov [#allocation4]   ;;  %s5502_s11 = smov [#allocation2]  }
   0x2   :  { %s37_s10 = sshll.u32 %s5501_s30, 4  ;;  %s23_s12 = sshll.u32 %s5502_s11, 4  ;;  %s38_s10 = int_to_ptr.vmem [resolvable:$true] %s37_s10  ;;  %s5557_s12 = int_to_ptr.vmem [resolvable:$true] %s23_s12 }
   0x3   :  { %s5431_s15 = scalar_lea.hbm %s5788_s3, 16384 }
   0x4   :  { %p5432_p0 = scmp.ne.s32.totalorder %s5788_s3, %s5431_s15  ;;  %p5435_p1 = scmp.lt.u32.totalorder %s5431_s15, %s5788_s3 }
   0x6   :  { %p5437_p2 = pnand %p5435_p1, %p5432_p0 }
   0x8   :  { %5440 = shalt.err (!%p5437_p2)
}
   0x9   :  { %s5441_s20 = scalar_lea.vmem %s38_s10, 16384  ;;  %p5446_p4 = scmp.lt.s32.totalorder %s38_s10, %s38_s10 }
   0xa   :  { %p5442_p3 = scmp.ne.s32.totalorder %s38_s10, %s5441_s20  ;;  %p5447_p5 = scmp.lt.s32.totalorder %s5441_s20, %s5441_s20 }
   0xc   :  { %p5448_p6 = por %p5447_p5, %p5446_p4 }
   0xe   :  { %p5449_p7 = pnand %p5448_p6, %p5442_p3 }
  0x10   :  { %5452 = shalt.err (!%p5449_p7)
}
  0x11   :  { %s5503_s21 = smov 256   ;;  %s5504_s22 = smov 16  }
  0x12   :  { %43 = dma.hbm_to_vmem [thread:$0]  %s5788_s3, 16384, %s38_s10, [#allocation5], %s5503_s21, %s5503_s21, %s5504_s22  }
  0x13   :  { %s5453_s27 = scalar_lea.hbm %s5786_s1, 28672 }
  0x14   :  { %p5454_p8 = scmp.ne.s32.totalorder %s5786_s1, %s5453_s27  ;;  %p5457_p9 = scmp.lt.u32.totalorder %s5453_s27, %s5786_s1 }
  0x16   :  { %p5459_p10 = pnand %p5457_p9, %p5454_p8 }
  0x18   :  { %5462 = shalt.err (!%p5459_p10)
}
  0x19   :  { %s5463_s13 = scalar_lea.vmem %s5557_s12, 28672  ;;  %p5468_p12 = scmp.lt.s32.totalorder %s5557_s12, %s5557_s12 }
  0x1a   :  { %p5464_p11 = scmp.ne.s32.totalorder %s5557_s12, %s5463_s13  ;;  %p5469_p13 = scmp.lt.s32.totalorder %s5463_s13, %s5463_s13 }
  0x1c   :  { %p5470_p0 = por %p5469_p13, %p5468_p12 }
  0x1e   :  { %p5471_p1 = pnand %p5470_p0, %p5464_p11 }
  0x20   :  { %5474 = shalt.err (!%p5471_p1)
}
  0x21   :  { %29 = dma.hbm_to_vmem [thread:$0]  %s5786_s1, 28672, %s5557_s12, [#allocation3], %s5503_s21, %s5503_s21, %s5504_s22  }
  0x22   :  { %s5505_s14 = smov [#allocation6]   ;;  %s5475_s18 = scalar_lea.hbm %s5790_s5, 16384 }
  0x23   :  { %s51_s15 = sshll.u32 %s5505_s14, 4  ;;  %p5476_p2 = scmp.ne.s32.totalorder %s5790_s5, %s5475_s18  ;;  %s52_s15 = int_to_ptr.vmem [resolvable:$true] %s51_s15 }
  0x24   :  { %p5479_p3 = scmp.lt.u32.totalorder %s5475_s18, %s5790_s5 }
  0x26   :  { %p5481_p4 = pnand %p5479_p3, %p5476_p2 }
  0x28   :  { %5484 = shalt.err (!%p5481_p4)
}
  0x29   :  { %s5485_s25 = scalar_lea.vmem %s52_s15, 16384  ;;  %p5490_p6 = scmp.lt.s32.totalorder %s52_s15, %s52_s15 }
  0x2a   :  { %p5486_p5 = scmp.ne.s32.totalorder %s52_s15, %s5485_s25  ;;  %p5491_p7 = scmp.lt.s32.totalorder %s5485_s25, %s5485_s25 }
  0x2c   :  { %p5492_p8 = por %p5491_p7, %p5490_p6 }
  0x2e   :  { %p5493_p9 = pnand %p5492_p8, %p5486_p5 }
  0x30   :  { %5496 = shalt.err (!%p5493_p9)
}
  0x31   :  { %57 = dma.hbm_to_vmem [thread:$0]  %s5790_s5, 16384, %s52_s15, [#allocation5], %s5503_s21, %s5503_s21, %s5504_s22  }
  0x32   :  { %5497 = dma.done.wait [#allocation3], 28672  }
  0x33   :  { %5498 = vsyncadd [#allocation3], 4294938624 }
  0x34   :  { %5499 = dma.done.wait [#allocation5], 32768  }
  0x35   :  { %5500 = vsyncadd [#allocation5], 4294934528  ;;  %v4679_v0 = vld [vmem:[#allocation2 + $0x4] ss:$16 sps:$4 sm:$0xff]   ;;  %v4681_v1 = vld [vmem:[#allocation2 + $0xc] ss:$16 sps:$4 sm:$0xff]  }
  0x36   :  { %1454 = vmatprep.subr.bf16.mxu0 %v4679_v0  ;;  %v4683_v2 = vld [vmem:[#allocation2] ss:$16 sps:$4 sm:$0xff]   ;;  %v4684_v3 = vld [vmem:[#allocation2 + $0x8] ss:$16 sps:$4 sm:$0xff]   ;;  %1618 = vmatprep.subr.bf16.mxu1 %v4681_v1  ;;  %v4685_v4 = vld [vmem:[#allocation2 + $0x24] ss:$16 sps:$4 sm:$0xff]  }
  0x37   :  { %1455 = vmatpush1.bf16.msra.mxu0 %v4683_v2  ;;  %1619 = vmatpush1.bf16.msra.mxu1 %v4684_v3  ;;  %v4687_v5 = vld [vmem:[#allocation2 + $0x2c] ss:$16 sps:$4 sm:$0xff]   ;;  %v4689_v6 = vld [vmem:[#allocation2 + $0x20] ss:$16 sps:$4 sm:$0xff]   ;;  %v4690_v7 = vld [vmem:[#allocation2 + $0x28] ss:$16 sps:$4 sm:$0xff]  }
  0x38   :  { %1456 = vmatprep.subr.bf16.mxu0 %v4685_v4  ;;  %1620 = vmatprep.subr.bf16.mxu1 %v4687_v5  ;;  %v4691_v8 = vld [vmem:[#allocation2 + $0x44] ss:$16 sps:$4 sm:$0xff]   ;;  %v4693_v9 = vld [vmem:[#allocation2 + $0x4c] ss:$16 sps:$4 sm:$0xff]   ;;  %v4695_v10 = vld [vmem:[#allocation2 + $0x40] ss:$16 sps:$4 sm:$0xff]  }
  0x39   :  { %v4696_v11 = vld [vmem:[#allocation2 + $0x48] ss:$16 sps:$4 sm:$0xff]   ;;  %v4697_v12 = vld [vmem:[#allocation2 + $0x64] ss:$16 sps:$4 sm:$0xff]   ;;  %v4699_v13 = vld [vmem:[#allocation2 + $0x6c] ss:$16 sps:$4 sm:$0xff]  }
  0x3a   :  { %v4701_v14 = vld [vmem:[#allocation2 + $0x60] ss:$16 sps:$4 sm:$0xff]   ;;  %v4702_v15 = vld [vmem:[#allocation2 + $0x68] ss:$16 sps:$4 sm:$0xff]   ;;  %v4703_v16 = vld [vmem:[#allocation2 + $0x84] ss:$16 sps:$4 sm:$0xff]  }
  0x3b   :  { %1457 = vmatpush1.bf16.msra.mxu0 %v4689_v6  ;;  %1621 = vmatpush1.bf16.msra.mxu1 %v4690_v7  ;;  %v4705_v17 = vld [vmem:[#allocation2 + $0x8c] ss:$16 sps:$4 sm:$0xff]   ;;  %v4707_v18 = vld [vmem:[#allocation2 + $0x80] ss:$16 sps:$4 sm:$0xff]   ;;  %v4708_v19 = vld [vmem:[#allocation2 + $0x88] ss:$16 sps:$4 sm:$0xff]  }
  0x3c   :  { %1458 = vmatprep.subr.bf16.mxu0 %v4691_v8  ;;  %1622 = vmatprep.subr.bf16.mxu1 %v4693_v9  ;;  %v4709_v20 = vld [vmem:[#allocation2 + $0xa4] ss:$16 sps:$4 sm:$0xff]   ;;  %v4711_v21 = vld [vmem:[#allocation2 + $0xac] ss:$16 sps:$4 sm:$0xff]   ;;  %v4713_v22 = vld [vmem:[#allocation2 + $0xa0] ss:$16 sps:$4 sm:$0xff]  }
  0x3d   :  { %v4714_v23 = vld [vmem:[#allocation2 + $0xa8] ss:$16 sps:$4 sm:$0xff]   ;;  %v4715_v24 = vld [vmem:[#allocation2 + $0xc4] ss:$16 sps:$4 sm:$0xff]   ;;  %v4717_v25 = vld [vmem:[#allocation2 + $0xcc] ss:$16 sps:$4 sm:$0xff]  }
  0x3e   :  { %v4719_v26 = vld [vmem:[#allocation2 + $0xc0] ss:$16 sps:$4 sm:$0xff]   ;;  %v4720_v27 = vld [vmem:[#allocation2 + $0xc8] ss:$16 sps:$4 sm:$0xff]   ;;  %v4721_v28 = vld [vmem:[#allocation2 + $0xe4] ss:$16 sps:$4 sm:$0xff]  }
  0x3f   :  { %1459 = vmatpush1.bf16.msra.mxu0 %v4695_v10  ;;  %1623 = vmatpush1.bf16.msra.mxu1 %v4696_v11  ;;  %v4723_v29 = vld [vmem:[#allocation2 + $0xec] ss:$16 sps:$4 sm:$0xff]   ;;  %v4725_v30 = vld [vmem:[#allocation2 + $0xe0] ss:$16 sps:$4 sm:$0xff]   ;;  %v4726_v31 = vld [vmem:[#allocation2 + $0xe8] ss:$16 sps:$4 sm:$0xff]  }
  0x40   :  { %1460 = vmatprep.subr.bf16.mxu0 %v4697_v12  ;;  %1624 = vmatprep.subr.bf16.mxu1 %v4699_v13  ;;  %v4727_v32 = vld [vmem:[#allocation2 + $0x104] ss:$16 sps:$4 sm:$0xff]   ;;  %v4729_v33 = vld [vmem:[#allocation2 + $0x10c] ss:$16 sps:$4 sm:$0xff]   ;;  %v4731_v34 = vld [vmem:[#allocation2 + $0x100] ss:$16 sps:$4 sm:$0xff]  }
  0x41   :  { %v4732_v35 = vld [vmem:[#allocation2 + $0x108] ss:$16 sps:$4 sm:$0xff]   ;;  %v4733_v36 = vld [vmem:[#allocation2 + $0x124] ss:$16 sps:$4 sm:$0xff]   ;;  %v4735_v37 = vld [vmem:[#allocation2 + $0x12c] ss:$16 sps:$4 sm:$0xff]  }
  0x42   :  { %v4737_v38 = vld [vmem:[#allocation2 + $0x120] ss:$16 sps:$4 sm:$0xff]   ;;  %v4738_v39 = vld [vmem:[#allocation2 + $0x128] ss:$16 sps:$4 sm:$0xff]   ;;  %v4739_v40 = vld [vmem:[#allocation2 + $0x144] ss:$16 sps:$4 sm:$0xff]  }
  0x43   :  { %1461 = vmatpush1.bf16.msra.mxu0 %v4701_v14  ;;  %1625 = vmatpush1.bf16.msra.mxu1 %v4702_v15  ;;  %v4741_v41 = vld [vmem:[#allocation2 + $0x14c] ss:$16 sps:$4 sm:$0xff]   ;;  %v4743_v42 = vld [vmem:[#allocation2 + $0x140] ss:$16 sps:$4 sm:$0xff]   ;;  %v4744_v43 = vld [vmem:[#allocation2 + $0x148] ss:$16 sps:$4 sm:$0xff]  }
  0x44   :  { %1462 = vmatprep.subr.bf16.mxu0 %v4703_v16  ;;  %1626 = vmatprep.subr.bf16.mxu1 %v4705_v17  ;;  %v4745_v44 = vld [vmem:[#allocation2 + $0x164] ss:$16 sps:$4 sm:$0xff]   ;;  %v4747_v45 = vld [vmem:[#allocation2 + $0x16c] ss:$16 sps:$4 sm:$0xff]   ;;  %v4749_v47 = vld [vmem:[#allocation2 + $0x160] ss:$16 sps:$4 sm:$0xff]  }
  0x45   :  { %v75_v46 = vld [vmem:[%s5785_s0 + $0x8] sm:$0xff]  ;;  %v4751_v50 = vld [vmem:[#allocation2 + $0x184] ss:$16 sps:$4 sm:$0xff]   ;;  %v4755_v52 = vld [vmem:[#allocation2 + $0x180] ss:$16 sps:$4 sm:$0xff]  }
  0x46   :  { %v82_v48 = vpack.c.bf16 %v75_v46, %v75_v46  ;;  %v4750_v49 = vld [vmem:[#allocation2 + $0x168] ss:$16 sps:$4 sm:$0xff]   ;;  %v4753_v51 = vld [vmem:[#allocation2 + $0x18c] ss:$16 sps:$4 sm:$0xff]   ;;  %v4757_v54 = vld [vmem:[#allocation2 + $0x1a4] ss:$16 sps:$4 sm:$0xff]  }
  0x47   :  { %1463 = vmatpush1.bf16.msra.mxu0 %v4707_v18  ;;  %1627 = vmatpush1.bf16.msra.mxu1 %v4708_v19  ;;  %v4756_v53 = vld [vmem:[#allocation2 + $0x188] ss:$16 sps:$4 sm:$0xff]   ;;  %v4759_v55 = vld [vmem:[#allocation2 + $0x1ac] ss:$16 sps:$4 sm:$0xff]   ;;  %v4761_v56 = vld [vmem:[#allocation2 + $0x1a0] ss:$16 sps:$4 sm:$0xff]  }
  0x48   :  { %1464 = vmatprep.subr.bf16.mxu0 %v4709_v20  ;;  %1628 = vmatprep.subr.bf16.mxu1 %v4711_v21  ;;  %v4762_v57 = vld [vmem:[#allocation2 + $0x1a8] ss:$16 sps:$4 sm:$0xff]   ;;  %v4763_v58 = vld [vmem:[#allocation2 + $0x1c4] ss:$16 sps:$4 sm:$0xff]   ;;  %v4765_v59 = vld [vmem:[#allocation2 + $0x1cc] ss:$16 sps:$4 sm:$0xff]  }
  0x49   :  { %1486 = vmatprep.mubr.bf16.mxu0 %v82_v48  ;;  %1650 = vmatprep.mubr.bf16.mxu1 %v82_v48  ;;  %v4767_v60 = vld [vmem:[#allocation2 + $0x1c0] ss:$16 sps:$4 sm:$0xff]   ;;  %v4768_v61 = vld [vmem:[#allocation2 + $0x1c8] ss:$16 sps:$4 sm:$0xff]   ;;  %v4769_v62 = vld [vmem:[#allocation2 + $0x1e4] ss:$16 sps:$4 sm:$0xff]  }
  0x4a   :  { %v4771_v63 = vld [vmem:[#allocation2 + $0x1ec] ss:$16 sps:$4 sm:$0xff]   ;;  %v4773_v0 = vld [vmem:[#allocation2 + $0x1e0] ss:$16 sps:$4 sm:$0xff]   ;;  %v4774_v1 = vld [vmem:[#allocation2 + $0x1e8] ss:$16 sps:$4 sm:$0xff]  }
  0x4b   :  { %1465 = vmatpush1.bf16.msra.mxu0 %v4713_v22  ;;  %1629 = vmatpush1.bf16.msra.mxu1 %v4714_v23  ;;  %v74_v2 = vld [vmem:[%s5785_s0] sm:$0xff]  ;;  %v4780_v4 = vld [vmem:[#allocation2 + $0x20c] ss:$16 sps:$4 sm:$0xff]   ;;  %v4778_v7 = vld [vmem:[#allocation2 + $0x208] ss:$16 sps:$4 sm:$0xff]  }
  0x4c   :  { %1466 = vmatprep.subr.bf16.mxu0 %v4715_v24  ;;  %1630 = vmatprep.subr.bf16.mxu1 %v4717_v25  ;;  %v4777_v3 = vld [vmem:[#allocation2 + $0x204] ss:$16 sps:$4 sm:$0xff]   ;;  %v81_v5 = vpack.c.bf16 %v74_v2, %v74_v2  ;;  %v4775_v6 = vld [vmem:[#allocation2 + $0x200] ss:$16 sps:$4 sm:$0xff]   ;;  %v4786_v9 = vld [vmem:[#allocation2 + $0x22c] ss:$16 sps:$4 sm:$0xff]  }
  0x4d   :  { %v4783_v8 = vld [vmem:[#allocation2 + $0x224] ss:$16 sps:$4 sm:$0xff]   ;;  %v4781_v10 = vld [vmem:[#allocation2 + $0x220] ss:$16 sps:$4 sm:$0xff]   ;;  %v4784_v11 = vld [vmem:[#allocation2 + $0x228] ss:$16 sps:$4 sm:$0xff]  }
  0x4e   :  { %v4789_v12 = vld [vmem:[#allocation2 + $0x244] ss:$16 sps:$4 sm:$0xff]   ;;  %v4792_v13 = vld [vmem:[#allocation2 + $0x24c] ss:$16 sps:$4 sm:$0xff]   ;;  %v4787_v14 = vld [vmem:[#allocation2 + $0x240] ss:$16 sps:$4 sm:$0xff]  }
  0x4f   :  { %1467 = vmatpush1.bf16.msra.mxu0 %v4719_v26  ;;  %1631 = vmatpush1.bf16.msra.mxu1 %v4720_v27  ;;  %v4790_v15 = vld [vmem:[#allocation2 + $0x248] ss:$16 sps:$4 sm:$0xff]   ;;  %v4795_v16 = vld [vmem:[#allocation2 + $0x264] ss:$16 sps:$4 sm:$0xff]   ;;  %v4798_v17 = vld [vmem:[#allocation2 + $0x26c] ss:$16 sps:$4 sm:$0xff]  }
  0x50   :  { %1468 = vmatprep.subr.bf16.mxu0 %v4721_v28  ;;  %1632 = vmatprep.subr.bf16.mxu1 %v4723_v29  ;;  %v4793_v18 = vld [vmem:[#allocation2 + $0x260] ss:$16 sps:$4 sm:$0xff]   ;;  %v4796_v19 = vld [vmem:[#allocation2 + $0x268] ss:$16 sps:$4 sm:$0xff]   ;;  %v4801_v20 = vld [vmem:[#allocation2 + $0x284] ss:$16 sps:$4 sm:$0xff]  }
  0x51   :  { %v4804_v21 = vld [vmem:[#allocation2 + $0x28c] ss:$16 sps:$4 sm:$0xff]   ;;  %v4799_v22 = vld [vmem:[#allocation2 + $0x280] ss:$16 sps:$4 sm:$0xff]   ;;  %v4802_v23 = vld [vmem:[#allocation2 + $0x288] ss:$16 sps:$4 sm:$0xff]  }
  0x52   :  { %v4807_v24 = vld [vmem:[#allocation2 + $0x2a4] ss:$16 sps:$4 sm:$0xff]   ;;  %v4810_v25 = vld [vmem:[#allocation2 + $0x2ac] ss:$16 sps:$4 sm:$0xff]   ;;  %v4805_v26 = vld [vmem:[#allocation2 + $0x2a0] ss:$16 sps:$4 sm:$0xff]  }
  0x53   :  { %1469 = vmatpush1.bf16.msra.mxu0 %v4725_v30  ;;  %1633 = vmatpush1.bf16.msra.mxu1 %v4726_v31  ;;  %v4808_v27 = vld [vmem:[#allocation2 + $0x2a8] ss:$16 sps:$4 sm:$0xff]   ;;  %v4813_v28 = vld [vmem:[#allocation2 + $0x2c4] ss:$16 sps:$4 sm:$0xff]   ;;  %v4816_v29 = vld [vmem:[#allocation2 + $0x2cc] ss:$16 sps:$4 sm:$0xff]  }
  0x54   :  { %1470 = vmatprep.subr.bf16.mxu0 %v4727_v32  ;;  %1634 = vmatprep.subr.bf16.mxu1 %v4729_v33  ;;  %v77_v30 = vld [vmem:[%s5785_s0 + $0x18] sm:$0xff]  ;;  %v4811_v31 = vld [vmem:[#allocation2 + $0x2c0] ss:$16 sps:$4 sm:$0xff]   ;;  %v4837_v46 = vld [vmem:[#allocation2 + $0x344] ss:$16 sps:$4 sm:$0xff]  }
  0x55   :  { %v84_v32 = vpack.c.bf16 %v77_v30, %v77_v30  ;;  %v4814_v33 = vld [vmem:[#allocation2 + $0x2c8] ss:$16 sps:$4 sm:$0xff]   ;;  %v4835_v48 = vld [vmem:[#allocation2 + $0x340] ss:$16 sps:$4 sm:$0xff]   ;;  %v4867_v2 = vld [vmem:[#allocation2 + $0x3e4] ss:$16 sps:$4 sm:$0xff]  }
  0x56   :  { %v4903_v30 = vld [vmem:[#allocation2 + $0x4a4] ss:$16 sps:$4 sm:$0xff]  }
  0x57   :  { %1471 = vmatpush1.bf16.msra.mxu0 %v4731_v34  ;;  %1635 = vmatpush1.bf16.msra.mxu1 %v4732_v35  ;;  %v4819_v34 = vld [vmem:[#allocation2 + $0x2e4] ss:$16 sps:$4 sm:$0xff]   ;;  %v4822_v35 = vld [vmem:[#allocation2 + $0x2ec] ss:$16 sps:$4 sm:$0xff]  }
  0x58   :  { %1472 = vmatprep.subr.bf16.mxu0 %v4733_v36  ;;  %1636 = vmatprep.subr.bf16.mxu1 %v4735_v37  ;;  %v4817_v36 = vld [vmem:[#allocation2 + $0x2e0] ss:$16 sps:$4 sm:$0xff]   ;;  %v4820_v37 = vld [vmem:[#allocation2 + $0x2e8] ss:$16 sps:$4 sm:$0xff]  }
  0x5b   :  { %1473 = vmatpush1.bf16.msra.mxu0 %v4737_v38  ;;  %1637 = vmatpush1.bf16.msra.mxu1 %v4738_v39  ;;  %v4825_v38 = vld [vmem:[#allocation2 + $0x304] ss:$16 sps:$4 sm:$0xff]   ;;  %v4828_v39 = vld [vmem:[#allocation2 + $0x30c] ss:$16 sps:$4 sm:$0xff]  }
  0x5c   :  { %1474 = vmatprep.subr.bf16.mxu0 %v4739_v40  ;;  %1638 = vmatprep.subr.bf16.mxu1 %v4741_v41  ;;  %v4823_v40 = vld [vmem:[#allocation2 + $0x300] ss:$16 sps:$4 sm:$0xff]   ;;  %v4826_v41 = vld [vmem:[#allocation2 + $0x308] ss:$16 sps:$4 sm:$0xff]  }
  0x5f   :  { %1475 = vmatpush1.bf16.msra.mxu0 %v4743_v42  ;;  %1639 = vmatpush1.bf16.msra.mxu1 %v4744_v43  ;;  %v4831_v42 = vld [vmem:[#allocation2 + $0x324] ss:$16 sps:$4 sm:$0xff]   ;;  %v4834_v43 = vld [vmem:[#allocation2 + $0x32c] ss:$16 sps:$4 sm:$0xff]  }
  0x60   :  { %1476 = vmatprep.subr.bf16.mxu0 %v4745_v44  ;;  %1640 = vmatprep.subr.bf16.mxu1 %v4747_v45  ;;  %v4829_v44 = vld [vmem:[#allocation2 + $0x320] ss:$16 sps:$4 sm:$0xff]   ;;  %v4832_v45 = vld [vmem:[#allocation2 + $0x328] ss:$16 sps:$4 sm:$0xff]  }
  0x63   :  { %1477 = vmatpush1.bf16.msra.mxu0 %v4749_v47  ;;  %1641 = vmatpush1.bf16.msra.mxu1 %v4750_v49  ;;  %v4840_v47 = vld [vmem:[#allocation2 + $0x34c] ss:$16 sps:$4 sm:$0xff]   ;;  %v4838_v49 = vld [vmem:[#allocation2 + $0x348] ss:$16 sps:$4 sm:$0xff]  }
  0x64   :  { %1478 = vmatprep.subr.bf16.mxu0 %v4751_v50  ;;  %1642 = vmatprep.subr.bf16.mxu1 %v4753_v51  ;;  %v4843_v50 = vld [vmem:[#allocation2 + $0x364] ss:$16 sps:$4 sm:$0xff]   ;;  %v4846_v51 = vld [vmem:[#allocation2 + $0x36c] ss:$16 sps:$4 sm:$0xff]  }
  0x67   :  { %1479 = vmatpush1.bf16.msra.mxu0 %v4755_v52  ;;  %1643 = vmatpush1.bf16.msra.mxu1 %v4756_v53  ;;  %v4841_v52 = vld [vmem:[#allocation2 + $0x360] ss:$16 sps:$4 sm:$0xff]   ;;  %v4844_v53 = vld [vmem:[#allocation2 + $0x368] ss:$16 sps:$4 sm:$0xff]  }
  0x68   :  { %1480 = vmatprep.subr.bf16.mxu0 %v4757_v54  ;;  %1644 = vmatprep.subr.bf16.mxu1 %v4759_v55  ;;  %v4849_v54 = vld [vmem:[#allocation2 + $0x384] ss:$16 sps:$4 sm:$0xff]   ;;  %v4852_v55 = vld [vmem:[#allocation2 + $0x38c] ss:$16 sps:$4 sm:$0xff]  }
  0x6b   :  { %1481 = vmatpush1.bf16.msra.mxu0 %v4761_v56  ;;  %1645 = vmatpush1.bf16.msra.mxu1 %v4762_v57  ;;  %v4847_v56 = vld [vmem:[#allocation2 + $0x380] ss:$16 sps:$4 sm:$0xff]   ;;  %v4850_v57 = vld [vmem:[#allocation2 + $0x388] ss:$16 sps:$4 sm:$0xff]  }
  0x6c   :  { %1482 = vmatprep.subr.bf16.mxu0 %v4763_v58  ;;  %1646 = vmatprep.subr.bf16.mxu1 %v4765_v59  ;;  %v4855_v58 = vld [vmem:[#allocation2 + $0x3a4] ss:$16 sps:$4 sm:$0xff]   ;;  %v4858_v59 = vld [vmem:[#allocation2 + $0x3ac] ss:$16 sps:$4 sm:$0xff]  }
  0x6f   :  { %1483 = vmatpush1.bf16.msra.mxu0 %v4767_v60  ;;  %1647 = vmatpush1.bf16.msra.mxu1 %v4768_v61  ;;  %v4853_v60 = vld [vmem:[#allocation2 + $0x3a0] ss:$16 sps:$4 sm:$0xff]   ;;  %v4856_v61 = vld [vmem:[#allocation2 + $0x3a8] ss:$16 sps:$4 sm:$0xff]  }
  0x70   :  { %1484 = vmatprep.subr.bf16.mxu0 %v4769_v62  ;;  %1648 = vmatprep.subr.bf16.mxu1 %v4771_v63  ;;  %v4861_v62 = vld [vmem:[#allocation2 + $0x3c4] ss:$16 sps:$4 sm:$0xff]   ;;  %v4864_v63 = vld [vmem:[#allocation2 + $0x3cc] ss:$16 sps:$4 sm:$0xff]  }
  0x73   :  { %1485 = vmatpush1.bf16.msra.mxu0 %v4773_v0  ;;  %1649 = vmatpush1.bf16.msra.mxu1 %v4774_v1  ;;  %v4859_v0 = vld [vmem:[#allocation2 + $0x3c0] ss:$16 sps:$4 sm:$0xff]   ;;  %v4862_v1 = vld [vmem:[#allocation2 + $0x3c8] ss:$16 sps:$4 sm:$0xff]  }
  0x74   :  { %1495 = vmatprep.subr.bf16.mxu0 %v4777_v3  ;;  %1659 = vmatprep.subr.bf16.mxu1 %v4780_v4  ;;  %v4870_v3 = vld [vmem:[#allocation2 + $0x3ec] ss:$16 sps:$4 sm:$0xff]   ;;  %v4865_v4 = vld [vmem:[#allocation2 + $0x3e0] ss:$16 sps:$4 sm:$0xff]  }
  0x76   :  { %1487 = vmatmul.mubr.bf16.vlgmr.msra.gmra.mrb[0].mxu0 %v81_v5  ;;  %1651 = vmatmul.mubr.bf16.vlgmr.msra.gmra.mrb[0].mxu1 %v81_v5  ;;  %v4868_v5 = vld [vmem:[#allocation2 + $0x3e8] ss:$16 sps:$4 sm:$0xff]  }
  0x77   :  { %1496 = vmatpush1.bf16.msra.mxu0 %v4775_v6  ;;  %1660 = vmatpush1.bf16.msra.mxu1 %v4778_v7  ;;  %v4873_v6 = vld [vmem:[#allocation2 + $0x404] ss:$16 sps:$4 sm:$0xff]  }
  0x78   :  { %1497 = vmatprep.subr.bf16.mxu0 %v4783_v8  ;;  %1661 = vmatprep.subr.bf16.mxu1 %v4786_v9  ;;  %v76_v7 = vld [vmem:[%s5785_s0 + $0x10] sm:$0xff]  ;;  %v4876_v8 = vld [vmem:[#allocation2 + $0x40c] ss:$16 sps:$4 sm:$0xff]  }
  0x79   :  { %1527 = vmatprep.mubr.bf16.mxu0 %v84_v32  ;;  %1691 = vmatprep.mubr.bf16.mxu1 %v84_v32  ;;  %v4871_v9 = vld [vmem:[#allocation2 + $0x400] ss:$16 sps:$4 sm:$0xff]  }
  0x7a   :  { %v4901_v32 = vld [vmem:[#allocation2 + $0x4a0] ss:$16 sps:$4 sm:$0xff]  }
  0x7b   :  { %1498 = vmatpush1.bf16.msra.mxu0 %v4781_v10  ;;  %1662 = vmatpush1.bf16.msra.mxu1 %v4784_v11  ;;  %v4874_v10 = vld [vmem:[#allocation2 + $0x408] ss:$16 sps:$4 sm:$0xff]   ;;  %v83_v11 = vpack.c.bf16 %v76_v7, %v76_v7  ;;  %v4966_v7 = vld [vmem:[#allocation2 + $0x5ec] ss:$16 sps:$4 sm:$0xff]  }
  0x7c   :  { %1499 = vmatprep.subr.bf16.mxu0 %v4789_v12  ;;  %1663 = vmatprep.subr.bf16.mxu1 %v4792_v13  ;;  %v4879_v12 = vld [vmem:[#allocation2 + $0x424] ss:$16 sps:$4 sm:$0xff]   ;;  %v4882_v13 = vld [vmem:[#allocation2 + $0x42c] ss:$16 sps:$4 sm:$0xff]  }
  0x7f   :  { %1500 = vmatpush1.bf16.msra.mxu0 %v4787_v14  ;;  %1664 = vmatpush1.bf16.msra.mxu1 %v4790_v15  ;;  %v79_v14 = vld [vmem:[%s5785_s0 + $0x28] sm:$0xff] }
  0x80   :  { %1501 = vmatprep.subr.bf16.mxu0 %v4795_v16  ;;  %1665 = vmatprep.subr.bf16.mxu1 %v4798_v17  ;;  %v86_v15 = vpack.c.bf16 %v79_v14, %v79_v14  ;;  %v4877_v16 = vld [vmem:[#allocation2 + $0x420] ss:$16 sps:$4 sm:$0xff]   ;;  %v4880_v17 = vld [vmem:[#allocation2 + $0x428] ss:$16 sps:$4 sm:$0xff]  }
  0x81   :  { %v4970_v14 = vld [vmem:[#allocation2 + $0x608] ss:$16 sps:$4 sm:$0xff]  }
  0x83   :  { %1502 = vmatpush1.bf16.msra.mxu0 %v4793_v18  ;;  %1666 = vmatpush1.bf16.msra.mxu1 %v4796_v19  ;;  %v4885_v18 = vld [vmem:[#allocation2 + $0x444] ss:$16 sps:$4 sm:$0xff]   ;;  %v4888_v19 = vld [vmem:[#allocation2 + $0x44c] ss:$16 sps:$4 sm:$0xff]  }
  0x84   :  { %1503 = vmatprep.subr.bf16.mxu0 %v4801_v20  ;;  %1667 = vmatprep.subr.bf16.mxu1 %v4804_v21  ;;  %v4883_v20 = vld [vmem:[#allocation2 + $0x440] ss:$16 sps:$4 sm:$0xff]   ;;  %v4886_v21 = vld [vmem:[#allocation2 + $0x448] ss:$16 sps:$4 sm:$0xff]  }
  0x87   :  { %1504 = vmatpush1.bf16.msra.mxu0 %v4799_v22  ;;  %1668 = vmatpush1.bf16.msra.mxu1 %v4802_v23  ;;  %v4891_v22 = vld [vmem:[#allocation2 + $0x464] ss:$16 sps:$4 sm:$0xff]   ;;  %v4894_v23 = vld [vmem:[#allocation2 + $0x46c] ss:$16 sps:$4 sm:$0xff]  }
  0x88   :  { %1505 = vmatprep.subr.bf16.mxu0 %v4807_v24  ;;  %1669 = vmatprep.subr.bf16.mxu1 %v4810_v25  ;;  %v4889_v24 = vld [vmem:[#allocation2 + $0x460] ss:$16 sps:$4 sm:$0xff]   ;;  %v4892_v25 = vld [vmem:[#allocation2 + $0x468] ss:$16 sps:$4 sm:$0xff]  }
  0x8b   :  { %1506 = vmatpush1.bf16.msra.mxu0 %v4805_v26  ;;  %1670 = vmatpush1.bf16.msra.mxu1 %v4808_v27  ;;  %v4897_v26 = vld [vmem:[#allocation2 + $0x484] ss:$16 sps:$4 sm:$0xff]   ;;  %v4900_v27 = vld [vmem:[#allocation2 + $0x48c] ss:$16 sps:$4 sm:$0xff]  }
  0x8c   :  { %1507 = vmatprep.subr.bf16.mxu0 %v4813_v28  ;;  %1671 = vmatprep.subr.bf16.mxu1 %v4816_v29  ;;  %v4895_v28 = vld [vmem:[#allocation2 + $0x480] ss:$16 sps:$4 sm:$0xff]   ;;  %v4898_v29 = vld [vmem:[#allocation2 + $0x488] ss:$16 sps:$4 sm:$0xff]  }
  0x8f   :  { %1508 = vmatpush1.bf16.msra.mxu0 %v4811_v31  ;;  %1672 = vmatpush1.bf16.msra.mxu1 %v4814_v33  ;;  %v4906_v31 = vld [vmem:[#allocation2 + $0x4ac] ss:$16 sps:$4 sm:$0xff]   ;;  %v4904_v33 = vld [vmem:[#allocation2 + $0x4a8] ss:$16 sps:$4 sm:$0xff]  }
  0x90   :  { %1509 = vmatprep.subr.bf16.mxu0 %v4819_v34  ;;  %1673 = vmatprep.subr.bf16.mxu1 %v4822_v35  ;;  %v4909_v34 = vld [vmem:[#allocation2 + $0x4c4] ss:$16 sps:$4 sm:$0xff]   ;;  %v4912_v35 = vld [vmem:[#allocation2 + $0x4cc] ss:$16 sps:$4 sm:$0xff]  }
  0x93   :  { %1510 = vmatpush1.bf16.msra.mxu0 %v4817_v36  ;;  %1674 = vmatpush1.bf16.msra.mxu1 %v4820_v37  ;;  %v4907_v36 = vld [vmem:[#allocation2 + $0x4c0] ss:$16 sps:$4 sm:$0xff]   ;;  %v4910_v37 = vld [vmem:[#allocation2 + $0x4c8] ss:$16 sps:$4 sm:$0xff]  }
  0x94   :  { %1511 = vmatprep.subr.bf16.mxu0 %v4825_v38  ;;  %1675 = vmatprep.subr.bf16.mxu1 %v4828_v39  ;;  %v4915_v38 = vld [vmem:[#allocation2 + $0x4e4] ss:$16 sps:$4 sm:$0xff]   ;;  %v4918_v39 = vld [vmem:[#allocation2 + $0x4ec] ss:$16 sps:$4 sm:$0xff]  }
  0x97   :  { %1512 = vmatpush1.bf16.msra.mxu0 %v4823_v40  ;;  %1676 = vmatpush1.bf16.msra.mxu1 %v4826_v41  ;;  %v4913_v40 = vld [vmem:[#allocation2 + $0x4e0] ss:$16 sps:$4 sm:$0xff]   ;;  %v4916_v41 = vld [vmem:[#allocation2 + $0x4e8] ss:$16 sps:$4 sm:$0xff]  }
  0x98   :  { %1513 = vmatprep.subr.bf16.mxu0 %v4831_v42  ;;  %1677 = vmatprep.subr.bf16.mxu1 %v4834_v43  ;;  %v4921_v42 = vld [vmem:[#allocation2 + $0x504] ss:$16 sps:$4 sm:$0xff]   ;;  %v4924_v43 = vld [vmem:[#allocation2 + $0x50c] ss:$16 sps:$4 sm:$0xff]  }
  0x9b   :  { %1514 = vmatpush1.bf16.msra.mxu0 %v4829_v44  ;;  %1678 = vmatpush1.bf16.msra.mxu1 %v4832_v45  ;;  %v4919_v44 = vld [vmem:[#allocation2 + $0x500] ss:$16 sps:$4 sm:$0xff]   ;;  %v4922_v45 = vld [vmem:[#allocation2 + $0x508] ss:$16 sps:$4 sm:$0xff]  }
  0x9c   :  { %1515 = vmatprep.subr.bf16.mxu0 %v4837_v46  ;;  %1679 = vmatprep.subr.bf16.mxu1 %v4840_v47  ;;  %v4927_v46 = vld [vmem:[#allocation2 + $0x524] ss:$16 sps:$4 sm:$0xff]   ;;  %v4930_v47 = vld [vmem:[#allocation2 + $0x52c] ss:$16 sps:$4 sm:$0xff]  }
  0x9f   :  { %1516 = vmatpush1.bf16.msra.mxu0 %v4835_v48  ;;  %1680 = vmatpush1.bf16.msra.mxu1 %v4838_v49  ;;  %v4925_v48 = vld [vmem:[#allocation2 + $0x520] ss:$16 sps:$4 sm:$0xff]   ;;  %v4928_v49 = vld [vmem:[#allocation2 + $0x528] ss:$16 sps:$4 sm:$0xff]  }
  0xa0   :  { %1517 = vmatprep.subr.bf16.mxu0 %v4843_v50  ;;  %1681 = vmatprep.subr.bf16.mxu1 %v4846_v51  ;;  %v4933_v50 = vld [vmem:[#allocation2 + $0x544] ss:$16 sps:$4 sm:$0xff]   ;;  %v4936_v51 = vld [vmem:[#allocation2 + $0x54c] ss:$16 sps:$4 sm:$0xff]  }
  0xa3   :  { %1518 = vmatpush1.bf16.msra.mxu0 %v4841_v52  ;;  %1682 = vmatpush1.bf16.msra.mxu1 %v4844_v53  ;;  %v4931_v52 = vld [vmem:[#allocation2 + $0x540] ss:$16 sps:$4 sm:$0xff]   ;;  %v4934_v53 = vld [vmem:[#allocation2 + $0x548] ss:$16 sps:$4 sm:$0xff]  }
  0xa4   :  { %1519 = vmatprep.subr.bf16.mxu0 %v4849_v54  ;;  %1683 = vmatprep.subr.bf16.mxu1 %v4852_v55  ;;  %v4939_v54 = vld [vmem:[#allocation2 + $0x564] ss:$16 sps:$4 sm:$0xff]   ;;  %v4942_v55 = vld [vmem:[#allocation2 + $0x56c] ss:$16 sps:$4 sm:$0xff]  }
  0xa7   :  { %1520 = vmatpush1.bf16.msra.mxu0 %v4847_v56  ;;  %1684 = vmatpush1.bf16.msra.mxu1 %v4850_v57  ;;  %v4937_v56 = vld [vmem:[#allocation2 + $0x560] ss:$16 sps:$4 sm:$0xff]   ;;  %v4940_v57 = vld [vmem:[#allocation2 + $0x568] ss:$16 sps:$4 sm:$0xff]  }
  0xa8   :  { %1521 = vmatprep.subr.bf16.mxu0 %v4855_v58  ;;  %1685 = vmatprep.subr.bf16.mxu1 %v4858_v59  ;;  %v4945_v58 = vld [vmem:[#allocation2 + $0x584] ss:$16 sps:$4 sm:$0xff]   ;;  %v4948_v59 = vld [vmem:[#allocation2 + $0x58c] ss:$16 sps:$4 sm:$0xff]  }
  0xab   :  { %1522 = vmatpush1.bf16.msra.mxu0 %v4853_v60  ;;  %1686 = vmatpush1.bf16.msra.mxu1 %v4856_v61  ;;  %v4943_v60 = vld [vmem:[#allocation2 + $0x580] ss:$16 sps:$4 sm:$0xff]   ;;  %v4946_v61 = vld [vmem:[#allocation2 + $0x588] ss:$16 sps:$4 sm:$0xff]  }
  0xac   :  { %1523 = vmatprep.subr.bf16.mxu0 %v4861_v62  ;;  %1687 = vmatprep.subr.bf16.mxu1 %v4864_v63  ;;  %v4951_v62 = vld [vmem:[#allocation2 + $0x5a4] ss:$16 sps:$4 sm:$0xff]   ;;  %v4954_v63 = vld [vmem:[#allocation2 + $0x5ac] ss:$16 sps:$4 sm:$0xff]  }
  0xaf   :  { %1524 = vmatpush1.bf16.msra.mxu0 %v4859_v0  ;;  %1688 = vmatpush1.bf16.msra.mxu1 %v4862_v1  ;;  %v4949_v0 = vld [vmem:[#allocation2 + $0x5a0] ss:$16 sps:$4 sm:$0xff]   ;;  %v4952_v1 = vld [vmem:[#allocation2 + $0x5a8] ss:$16 sps:$4 sm:$0xff]  }
  0xb0   :  { %1525 = vmatprep.subr.bf16.mxu0 %v4867_v2  ;;  %1689 = vmatprep.subr.bf16.mxu1 %v4870_v3  ;;  %v4957_v2 = vld [vmem:[#allocation2 + $0x5c4] ss:$16 sps:$4 sm:$0xff]   ;;  %v4960_v3 = vld [vmem:[#allocation2 + $0x5cc] ss:$16 sps:$4 sm:$0xff]  }
  0xb3   :  { %1526 = vmatpush1.bf16.msra.mxu0 %v4865_v4  ;;  %1690 = vmatpush1.bf16.msra.mxu1 %v4868_v5  ;;  %v4955_v4 = vld [vmem:[#allocation2 + $0x5c0] ss:$16 sps:$4 sm:$0xff]   ;;  %v4958_v5 = vld [vmem:[#allocation2 + $0x5c8] ss:$16 sps:$4 sm:$0xff]  }
  0xb4   :  { %1536 = vmatprep.subr.bf16.mxu0 %v4873_v6  ;;  %1700 = vmatprep.subr.bf16.mxu1 %v4876_v8  ;;  %v4963_v6 = vld [vmem:[#allocation2 + $0x5e4] ss:$16 sps:$4 sm:$0xff]   ;;  %v4961_v8 = vld [vmem:[#allocation2 + $0x5e0] ss:$16 sps:$4 sm:$0xff]  }
  0xb6   :  { %1528 = vmatmul.mubr.bf16.vlgmr.msra.gmra.mrb[0].mxu0 %v83_v11  ;;  %1692 = vmatmul.mubr.bf16.vlgmr.msra.gmra.mrb[0].mxu1 %v83_v11  ;;  %v78_v11 = vld [vmem:[%s5785_s0 + $0x20] sm:$0xff] }
  0xb7   :  { %1537 = vmatpush1.bf16.msra.mxu0 %v4871_v9  ;;  %1701 = vmatpush1.bf16.msra.mxu1 %v4874_v10  ;;  %v4964_v9 = vld [vmem:[#allocation2 + $0x5e8] ss:$16 sps:$4 sm:$0xff]   ;;  %v4969_v10 = vld [vmem:[#allocation2 + $0x604] ss:$16 sps:$4 sm:$0xff]  }
  0xb8   :  { %1538 = vmatprep.subr.bf16.mxu0 %v4879_v12  ;;  %1702 = vmatprep.subr.bf16.mxu1 %v4882_v13  ;;  %v4972_v12 = vld [vmem:[#allocation2 + $0x60c] ss:$16 sps:$4 sm:$0xff]   ;;  %v4967_v13 = vld [vmem:[#allocation2 + $0x600] ss:$16 sps:$4 sm:$0xff]  }
  0xb9   :  { %1568 = vmatprep.mubr.bf16.mxu0 %v86_v15  ;;  %1732 = vmatprep.mubr.bf16.mxu1 %v86_v15  ;;  %v85_v15 = vpack.c.bf16 %v78_v11, %v78_v11  ;;  %v5059_v11 = vld [vmem:[#allocation4 + $0xe4] ss:$16 sps:$4 sm:$0xff]  }
  0xbb   :  { %1539 = vmatpush1.bf16.msra.mxu0 %v4877_v16  ;;  %1703 = vmatpush1.bf16.msra.mxu1 %v4880_v17  ;;  %v4975_v16 = vld [vmem:[#allocation2 + $0x624] ss:$16 sps:$4 sm:$0xff]   ;;  %v4978_v17 = vld [vmem:[#allocation2 + $0x62c] ss:$16 sps:$4 sm:$0xff]  }
  0xbc   :  { %1540 = vmatprep.subr.bf16.mxu0 %v4885_v18  ;;  %1704 = vmatprep.subr.bf16.mxu1 %v4888_v19  ;;  %v4973_v18 = vld [vmem:[#allocation2 + $0x620] ss:$16 sps:$4 sm:$0xff]   ;;  %v4976_v19 = vld [vmem:[#allocation2 + $0x628] ss:$16 sps:$4 sm:$0xff]  }
  0xbf   :  { %1541 = vmatpush1.bf16.msra.mxu0 %v4883_v20  ;;  %1705 = vmatpush1.bf16.msra.mxu1 %v4886_v21  ;;  %v4981_v20 = vld [vmem:[#allocation2 + $0x644] ss:$16 sps:$4 sm:$0xff]   ;;  %v4984_v21 = vld [vmem:[#allocation2 + $0x64c] ss:$16 sps:$4 sm:$0xff]  }
  0xc0   :  { %1542 = vmatprep.subr.bf16.mxu0 %v4891_v22  ;;  %1706 = vmatprep.subr.bf16.mxu1 %v4894_v23  ;;  %v4979_v22 = vld [vmem:[#allocation2 + $0x640] ss:$16 sps:$4 sm:$0xff]   ;;  %v4982_v23 = vld [vmem:[#allocation2 + $0x648] ss:$16 sps:$4 sm:$0xff]  }
  0xc3   :  { %1543 = vmatpush1.bf16.msra.mxu0 %v4889_v24  ;;  %1707 = vmatpush1.bf16.msra.mxu1 %v4892_v25  ;;  %v5506_v24 = vmov 0   ;;  %v4987_v25 = vld [vmem:[#allocation2 + $0x664] ss:$16 sps:$4 sm:$0xff]  }
  0xc4   :  { %1544 = vmatprep.subr.bf16.mxu0 %v4897_v26  ;;  %1708 = vmatprep.subr.bf16.mxu1 %v4900_v27  ;;  %v4990_v26 = vld [vmem:[#allocation2 + $0x66c] ss:$16 sps:$4 sm:$0xff]   ;;  %v4985_v27 = vld [vmem:[#allocation2 + $0x660] ss:$16 sps:$4 sm:$0xff]  }
  0xc7   :  { %1545 = vmatpush1.bf16.msra.mxu0 %v4895_v28  ;;  %1709 = vmatpush1.bf16.msra.mxu1 %v4898_v29  ;;  %v4988_v28 = vld [vmem:[#allocation2 + $0x668] ss:$16 sps:$4 sm:$0xff]   ;;  %v4993_v29 = vld [vmem:[#allocation2 + $0x684] ss:$16 sps:$4 sm:$0xff]  }
  0xc8   :  { %1546 = vmatprep.subr.bf16.mxu0 %v4903_v30  ;;  %1710 = vmatprep.subr.bf16.mxu1 %v4906_v31  ;;  %v4996_v30 = vld [vmem:[#allocation2 + $0x68c] ss:$16 sps:$4 sm:$0xff]   ;;  %v4991_v31 = vld [vmem:[#allocation2 + $0x680] ss:$16 sps:$4 sm:$0xff]  }
  0xcb   :  { %1547 = vmatpush1.bf16.msra.mxu0 %v4901_v32  ;;  %1711 = vmatpush1.bf16.msra.mxu1 %v4904_v33  ;;  %v4994_v32 = vld [vmem:[#allocation2 + $0x688] ss:$16 sps:$4 sm:$0xff]   ;;  %v4999_v33 = vld [vmem:[#allocation2 + $0x6a4] ss:$16 sps:$4 sm:$0xff]  }
  0xcc   :  { %1548 = vmatprep.subr.bf16.mxu0 %v4909_v34  ;;  %1712 = vmatprep.subr.bf16.mxu1 %v4912_v35  ;;  %v5002_v34 = vld [vmem:[#allocation2 + $0x6ac] ss:$16 sps:$4 sm:$0xff]   ;;  %v4997_v35 = vld [vmem:[#allocation2 + $0x6a0] ss:$16 sps:$4 sm:$0xff]  }
  0xcf   :  { %1549 = vmatpush1.bf16.msra.mxu0 %v4907_v36  ;;  %1713 = vmatpush1.bf16.msra.mxu1 %v4910_v37  ;;  %v5000_v36 = vld [vmem:[#allocation2 + $0x6a8] ss:$16 sps:$4 sm:$0xff]   ;;  %v5005_v37 = vld [vmem:[#allocation2 + $0x6c4] ss:$16 sps:$4 sm:$0xff]  }
  0xd0   :  { %1550 = vmatprep.subr.bf16.mxu0 %v4915_v38  ;;  %1714 = vmatprep.subr.bf16.mxu1 %v4918_v39  ;;  %v5008_v38 = vld [vmem:[#allocation2 + $0x6cc] ss:$16 sps:$4 sm:$0xff]   ;;  %v5003_v39 = vld [vmem:[#allocation2 + $0x6c0] ss:$16 sps:$4 sm:$0xff]  }
  0xd3   :  { %1551 = vmatpush1.bf16.msra.mxu0 %v4913_v40  ;;  %1715 = vmatpush1.bf16.msra.mxu1 %v4916_v41  ;;  %v5006_v40 = vld [vmem:[#allocation2 + $0x6c8] ss:$16 sps:$4 sm:$0xff]   ;;  %v5011_v41 = vld [vmem:[#allocation2 + $0x6e4] ss:$16 sps:$4 sm:$0xff]  }
  0xd4   :  { %1552 = vmatprep.subr.bf16.mxu0 %v4921_v42  ;;  %1716 = vmatprep.subr.bf16.mxu1 %v4924_v43  ;;  %v5014_v42 = vld [vmem:[#allocation2 + $0x6ec] ss:$16 sps:$4 sm:$0xff]   ;;  %v5009_v43 = vld [vmem:[#allocation2 + $0x6e0] ss:$16 sps:$4 sm:$0xff]  }
  0xd7   :  { %1553 = vmatpush1.bf16.msra.mxu0 %v4919_v44  ;;  %1717 = vmatpush1.bf16.msra.mxu1 %v4922_v45  ;;  %v5012_v44 = vld [vmem:[#allocation2 + $0x6e8] ss:$16 sps:$4 sm:$0xff]   ;;  %v80_v45 = vld [vmem:[%s5785_s0 + $0x30] sm:$0xff] }
  0xd8   :  { %1554 = vmatprep.subr.bf16.mxu0 %v4927_v46  ;;  %1718 = vmatprep.subr.bf16.mxu1 %v4930_v47  ;;  %v5017_v46 = vld [vmem:[#allocation4 + $0x4] ss:$16 sps:$4 sm:$0xff]   ;;  %v5020_v47 = vld [vmem:[#allocation4 + $0xc] ss:$16 sps:$4 sm:$0xff]  }
  0xdb   :  { %1555 = vmatpush1.bf16.msra.mxu0 %v4925_v48  ;;  %1719 = vmatpush1.bf16.msra.mxu1 %v4928_v49  ;;  %v5015_v48 = vld [vmem:[#allocation4] ss:$16 sps:$4 sm:$0xff]   ;;  %v5018_v49 = vld [vmem:[#allocation4 + $0x8] ss:$16 sps:$4 sm:$0xff]  }
  0xdc   :  { %1556 = vmatprep.subr.bf16.mxu0 %v4933_v50  ;;  %1720 = vmatprep.subr.bf16.mxu1 %v4936_v51  ;;  %v87_v50 = vpack.c.bf16 %v80_v45, %v80_v45  ;;  %v5023_v51 = vld [vmem:[#allocation4 + $0x24] ss:$16 sps:$4 sm:$0xff]   ;;  %v5105_v45 = vld [vmem:[#allocation4 + $0x1e0] ss:$16 sps:$4 sm:$0xff]  }
  0xdf   :  { %1557 = vmatpush1.bf16.msra.mxu0 %v4931_v52  ;;  %1721 = vmatpush1.bf16.msra.mxu1 %v4934_v53  ;;  %v5026_v52 = vld [vmem:[#allocation4 + $0x2c] ss:$16 sps:$4 sm:$0xff]   ;;  %v5021_v53 = vld [vmem:[#allocation4 + $0x20] ss:$16 sps:$4 sm:$0xff]  }
  0xe0   :  { %1558 = vmatprep.subr.bf16.mxu0 %v4939_v54  ;;  %1722 = vmatprep.subr.bf16.mxu1 %v4942_v55  ;;  %v5024_v54 = vld [vmem:[#allocation4 + $0x28] ss:$16 sps:$4 sm:$0xff]   ;;  %v5029_v55 = vld [vmem:[#allocation4 + $0x44] ss:$16 sps:$4 sm:$0xff]  }
  0xe3   :  { %1559 = vmatpush1.bf16.msra.mxu0 %v4937_v56  ;;  %1723 = vmatpush1.bf16.msra.mxu1 %v4940_v57  ;;  %v5032_v56 = vld [vmem:[#allocation4 + $0x4c] ss:$16 sps:$4 sm:$0xff]   ;;  %v5027_v57 = vld [vmem:[#allocation4 + $0x40] ss:$16 sps:$4 sm:$0xff]  }
  0xe4   :  { %1560 = vmatprep.subr.bf16.mxu0 %v4945_v58  ;;  %1724 = vmatprep.subr.bf16.mxu1 %v4948_v59  ;;  %v5030_v58 = vld [vmem:[#allocation4 + $0x48] ss:$16 sps:$4 sm:$0xff]   ;;  %v5035_v59 = vld [vmem:[#allocation4 + $0x64] ss:$16 sps:$4 sm:$0xff]  }
  0xe7   :  { %1561 = vmatpush1.bf16.msra.mxu0 %v4943_v60  ;;  %1725 = vmatpush1.bf16.msra.mxu1 %v4946_v61  ;;  %v5038_v60 = vld [vmem:[#allocation4 + $0x6c] ss:$16 sps:$4 sm:$0xff]   ;;  %v5033_v61 = vld [vmem:[#allocation4 + $0x60] ss:$16 sps:$4 sm:$0xff]  }
  0xe8   :  { %1562 = vmatprep.subr.bf16.mxu0 %v4951_v62  ;;  %1726 = vmatprep.subr.bf16.mxu1 %v4954_v63  ;;  %v5036_v62 = vld [vmem:[#allocation4 + $0x68] ss:$16 sps:$4 sm:$0xff]   ;;  %v5041_v63 = vld [vmem:[#allocation4 + $0x84] ss:$16 sps:$4 sm:$0xff]  }
  0xeb   :  { %1563 = vmatpush1.bf16.msra.mxu0 %v4949_v0  ;;  %1727 = vmatpush1.bf16.msra.mxu1 %v4952_v1  ;;  %v5044_v0 = vld [vmem:[#allocation4 + $0x8c] ss:$16 sps:$4 sm:$0xff]   ;;  %v5039_v1 = vld [vmem:[#allocation4 + $0x80] ss:$16 sps:$4 sm:$0xff]  }
  0xec   :  { %1564 = vmatprep.subr.bf16.mxu0 %v4957_v2  ;;  %1728 = vmatprep.subr.bf16.mxu1 %v4960_v3  ;;  %v5042_v2 = vld [vmem:[#allocation4 + $0x88] ss:$16 sps:$4 sm:$0xff]   ;;  %v5047_v3 = vld [vmem:[#allocation4 + $0xa4] ss:$16 sps:$4 sm:$0xff]  }
  0xef   :  { %1565 = vmatpush1.bf16.msra.mxu0 %v4955_v4  ;;  %1729 = vmatpush1.bf16.msra.mxu1 %v4958_v5  ;;  %v5050_v4 = vld [vmem:[#allocation4 + $0xac] ss:$16 sps:$4 sm:$0xff]   ;;  %v5045_v5 = vld [vmem:[#allocation4 + $0xa0] ss:$16 sps:$4 sm:$0xff]  }
  0xf0   :  { %1566 = vmatprep.subr.bf16.mxu0 %v4963_v6  ;;  %1730 = vmatprep.subr.bf16.mxu1 %v4966_v7  ;;  %v5048_v6 = vld [vmem:[#allocation4 + $0xa8] ss:$16 sps:$4 sm:$0xff]   ;;  %v5053_v7 = vld [vmem:[#allocation4 + $0xc4] ss:$16 sps:$4 sm:$0xff]  }
  0xf3   :  { %1567 = vmatpush1.bf16.msra.mxu0 %v4961_v8  ;;  %1731 = vmatpush1.bf16.msra.mxu1 %v4964_v9  ;;  %v5056_v8 = vld [vmem:[#allocation4 + $0xcc] ss:$16 sps:$4 sm:$0xff]   ;;  %v5051_v9 = vld [vmem:[#allocation4 + $0xc0] ss:$16 sps:$4 sm:$0xff]  }
  0xf4   :  { %1577 = vmatprep.subr.bf16.mxu0 %v4969_v10  ;;  %1741 = vmatprep.subr.bf16.mxu1 %v4972_v12  ;;  %v5054_v10 = vld [vmem:[#allocation4 + $0xc8] ss:$16 sps:$4 sm:$0xff]   ;;  %v5062_v12 = vld [vmem:[#allocation4 + $0xec] ss:$16 sps:$4 sm:$0xff]  }
  0xf6   :  { %1569 = vmatmul.mubr.bf16.vlgmr.msra.gmra.mrb[0].mxu0 %v85_v15  ;;  %1733 = vmatmul.mubr.bf16.vlgmr.msra.gmra.mrb[0].mxu1 %v85_v15  ;;  %v5065_v15 = vld [vmem:[#allocation4 + $0x104] ss:$16 sps:$4 sm:$0xff]  }
  0xf7   :  { %1578 = vmatpush1.bf16.msra.mxu0 %v4967_v13  ;;  %1742 = vmatpush1.bf16.msra.mxu1 %v4970_v14  ;;  %v5057_v13 = vld [vmem:[#allocation4 + $0xe0] ss:$16 sps:$4 sm:$0xff]   ;;  %v5060_v14 = vld [vmem:[#allocation4 + $0xe8] ss:$16 sps:$4 sm:$0xff]  }
  0xf8   :  { %1579 = vmatprep.subr.bf16.mxu0 %v4975_v16  ;;  %1743 = vmatprep.subr.bf16.mxu1 %v4978_v17  ;;  %v5068_v16 = vld [vmem:[#allocation4 + $0x10c] ss:$16 sps:$4 sm:$0xff]   ;;  %v5063_v17 = vld [vmem:[#allocation4 + $0x100] ss:$16 sps:$4 sm:$0xff]  }
  0xf9   :  { %1609 = vmatprep.mubr.bf16.mxu0 %v5506_v24  ;;  %1773 = vmatprep.mubr.bf16.mxu1 %v5506_v24  ;;  %v5080_v24 = vld [vmem:[#allocation4 + $0x14c] ss:$16 sps:$4 sm:$0xff]  }
  0xfb   :  { %1580 = vmatpush1.bf16.msra.mxu0 %v4973_v18  ;;  %1744 = vmatpush1.bf16.msra.mxu1 %v4976_v19  ;;  %v5066_v18 = vld [vmem:[#allocation4 + $0x108] ss:$16 sps:$4 sm:$0xff]   ;;  %v5071_v19 = vld [vmem:[#allocation4 + $0x124] ss:$16 sps:$4 sm:$0xff]  }
  0xfc   :  { %1581 = vmatprep.subr.bf16.mxu0 %v4981_v20  ;;  %1745 = vmatprep.subr.bf16.mxu1 %v4984_v21  ;;  %v5074_v20 = vld [vmem:[#allocation4 + $0x12c] ss:$16 sps:$4 sm:$0xff]   ;;  %v5069_v21 = vld [vmem:[#allocation4 + $0x120] ss:$16 sps:$4 sm:$0xff]  }
  0xff   :  { %1582 = vmatpush1.bf16.msra.mxu0 %v4979_v22  ;;  %1746 = vmatpush1.bf16.msra.mxu1 %v4982_v23  ;;  %v5072_v22 = vld [vmem:[#allocation4 + $0x128] ss:$16 sps:$4 sm:$0xff]   ;;  %v5077_v23 = vld [vmem:[#allocation4 + $0x144] ss:$16 sps:$4 sm:$0xff]  }
 0x100   :  { %1583 = vmatprep.subr.bf16.mxu0 %v4987_v25  ;;  %1747 = vmatprep.subr.bf16.mxu1 %v4990_v26  ;;  %v5075_v25 = vld [vmem:[#allocation4 + $0x140] ss:$16 sps:$4 sm:$0xff]   ;;  %v5078_v26 = vld [vmem:[#allocation4 + $0x148] ss:$16 sps:$4 sm:$0xff]  }
 0x103   :  { %1584 = vmatpush1.bf16.msra.mxu0 %v4985_v27  ;;  %1748 = vmatpush1.bf16.msra.mxu1 %v4988_v28  ;;  %v5083_v27 = vld [vmem:[#allocation4 + $0x164] ss:$16 sps:$4 sm:$0xff]   ;;  %v5086_v28 = vld [vmem:[#allocation4 + $0x16c] ss:$16 sps:$4 sm:$0xff]  }
 0x104   :  { %1585 = vmatprep.subr.bf16.mxu0 %v4993_v29  ;;  %1749 = vmatprep.subr.bf16.mxu1 %v4996_v30  ;;  %v5081_v29 = vld [vmem:[#allocation4 + $0x160] ss:$16 sps:$4 sm:$0xff]   ;;  %v5084_v30 = vld [vmem:[#allocation4 + $0x168] ss:$16 sps:$4 sm:$0xff]  }
 0x107   :  { %1586 = vmatpush1.bf16.msra.mxu0 %v4991_v31  ;;  %1750 = vmatpush1.bf16.msra.mxu1 %v4994_v32  ;;  %v5089_v31 = vld [vmem:[#allocation4 + $0x184] ss:$16 sps:$4 sm:$0xff]   ;;  %v5092_v32 = vld [vmem:[#allocation4 + $0x18c] ss:$16 sps:$4 sm:$0xff]  }
 0x108   :  { %1587 = vmatprep.subr.bf16.mxu0 %v4999_v33  ;;  %1751 = vmatprep.subr.bf16.mxu1 %v5002_v34  ;;  %v5087_v33 = vld [vmem:[#allocation4 + $0x180] ss:$16 sps:$4 sm:$0xff]   ;;  %v5090_v34 = vld [vmem:[#allocation4 + $0x188] ss:$16 sps:$4 sm:$0xff]  }
 0x10b   :  { %1588 = vmatpush1.bf16.msra.mxu0 %v4997_v35  ;;  %1752 = vmatpush1.bf16.msra.mxu1 %v5000_v36  ;;  %v5095_v35 = vld [vmem:[#allocation4 + $0x1a4] ss:$16 sps:$4 sm:$0xff]   ;;  %v5098_v36 = vld [vmem:[#allocation4 + $0x1ac] ss:$16 sps:$4 sm:$0xff]  }
 0x10c   :  { %1589 = vmatprep.subr.bf16.mxu0 %v5005_v37  ;;  %1753 = vmatprep.subr.bf16.mxu1 %v5008_v38  ;;  %v5093_v37 = vld [vmem:[#allocation4 + $0x1a0] ss:$16 sps:$4 sm:$0xff]   ;;  %v5096_v38 = vld [vmem:[#allocation4 + $0x1a8] ss:$16 sps:$4 sm:$0xff]  }
 0x10f   :  { %1590 = vmatpush1.bf16.msra.mxu0 %v5003_v39  ;;  %1754 = vmatpush1.bf16.msra.mxu1 %v5006_v40  ;;  %v5101_v39 = vld [vmem:[#allocation4 + $0x1c4] ss:$16 sps:$4 sm:$0xff]   ;;  %v5104_v40 = vld [vmem:[#allocation4 + $0x1cc] ss:$16 sps:$4 sm:$0xff]  }
 0x110   :  { %1591 = vmatprep.subr.bf16.mxu0 %v5011_v41  ;;  %1755 = vmatprep.subr.bf16.mxu1 %v5014_v42  ;;  %v5099_v41 = vld [vmem:[#allocation4 + $0x1c0] ss:$16 sps:$4 sm:$0xff]   ;;  %v5102_v42 = vld [vmem:[#allocation4 + $0x1c8] ss:$16 sps:$4 sm:$0xff]  }
 0x113   :  { %1592 = vmatpush1.bf16.msra.mxu0 %v5009_v43  ;;  %1756 = vmatpush1.bf16.msra.mxu1 %v5012_v44  ;;  %v5107_v43 = vld [vmem:[#allocation4 + $0x1e4] ss:$16 sps:$4 sm:$0xff]   ;;  %v5110_v44 = vld [vmem:[#allocation4 + $0x1ec] ss:$16 sps:$4 sm:$0xff]  }
 0x114   :  { %2580 = vmatprep.subr.bf16.mxu0 %v5017_v46  ;;  %2662 = vmatprep.subr.bf16.mxu1 %v5020_v47  ;;  %v5108_v46 = vld [vmem:[#allocation4 + $0x1e8] ss:$16 sps:$4 sm:$0xff]   ;;  %v5113_v47 = vld [vmem:[#allocation4 + $0x204] ss:$16 sps:$4 sm:$0xff]  }
 0x116   :  { %1610 = vmatmul.mubr.bf16.vlgmr.msra.gmra.mrb[0].mxu0 %v87_v50  ;;  %1774 = vmatmul.mubr.bf16.vlgmr.msra.gmra.mrb[0].mxu1 %v87_v50 }
 0x117   :  { %2581 = vmatpush1.bf16.msra.mxu0 %v5015_v48  ;;  %2663 = vmatpush1.bf16.msra.mxu1 %v5018_v49  ;;  %v5116_v48 = vld [vmem:[#allocation4 + $0x20c] ss:$16 sps:$4 sm:$0xff]   ;;  %v314_v49 = vlaneseq }
 0x118   :  { %2582 = vmatprep.subr.bf16.mxu0 %v5023_v51  ;;  %2664 = vmatprep.subr.bf16.mxu1 %v5026_v52  ;;  %v5638_v52 = vld [vmem:[%s5787_s2] sm:$0xf] }
 0x119   :  { %v5630_v50 = vshrl.u32 %v314_v49, 7  ;;  %v5173_v49 = vld [vmem:[#allocation4 + $0x344] ss:$16 sps:$4 sm:$0xff]  }
 0x11b   :  { %2583 = vmatpush1.bf16.msra.mxu0 %v5021_v53  ;;  %2665 = vmatpush1.bf16.msra.mxu1 %v5024_v54  ;;  %v5633_v51 = vsub.s32 0, %v5630_v50  ;;  %v5641_v53 = vsub.s32 1, %v5630_v50  ;;  %v5644_v54 = vsub.s32 3, %v5630_v50 }
 0x11c   :  { %2584 = vmatprep.subr.bf16.mxu0 %v5029_v55  ;;  %2666 = vmatprep.subr.bf16.mxu1 %v5032_v56 }
 0x11d   :  { %v317_v55 = vrot.slane %v5638_v52, %v5633_v51  ;;  %v321_v56 = vrot.slane %v5638_v52, %v5641_v53 }
 0x11f   :  { %2585 = vmatpush1.bf16.msra.mxu0 %v5027_v57  ;;  %2667 = vmatpush1.bf16.msra.mxu1 %v5030_v58  ;;  %v329_v57 = vrot.slane %v5638_v52, %v5644_v54 }
 0x120   :  { %2586 = vmatprep.subr.bf16.mxu0 %v5035_v59  ;;  %2668 = vmatprep.subr.bf16.mxu1 %v5038_v60 }
 0x123   :  { %2587 = vmatpush1.bf16.msra.mxu0 %v5033_v61  ;;  %2669 = vmatpush1.bf16.msra.mxu1 %v5036_v62 }
 0x124   :  { %2588 = vmatprep.subr.bf16.mxu0 %v5041_v63  ;;  %2670 = vmatprep.subr.bf16.mxu1 %v5044_v0 }
 0x127   :  { %2589 = vmatpush1.bf16.msra.mxu0 %v5039_v1  ;;  %2671 = vmatpush1.bf16.msra.mxu1 %v5042_v2 }
 0x128   :  { %2590 = vmatprep.subr.bf16.mxu0 %v5047_v3  ;;  %2672 = vmatprep.subr.bf16.mxu1 %v5050_v4 }
 0x12b   :  { %2591 = vmatpush1.bf16.msra.mxu0 %v5045_v5  ;;  %2673 = vmatpush1.bf16.msra.mxu1 %v5048_v6 }
 0x12c   :  { %2592 = vmatprep.subr.bf16.mxu0 %v5053_v7  ;;  %2674 = vmatprep.subr.bf16.mxu1 %v5056_v8 }
 0x12f   :  { %2593 = vmatpush1.bf16.msra.mxu0 %v5051_v9  ;;  %2675 = vmatpush1.bf16.msra.mxu1 %v5054_v10  ;;  %v5111_v9 = vld [vmem:[#allocation4 + $0x200] ss:$16 sps:$4 sm:$0xff]   ;;  %v5114_v10 = vld [vmem:[#allocation4 + $0x208] ss:$16 sps:$4 sm:$0xff]  }
 0x130   :  { %2594 = vmatprep.subr.bf16.mxu0 %v5059_v11  ;;  %2676 = vmatprep.subr.bf16.mxu1 %v5062_v12  ;;  %v5119_v12 = vld [vmem:[#allocation4 + $0x224] ss:$16 sps:$4 sm:$0xff]  }
 0x133   :  { %2595 = vmatpush1.bf16.msra.mxu0 %v5057_v13  ;;  %2677 = vmatpush1.bf16.msra.mxu1 %v5060_v14  ;;  %v5122_v13 = vld [vmem:[#allocation4 + $0x22c] ss:$16 sps:$4 sm:$0xff]  }
 0x134   :  { %2596 = vmatprep.subr.bf16.mxu0 %v5065_v15  ;;  %2678 = vmatprep.subr.bf16.mxu1 %v5068_v16  ;;  %v5117_v15 = vld [vmem:[#allocation4 + $0x220] ss:$16 sps:$4 sm:$0xff]   ;;  %v5120_v16 = vld [vmem:[#allocation4 + $0x228] ss:$16 sps:$4 sm:$0xff]  }
 0x137   :  { %2597 = vmatpush1.bf16.msra.mxu0 %v5063_v17  ;;  %2679 = vmatpush1.bf16.msra.mxu1 %v5066_v18  ;;  %v5125_v17 = vld [vmem:[#allocation4 + $0x244] ss:$16 sps:$4 sm:$0xff]   ;;  %v5128_v18 = vld [vmem:[#allocation4 + $0x24c] ss:$16 sps:$4 sm:$0xff]  }
 0x138   :  { %2598 = vmatprep.subr.bf16.mxu0 %v5071_v19  ;;  %2680 = vmatprep.subr.bf16.mxu1 %v5074_v20  ;;  %v5123_v19 = vld [vmem:[#allocation4 + $0x240] ss:$16 sps:$4 sm:$0xff]   ;;  %v5126_v20 = vld [vmem:[#allocation4 + $0x248] ss:$16 sps:$4 sm:$0xff]  }
 0x13b   :  { %2599 = vmatpush1.bf16.msra.mxu0 %v5069_v21  ;;  %2681 = vmatpush1.bf16.msra.mxu1 %v5072_v22  ;;  %v5131_v21 = vld [vmem:[#allocation4 + $0x264] ss:$16 sps:$4 sm:$0xff]   ;;  %v5134_v22 = vld [vmem:[#allocation4 + $0x26c] ss:$16 sps:$4 sm:$0xff]  }
 0x13c   :  { %2600 = vmatprep.subr.bf16.mxu0 %v5077_v23  ;;  %2682 = vmatprep.subr.bf16.mxu1 %v5080_v24  ;;  %v5129_v23 = vld [vmem:[#allocation4 + $0x260] ss:$16 sps:$4 sm:$0xff]   ;;  %v5132_v24 = vld [vmem:[#allocation4 + $0x268] ss:$16 sps:$4 sm:$0xff]  }
 0x13f   :  { %2601 = vmatpush1.bf16.msra.mxu0 %v5075_v25  ;;  %2683 = vmatpush1.bf16.msra.mxu1 %v5078_v26  ;;  %v5137_v25 = vld [vmem:[#allocation4 + $0x284] ss:$16 sps:$4 sm:$0xff]   ;;  %v5140_v26 = vld [vmem:[#allocation4 + $0x28c] ss:$16 sps:$4 sm:$0xff]  }
 0x140   :  { %2602 = vmatprep.subr.bf16.mxu0 %v5083_v27  ;;  %2684 = vmatprep.subr.bf16.mxu1 %v5086_v28  ;;  %v5135_v27 = vld [vmem:[#allocation4 + $0x280] ss:$16 sps:$4 sm:$0xff]   ;;  %v5138_v28 = vld [vmem:[#allocation4 + $0x288] ss:$16 sps:$4 sm:$0xff]  }
 0x143   :  { %2603 = vmatpush1.bf16.msra.mxu0 %v5081_v29  ;;  %2685 = vmatpush1.bf16.msra.mxu1 %v5084_v30  ;;  %v5143_v29 = vld [vmem:[#allocation4 + $0x2a4] ss:$16 sps:$4 sm:$0xff]   ;;  %v5146_v30 = vld [vmem:[#allocation4 + $0x2ac] ss:$16 sps:$4 sm:$0xff]  }
 0x144   :  { %2604 = vmatprep.subr.bf16.mxu0 %v5089_v31  ;;  %2686 = vmatprep.subr.bf16.mxu1 %v5092_v32  ;;  %v5141_v31 = vld [vmem:[#allocation4 + $0x2a0] ss:$16 sps:$4 sm:$0xff]   ;;  %v5144_v32 = vld [vmem:[#allocation4 + $0x2a8] ss:$16 sps:$4 sm:$0xff]  }
 0x147   :  { %2605 = vmatpush1.bf16.msra.mxu0 %v5087_v33  ;;  %2687 = vmatpush1.bf16.msra.mxu1 %v5090_v34  ;;  %v5149_v33 = vld [vmem:[#allocation4 + $0x2c4] ss:$16 sps:$4 sm:$0xff]   ;;  %v5152_v34 = vld [vmem:[#allocation4 + $0x2cc] ss:$16 sps:$4 sm:$0xff]  }
 0x148   :  { %2606 = vmatprep.subr.bf16.mxu0 %v5095_v35  ;;  %2688 = vmatprep.subr.bf16.mxu1 %v5098_v36  ;;  %v5147_v35 = vld [vmem:[#allocation4 + $0x2c0] ss:$16 sps:$4 sm:$0xff]   ;;  %v5150_v36 = vld [vmem:[#allocation4 + $0x2c8] ss:$16 sps:$4 sm:$0xff]  }
 0x14b   :  { %2607 = vmatpush1.bf16.msra.mxu0 %v5093_v37  ;;  %2689 = vmatpush1.bf16.msra.mxu1 %v5096_v38  ;;  %v5155_v37 = vld [vmem:[#allocation4 + $0x2e4] ss:$16 sps:$4 sm:$0xff]   ;;  %v5158_v38 = vld [vmem:[#allocation4 + $0x2ec] ss:$16 sps:$4 sm:$0xff]  }
 0x14c   :  { %2608 = vmatprep.subr.bf16.mxu0 %v5101_v39  ;;  %2690 = vmatprep.subr.bf16.mxu1 %v5104_v40  ;;  %v5153_v39 = vld [vmem:[#allocation4 + $0x2e0] ss:$16 sps:$4 sm:$0xff]   ;;  %v5156_v40 = vld [vmem:[#allocation4 + $0x2e8] ss:$16 sps:$4 sm:$0xff]  }
 0x14f   :  { %2609 = vmatpush1.bf16.msra.mxu0 %v5099_v41  ;;  %2691 = vmatpush1.bf16.msra.mxu1 %v5102_v42  ;;  %v5161_v41 = vld [vmem:[#allocation4 + $0x304] ss:$16 sps:$4 sm:$0xff]   ;;  %v5164_v42 = vld [vmem:[#allocation4 + $0x30c] ss:$16 sps:$4 sm:$0xff]  }
 0x150   :  { %2610 = vmatprep.subr.bf16.mxu0 %v5107_v43  ;;  %2692 = vmatprep.subr.bf16.mxu1 %v5110_v44  ;;  %v5159_v43 = vld [vmem:[#allocation4 + $0x300] ss:$16 sps:$4 sm:$0xff]   ;;  %v5162_v44 = vld [vmem:[#allocation4 + $0x308] ss:$16 sps:$4 sm:$0xff]  }
 0x153   :  { %2611 = vmatpush1.bf16.msra.mxu0 %v5105_v45  ;;  %2693 = vmatpush1.bf16.msra.mxu1 %v5108_v46  ;;  %v5167_v45 = vld [vmem:[#allocation4 + $0x324] ss:$16 sps:$4 sm:$0xff]   ;;  %v5170_v46 = vld [vmem:[#allocation4 + $0x32c] ss:$16 sps:$4 sm:$0xff]  }
 0x154   :  { %2621 = vmatprep.subr.bf16.mxu0 %v5113_v47  ;;  %2703 = vmatprep.subr.bf16.mxu1 %v5116_v48  ;;  %v5165_v47 = vld [vmem:[#allocation4 + $0x320] ss:$16 sps:$4 sm:$0xff]   ;;  %v5168_v48 = vld [vmem:[#allocation4 + $0x328] ss:$16 sps:$4 sm:$0xff]  }
 0x1e9   :  { %v1611_v58 = vpop.f32.mrb[0].mxu0  ;;  %v5652_v59 = vpop.f32.mrb[0].mxu1 }
 0x1ea   :  { %v4621_v60 = vadd.f32 %v1611_v58, %v317_v55  ;;  %v1613_v61 = vpop.f32.mrb[1].mxu0  ;;  %v1777_v62 = vpop.f32.mrb[1].mxu1  ;;  %v5176_v55 = vld [vmem:[#allocation4 + $0x34c] ss:$16 sps:$4 sm:$0xff]   ;;  %v5179_v58 = vld [vmem:[#allocation4 + $0x364] ss:$16 sps:$4 sm:$0xff]  }
 0x1eb   :  { %v4622_v63 = vadd.f32 %v1613_v61, %v321_v56  ;;  %v4624_v0 = vadd.f32 %v1777_v62, %v329_v57  ;;  %v1615_v1 = vpop.f32.mrb[2].mxu0  ;;  %v1779_v2 = vpop.f32.mrb[2].mxu1  ;;  %v5171_v56 = vld [vmem:[#allocation4 + $0x340] ss:$16 sps:$4 sm:$0xff]   ;;  %v5174_v57 = vld [vmem:[#allocation4 + $0x348] ss:$16 sps:$4 sm:$0xff]  }
 0x1ec   :  { %v1782_v3 = vmax.f32 %v4621_v60, 0.0  ;;  %v1616_v4 = vpop.f32.mrb[3].mxu0  ;;  %v1780_v5 = vpop.f32.mrb[3].mxu1  ;;  %v5182_v60 = vld [vmem:[#allocation4 + $0x36c] ss:$16 sps:$4 sm:$0xff]  }
 0x1ed   :  { %v1783_v6 = vmax.f32 %v4622_v63, 0.0  ;;  %v1785_v7 = vmax.f32 %v4624_v0, 0.0  ;;  %v5177_v61 = vld [vmem:[#allocation4 + $0x360] ss:$16 sps:$4 sm:$0xff]   ;;  %v5180_v62 = vld [vmem:[#allocation4 + $0x368] ss:$16 sps:$4 sm:$0xff]  }
 0x1ee   :  { %v1786_v11 = vpack.c.bf16 %v1782_v3, %v1782_v3  ;;  %v5185_v63 = vld [vmem:[#allocation4 + $0x384] ss:$16 sps:$4 sm:$0xff]   ;;  %v5188_v0 = vld [vmem:[#allocation4 + $0x38c] ss:$16 sps:$4 sm:$0xff]   ;;  %v5183_v1 = vld [vmem:[#allocation4 + $0x380] ss:$16 sps:$4 sm:$0xff]  }
 0x1ef   :  { %v1787_v8 = vpack.c.bf16 %v1783_v6, %v1783_v6  ;;  %v1789_v14 = vpack.c.bf16 %v1785_v7, %v1785_v7  ;;  %v5186_v2 = vld [vmem:[#allocation4 + $0x388] ss:$16 sps:$4 sm:$0xff]   ;;  %v5655_v3 = vsub.s32 2, %v5630_v50  ;;  %v5191_v4 = vld [vmem:[#allocation4 + $0x3a4] ss:$16 sps:$4 sm:$0xff]  }
 0x1f0   :  { %v5194_v5 = vld [vmem:[#allocation4 + $0x3ac] ss:$16 sps:$4 sm:$0xff]   ;;  %v5189_v6 = vld [vmem:[#allocation4 + $0x3a0] ss:$16 sps:$4 sm:$0xff]   ;;  %v5192_v7 = vld [vmem:[#allocation4 + $0x3a8] ss:$16 sps:$4 sm:$0xff]  }
 0x1f1   :  { %2612 = vmatprep.mubr.bf16.mxu0 %v1787_v8  ;;  %2694 = vmatprep.mubr.bf16.mxu1 %v1787_v8  ;;  %v325_v8 = vrot.slane %v5638_v52, %v5655_v3  ;;  %v5198_v50 = vld [vmem:[#allocation4 + $0x3c8] ss:$16 sps:$4 sm:$0xff]   ;;  %v5209_v52 = vld [vmem:[#allocation6 + $0x4] ss:$16 sps:$4 sm:$0xff]  }
 0x1f2   :  { %2613 = vmatmul.mubr.bf16.vlgmr.msra.gmra.mrb[4].mxu0 %v1786_v11  ;;  %2695 = vmatmul.mubr.bf16.vlgmr.msra.gmra.mrb[4].mxu1 %v1786_v11  ;;  %v5195_v11 = vld [vmem:[#allocation4 + $0x3c0] ss:$16 sps:$4 sm:$0xff]  }
 0x1f3   :  { %2622 = vmatpush1.bf16.msra.mxu0 %v5111_v9  ;;  %2704 = vmatpush1.bf16.msra.mxu1 %v5114_v10  ;;  %v5197_v9 = vld [vmem:[#allocation4 + $0x3c4] ss:$16 sps:$4 sm:$0xff]   ;;  %v5200_v10 = vld [vmem:[#allocation4 + $0x3cc] ss:$16 sps:$4 sm:$0xff]  }
 0x1f4   :  { %2653 = vmatprep.mubr.bf16.mxu0 %v1789_v14  ;;  %2735 = vmatprep.mubr.bf16.mxu1 %v1789_v14  ;;  %v5206_v14 = vld [vmem:[#allocation4 + $0x3ec] ss:$16 sps:$4 sm:$0xff]  }
 0x1f5   :  { %2623 = vmatprep.subr.bf16.mxu0 %v5119_v12  ;;  %2705 = vmatprep.subr.bf16.mxu1 %v5122_v13  ;;  %v4623_v12 = vadd.f32 %v5652_v59, %v325_v8  ;;  %v5203_v13 = vld [vmem:[#allocation4 + $0x3e4] ss:$16 sps:$4 sm:$0xff]  }
 0x1f6   :  { %v5215_v59 = vld [vmem:[#allocation6 + $0x24] ss:$16 sps:$4 sm:$0xff]  }
 0x1f7   :  { %2624 = vmatpush1.bf16.msra.mxu0 %v5117_v15  ;;  %2706 = vmatpush1.bf16.msra.mxu1 %v5120_v16  ;;  %v5201_v15 = vld [vmem:[#allocation4 + $0x3e0] ss:$16 sps:$4 sm:$0xff]   ;;  %v5204_v16 = vld [vmem:[#allocation4 + $0x3e8] ss:$16 sps:$4 sm:$0xff]   ;;  %v5281_v8 = vld [vmem:[#allocation6 + $0x184] ss:$16 sps:$4 sm:$0xff]  }
 0x1f8   :  { %2625 = vmatprep.subr.bf16.mxu0 %v5125_v17  ;;  %2707 = vmatprep.subr.bf16.mxu1 %v5128_v18  ;;  %v1784_v17 = vmax.f32 %v4623_v12, 0.0  ;;  %v5212_v18 = vld [vmem:[#allocation6 + $0xc] ss:$16 sps:$4 sm:$0xff]  }
 0x1f9   :  { %v5290_v12 = vld [vmem:[#allocation6 + $0x1ac] ss:$16 sps:$4 sm:$0xff]  }
 0x1fb   :  { %2626 = vmatpush1.bf16.msra.mxu0 %v5123_v19  ;;  %2708 = vmatpush1.bf16.msra.mxu1 %v5126_v20  ;;  %v5207_v19 = vld [vmem:[#allocation6] ss:$16 sps:$4 sm:$0xff]   ;;  %v5210_v20 = vld [vmem:[#allocation6 + $0x8] ss:$16 sps:$4 sm:$0xff]  }
 0x1fc   :  { %2627 = vmatprep.subr.bf16.mxu0 %v5131_v21  ;;  %2709 = vmatprep.subr.bf16.mxu1 %v5134_v22  ;;  %v1788_v21 = vpack.c.bf16 %v1784_v17, %v1784_v17  ;;  %v5218_v22 = vld [vmem:[#allocation6 + $0x2c] ss:$16 sps:$4 sm:$0xff]   ;;  %v5291_v17 = vld [vmem:[#allocation6 + $0x1c0] ss:$16 sps:$4 sm:$0xff]  }
 0x1ff   :  { %2628 = vmatpush1.bf16.msra.mxu0 %v5129_v23  ;;  %2710 = vmatpush1.bf16.msra.mxu1 %v5132_v24  ;;  %v5213_v23 = vld [vmem:[#allocation6 + $0x20] ss:$16 sps:$4 sm:$0xff]   ;;  %v5216_v24 = vld [vmem:[#allocation6 + $0x28] ss:$16 sps:$4 sm:$0xff]  }
 0x200   :  { %2629 = vmatprep.subr.bf16.mxu0 %v5137_v25  ;;  %2711 = vmatprep.subr.bf16.mxu1 %v5140_v26  ;;  %v5221_v25 = vld [vmem:[#allocation6 + $0x44] ss:$16 sps:$4 sm:$0xff]   ;;  %v5224_v26 = vld [vmem:[#allocation6 + $0x4c] ss:$16 sps:$4 sm:$0xff]  }
 0x203   :  { %2630 = vmatpush1.bf16.msra.mxu0 %v5135_v27  ;;  %2712 = vmatpush1.bf16.msra.mxu1 %v5138_v28  ;;  %v5219_v27 = vld [vmem:[#allocation6 + $0x40] ss:$16 sps:$4 sm:$0xff]   ;;  %v5222_v28 = vld [vmem:[#allocation6 + $0x48] ss:$16 sps:$4 sm:$0xff]  }
 0x204   :  { %2631 = vmatprep.subr.bf16.mxu0 %v5143_v29  ;;  %2713 = vmatprep.subr.bf16.mxu1 %v5146_v30  ;;  %v5227_v29 = vld [vmem:[#allocation6 + $0x64] ss:$16 sps:$4 sm:$0xff]   ;;  %v5230_v30 = vld [vmem:[#allocation6 + $0x6c] ss:$16 sps:$4 sm:$0xff]  }
 0x207   :  { %2632 = vmatpush1.bf16.msra.mxu0 %v5141_v31  ;;  %2714 = vmatpush1.bf16.msra.mxu1 %v5144_v32  ;;  %v5225_v31 = vld [vmem:[#allocation6 + $0x60] ss:$16 sps:$4 sm:$0xff]   ;;  %v5228_v32 = vld [vmem:[#allocation6 + $0x68] ss:$16 sps:$4 sm:$0xff]  }
 0x208   :  { %2633 = vmatprep.subr.bf16.mxu0 %v5149_v33  ;;  %2715 = vmatprep.subr.bf16.mxu1 %v5152_v34  ;;  %v5233_v33 = vld [vmem:[#allocation6 + $0x84] ss:$16 sps:$4 sm:$0xff]   ;;  %v5236_v34 = vld [vmem:[#allocation6 + $0x8c] ss:$16 sps:$4 sm:$0xff]  }
 0x20b   :  { %2634 = vmatpush1.bf16.msra.mxu0 %v5147_v35  ;;  %2716 = vmatpush1.bf16.msra.mxu1 %v5150_v36  ;;  %v5231_v35 = vld [vmem:[#allocation6 + $0x80] ss:$16 sps:$4 sm:$0xff]   ;;  %v5234_v36 = vld [vmem:[#allocation6 + $0x88] ss:$16 sps:$4 sm:$0xff]  }
 0x20c   :  { %2635 = vmatprep.subr.bf16.mxu0 %v5155_v37  ;;  %2717 = vmatprep.subr.bf16.mxu1 %v5158_v38  ;;  %v5239_v37 = vld [vmem:[#allocation6 + $0xa4] ss:$16 sps:$4 sm:$0xff]   ;;  %v5242_v38 = vld [vmem:[#allocation6 + $0xac] ss:$16 sps:$4 sm:$0xff]  }
 0x20f   :  { %2636 = vmatpush1.bf16.msra.mxu0 %v5153_v39  ;;  %2718 = vmatpush1.bf16.msra.mxu1 %v5156_v40  ;;  %v5237_v39 = vld [vmem:[#allocation6 + $0xa0] ss:$16 sps:$4 sm:$0xff]   ;;  %v5240_v40 = vld [vmem:[#allocation6 + $0xa8] ss:$16 sps:$4 sm:$0xff]  }
 0x210   :  { %2637 = vmatprep.subr.bf16.mxu0 %v5161_v41  ;;  %2719 = vmatprep.subr.bf16.mxu1 %v5164_v42  ;;  %v5245_v41 = vld [vmem:[#allocation6 + $0xc4] ss:$16 sps:$4 sm:$0xff]   ;;  %v5248_v42 = vld [vmem:[#allocation6 + $0xcc] ss:$16 sps:$4 sm:$0xff]  }
 0x213   :  { %2638 = vmatpush1.bf16.msra.mxu0 %v5159_v43  ;;  %2720 = vmatpush1.bf16.msra.mxu1 %v5162_v44  ;;  %v5243_v43 = vld [vmem:[#allocation6 + $0xc0] ss:$16 sps:$4 sm:$0xff]   ;;  %v5246_v44 = vld [vmem:[#allocation6 + $0xc8] ss:$16 sps:$4 sm:$0xff]  }
 0x214   :  { %2639 = vmatprep.subr.bf16.mxu0 %v5167_v45  ;;  %2721 = vmatprep.subr.bf16.mxu1 %v5170_v46  ;;  %v5251_v45 = vld [vmem:[#allocation6 + $0xe4] ss:$16 sps:$4 sm:$0xff]   ;;  %v5254_v46 = vld [vmem:[#allocation6 + $0xec] ss:$16 sps:$4 sm:$0xff]  }
 0x217   :  { %2640 = vmatpush1.bf16.msra.mxu0 %v5165_v47  ;;  %2722 = vmatpush1.bf16.msra.mxu1 %v5168_v48  ;;  %v5249_v47 = vld [vmem:[#allocation6 + $0xe0] ss:$16 sps:$4 sm:$0xff]   ;;  %v5252_v48 = vld [vmem:[#allocation6 + $0xe8] ss:$16 sps:$4 sm:$0xff]  }
 0x218   :  { %2641 = vmatprep.subr.bf16.mxu0 %v5173_v49  ;;  %2723 = vmatprep.subr.bf16.mxu1 %v5176_v55  ;;  %v5257_v49 = vld [vmem:[#allocation6 + $0x104] ss:$16 sps:$4 sm:$0xff]   ;;  %v5260_v55 = vld [vmem:[#allocation6 + $0x10c] ss:$16 sps:$4 sm:$0xff]  }
 0x21b   :  { %2642 = vmatpush1.bf16.msra.mxu0 %v5171_v56  ;;  %2724 = vmatpush1.bf16.msra.mxu1 %v5174_v57  ;;  %v5255_v56 = vld [vmem:[#allocation6 + $0x100] ss:$16 sps:$4 sm:$0xff]   ;;  %v5258_v57 = vld [vmem:[#allocation6 + $0x108] ss:$16 sps:$4 sm:$0xff]  }
 0x21c   :  { %2643 = vmatprep.subr.bf16.mxu0 %v5179_v58  ;;  %2725 = vmatprep.subr.bf16.mxu1 %v5182_v60  ;;  %v5263_v58 = vld [vmem:[#allocation6 + $0x124] ss:$16 sps:$4 sm:$0xff]   ;;  %v5266_v60 = vld [vmem:[#allocation6 + $0x12c] ss:$16 sps:$4 sm:$0xff]  }
 0x21f   :  { %2644 = vmatpush1.bf16.msra.mxu0 %v5177_v61  ;;  %2726 = vmatpush1.bf16.msra.mxu1 %v5180_v62  ;;  %v5261_v61 = vld [vmem:[#allocation6 + $0x120] ss:$16 sps:$4 sm:$0xff]   ;;  %v5264_v62 = vld [vmem:[#allocation6 + $0x128] ss:$16 sps:$4 sm:$0xff]  }
 0x220   :  { %2645 = vmatprep.subr.bf16.mxu0 %v5185_v63  ;;  %2727 = vmatprep.subr.bf16.mxu1 %v5188_v0  ;;  %v5269_v63 = vld [vmem:[#allocation6 + $0x144] ss:$16 sps:$4 sm:$0xff]   ;;  %v5272_v0 = vld [vmem:[#allocation6 + $0x14c] ss:$16 sps:$4 sm:$0xff]  }
 0x223   :  { %2646 = vmatpush1.bf16.msra.mxu0 %v5183_v1  ;;  %2728 = vmatpush1.bf16.msra.mxu1 %v5186_v2  ;;  %v5267_v1 = vld [vmem:[#allocation6 + $0x140] ss:$16 sps:$4 sm:$0xff]   ;;  %v5270_v2 = vld [vmem:[#allocation6 + $0x148] ss:$16 sps:$4 sm:$0xff]  }
 0x224   :  { %2647 = vmatprep.subr.bf16.mxu0 %v5191_v4  ;;  %2729 = vmatprep.subr.bf16.mxu1 %v5194_v5  ;;  %v5275_v4 = vld [vmem:[#allocation6 + $0x164] ss:$16 sps:$4 sm:$0xff]   ;;  %v5278_v5 = vld [vmem:[#allocation6 + $0x16c] ss:$16 sps:$4 sm:$0xff]  }
 0x227   :  { %2648 = vmatpush1.bf16.msra.mxu0 %v5189_v6  ;;  %2730 = vmatpush1.bf16.msra.mxu1 %v5192_v7  ;;  %v5273_v6 = vld [vmem:[#allocation6 + $0x160] ss:$16 sps:$4 sm:$0xff]   ;;  %v5276_v7 = vld [vmem:[#allocation6 + $0x168] ss:$16 sps:$4 sm:$0xff]  }
 0x228   :  { %2649 = vmatprep.subr.bf16.mxu0 %v5197_v9  ;;  %2731 = vmatprep.subr.bf16.mxu1 %v5200_v10  ;;  %v5284_v9 = vld [vmem:[#allocation6 + $0x18c] ss:$16 sps:$4 sm:$0xff]   ;;  %v5279_v10 = vld [vmem:[#allocation6 + $0x180] ss:$16 sps:$4 sm:$0xff]  }
 0x22b   :  { %2650 = vmatpush1.bf16.msra.mxu0 %v5195_v11  ;;  %2732 = vmatpush1.bf16.msra.mxu1 %v5198_v50  ;;  %v5282_v11 = vld [vmem:[#allocation6 + $0x188] ss:$16 sps:$4 sm:$0xff]   ;;  %v5287_v50 = vld [vmem:[#allocation6 + $0x1a4] ss:$16 sps:$4 sm:$0xff]  }
 0x22c   :  { %2651 = vmatprep.subr.bf16.mxu0 %v5203_v13  ;;  %2733 = vmatprep.subr.bf16.mxu1 %v5206_v14  ;;  %v5285_v13 = vld [vmem:[#allocation6 + $0x1a0] ss:$16 sps:$4 sm:$0xff]   ;;  %v5288_v14 = vld [vmem:[#allocation6 + $0x1a8] ss:$16 sps:$4 sm:$0xff]  }
 0x22f   :  { %2652 = vmatpush1.bf16.msra.mxu0 %v5201_v15  ;;  %2734 = vmatpush1.bf16.msra.mxu1 %v5204_v16  ;;  %v5293_v15 = vld [vmem:[#allocation6 + $0x1c4] ss:$16 sps:$4 sm:$0xff]   ;;  %v5296_v16 = vld [vmem:[#allocation6 + $0x1cc] ss:$16 sps:$4 sm:$0xff]  }
 0x230   :  { %3542 = vmatprep.subr.bf16.mxu0 %v5209_v52  ;;  %3624 = vmatprep.subr.bf16.mxu1 %v5212_v18  ;;  %v5294_v52 = vld [vmem:[#allocation6 + $0x1c8] ss:$16 sps:$4 sm:$0xff]   ;;  %v5299_v18 = vld [vmem:[#allocation6 + $0x1e4] ss:$16 sps:$4 sm:$0xff]  }
 0x232   :  { %2654 = vmatmul.mubr.bf16.vlgmr.msra.gmra.mrb[4].mxu0 %v1788_v21  ;;  %2736 = vmatmul.mubr.bf16.vlgmr.msra.gmra.mrb[4].mxu1 %v1788_v21  ;;  %v5300_v21 = vld [vmem:[#allocation6 + $0x1e8] ss:$16 sps:$4 sm:$0xff]  }
 0x233   :  { %3543 = vmatpush1.bf16.msra.mxu0 %v5207_v19  ;;  %3625 = vmatpush1.bf16.msra.mxu1 %v5210_v20  ;;  %v5302_v19 = vld [vmem:[#allocation6 + $0x1ec] ss:$16 sps:$4 sm:$0xff]   ;;  %v5297_v20 = vld [vmem:[#allocation6 + $0x1e0] ss:$16 sps:$4 sm:$0xff]  }
 0x234   :  { %3544 = vmatprep.subr.bf16.mxu0 %v5215_v59  ;;  %3626 = vmatprep.subr.bf16.mxu1 %v5218_v22  ;;  %v5305_v59 = vld [vmem:[#allocation6 + $0x204] ss:$16 sps:$4 sm:$0xff]   ;;  %v5308_v22 = vld [vmem:[#allocation6 + $0x20c] ss:$16 sps:$4 sm:$0xff]  }
 0x237   :  { %3545 = vmatpush1.bf16.msra.mxu0 %v5213_v23  ;;  %3627 = vmatpush1.bf16.msra.mxu1 %v5216_v24  ;;  %v5663_v23 = vld [vmem:[%s5789_s4] sm:$0xf] }
 0x238   :  { %3546 = vmatprep.subr.bf16.mxu0 %v5221_v25  ;;  %3628 = vmatprep.subr.bf16.mxu1 %v5224_v26  ;;  %v1923_v24 = vrot.slane %v5663_v23, %v5633_v51  ;;  %v1927_v25 = vrot.slane %v5663_v23, %v5641_v53  ;;  %v1935_v26 = vrot.slane %v5663_v23, %v5644_v54 }
 0x23b   :  { %3547 = vmatpush1.bf16.msra.mxu0 %v5219_v27  ;;  %3629 = vmatpush1.bf16.msra.mxu1 %v5222_v28 }
 0x23c   :  { %3548 = vmatprep.subr.bf16.mxu0 %v5227_v29  ;;  %3630 = vmatprep.subr.bf16.mxu1 %v5230_v30 }
 0x23f   :  { %3549 = vmatpush1.bf16.msra.mxu0 %v5225_v31  ;;  %3631 = vmatpush1.bf16.msra.mxu1 %v5228_v32 }
 0x240   :  { %3550 = vmatprep.subr.bf16.mxu0 %v5233_v33  ;;  %3632 = vmatprep.subr.bf16.mxu1 %v5236_v34 }
 0x243   :  { %3551 = vmatpush1.bf16.msra.mxu0 %v5231_v35  ;;  %3633 = vmatpush1.bf16.msra.mxu1 %v5234_v36 }
 0x244   :  { %3552 = vmatprep.subr.bf16.mxu0 %v5239_v37  ;;  %3634 = vmatprep.subr.bf16.mxu1 %v5242_v38 }
 0x247   :  { %3553 = vmatpush1.bf16.msra.mxu0 %v5237_v39  ;;  %3635 = vmatpush1.bf16.msra.mxu1 %v5240_v40 }
 0x248   :  { %3554 = vmatprep.subr.bf16.mxu0 %v5245_v41  ;;  %3636 = vmatprep.subr.bf16.mxu1 %v5248_v42  ;;  %v5303_v42 = vld [vmem:[#allocation6 + $0x200] ss:$16 sps:$4 sm:$0xff]  }
 0x24b   :  { %3555 = vmatpush1.bf16.msra.mxu0 %v5243_v43  ;;  %3637 = vmatpush1.bf16.msra.mxu1 %v5246_v44  ;;  %v5306_v43 = vld [vmem:[#allocation6 + $0x208] ss:$16 sps:$4 sm:$0xff]  }
 0x24c   :  { %3556 = vmatprep.subr.bf16.mxu0 %v5251_v45  ;;  %3638 = vmatprep.subr.bf16.mxu1 %v5254_v46  ;;  %v5311_v45 = vld [vmem:[#allocation6 + $0x224] ss:$16 sps:$4 sm:$0xff]   ;;  %v5314_v46 = vld [vmem:[#allocation6 + $0x22c] ss:$16 sps:$4 sm:$0xff]  }
 0x24f   :  { %3557 = vmatpush1.bf16.msra.mxu0 %v5249_v47  ;;  %3639 = vmatpush1.bf16.msra.mxu1 %v5252_v48  ;;  %v5309_v48 = vld [vmem:[#allocation6 + $0x220] ss:$16 sps:$4 sm:$0xff]  }
 0x250   :  { %3558 = vmatprep.subr.bf16.mxu0 %v5257_v49  ;;  %3640 = vmatprep.subr.bf16.mxu1 %v5260_v55  ;;  %v5312_v49 = vld [vmem:[#allocation6 + $0x228] ss:$16 sps:$4 sm:$0xff]   ;;  %v5317_v55 = vld [vmem:[#allocation6 + $0x244] ss:$16 sps:$4 sm:$0xff]  }
 0x253   :  { %3559 = vmatpush1.bf16.msra.mxu0 %v5255_v56  ;;  %3641 = vmatpush1.bf16.msra.mxu1 %v5258_v57  ;;  %v5320_v56 = vld [vmem:[#allocation6 + $0x24c] ss:$16 sps:$4 sm:$0xff]   ;;  %v5315_v57 = vld [vmem:[#allocation6 + $0x240] ss:$16 sps:$4 sm:$0xff]  }
 0x254   :  { %3560 = vmatprep.subr.bf16.mxu0 %v5263_v58  ;;  %3642 = vmatprep.subr.bf16.mxu1 %v5266_v60  ;;  %v5318_v58 = vld [vmem:[#allocation6 + $0x248] ss:$16 sps:$4 sm:$0xff]   ;;  %v5323_v60 = vld [vmem:[#allocation6 + $0x264] ss:$16 sps:$4 sm:$0xff]  }
 0x257   :  { %3561 = vmatpush1.bf16.msra.mxu0 %v5261_v61  ;;  %3643 = vmatpush1.bf16.msra.mxu1 %v5264_v62  ;;  %v5326_v61 = vld [vmem:[#allocation6 + $0x26c] ss:$16 sps:$4 sm:$0xff]   ;;  %v5321_v62 = vld [vmem:[#allocation6 + $0x260] ss:$16 sps:$4 sm:$0xff]  }
 0x258   :  { %3562 = vmatprep.subr.bf16.mxu0 %v5269_v63  ;;  %3644 = vmatprep.subr.bf16.mxu1 %v5272_v0  ;;  %v5324_v63 = vld [vmem:[#allocation6 + $0x268] ss:$16 sps:$4 sm:$0xff]   ;;  %v5329_v0 = vld [vmem:[#allocation6 + $0x284] ss:$16 sps:$4 sm:$0xff]  }
 0x25b   :  { %3563 = vmatpush1.bf16.msra.mxu0 %v5267_v1  ;;  %3645 = vmatpush1.bf16.msra.mxu1 %v5270_v2  ;;  %v5332_v1 = vld [vmem:[#allocation6 + $0x28c] ss:$16 sps:$4 sm:$0xff]   ;;  %v5327_v2 = vld [vmem:[#allocation6 + $0x280] ss:$16 sps:$4 sm:$0xff]  }
 0x25c   :  { %3564 = vmatprep.subr.bf16.mxu0 %v5275_v4  ;;  %3646 = vmatprep.subr.bf16.mxu1 %v5278_v5  ;;  %v5330_v4 = vld [vmem:[#allocation6 + $0x288] ss:$16 sps:$4 sm:$0xff]   ;;  %v5335_v5 = vld [vmem:[#allocation6 + $0x2a4] ss:$16 sps:$4 sm:$0xff]  }
 0x25f   :  { %3565 = vmatpush1.bf16.msra.mxu0 %v5273_v6  ;;  %3647 = vmatpush1.bf16.msra.mxu1 %v5276_v7  ;;  %v5338_v6 = vld [vmem:[#allocation6 + $0x2ac] ss:$16 sps:$4 sm:$0xff]   ;;  %v5333_v7 = vld [vmem:[#allocation6 + $0x2a0] ss:$16 sps:$4 sm:$0xff]  }
 0x260   :  { %3566 = vmatprep.subr.bf16.mxu0 %v5281_v8  ;;  %3648 = vmatprep.subr.bf16.mxu1 %v5284_v9  ;;  %v5336_v8 = vld [vmem:[#allocation6 + $0x2a8] ss:$16 sps:$4 sm:$0xff]   ;;  %v5341_v9 = vld [vmem:[#allocation6 + $0x2c4] ss:$16 sps:$4 sm:$0xff]  }
 0x263   :  { %3567 = vmatpush1.bf16.msra.mxu0 %v5279_v10  ;;  %3649 = vmatpush1.bf16.msra.mxu1 %v5282_v11  ;;  %v5344_v10 = vld [vmem:[#allocation6 + $0x2cc] ss:$16 sps:$4 sm:$0xff]   ;;  %v5339_v11 = vld [vmem:[#allocation6 + $0x2c0] ss:$16 sps:$4 sm:$0xff]  }
 0x264   :  { %3568 = vmatprep.subr.bf16.mxu0 %v5287_v50  ;;  %3650 = vmatprep.subr.bf16.mxu1 %v5290_v12  ;;  %v5342_v50 = vld [vmem:[#allocation6 + $0x2c8] ss:$16 sps:$4 sm:$0xff]   ;;  %v5347_v12 = vld [vmem:[#allocation6 + $0x2e4] ss:$16 sps:$4 sm:$0xff]  }
 0x267   :  { %3569 = vmatpush1.bf16.msra.mxu0 %v5285_v13  ;;  %3651 = vmatpush1.bf16.msra.mxu1 %v5288_v14  ;;  %v5350_v13 = vld [vmem:[#allocation6 + $0x2ec] ss:$16 sps:$4 sm:$0xff]   ;;  %v5345_v14 = vld [vmem:[#allocation6 + $0x2e0] ss:$16 sps:$4 sm:$0xff]  }
 0x268   :  { %3570 = vmatprep.subr.bf16.mxu0 %v5293_v15  ;;  %3652 = vmatprep.subr.bf16.mxu1 %v5296_v16  ;;  %v5348_v15 = vld [vmem:[#allocation6 + $0x2e8] ss:$16 sps:$4 sm:$0xff]   ;;  %v5353_v16 = vld [vmem:[#allocation6 + $0x304] ss:$16 sps:$4 sm:$0xff]  }
 0x26b   :  { %3571 = vmatpush1.bf16.msra.mxu0 %v5291_v17  ;;  %3653 = vmatpush1.bf16.msra.mxu1 %v5294_v52  ;;  %v5356_v17 = vld [vmem:[#allocation6 + $0x30c] ss:$16 sps:$4 sm:$0xff]   ;;  %v5351_v52 = vld [vmem:[#allocation6 + $0x300] ss:$16 sps:$4 sm:$0xff]  }
 0x26c   :  { %3572 = vmatprep.subr.bf16.mxu0 %v5299_v18  ;;  %3654 = vmatprep.subr.bf16.mxu1 %v5302_v19  ;;  %v5354_v18 = vld [vmem:[#allocation6 + $0x308] ss:$16 sps:$4 sm:$0xff]   ;;  %v5359_v19 = vld [vmem:[#allocation6 + $0x324] ss:$16 sps:$4 sm:$0xff]  }
 0x26f   :  { %3573 = vmatpush1.bf16.msra.mxu0 %v5297_v20  ;;  %3655 = vmatpush1.bf16.msra.mxu1 %v5300_v21  ;;  %v5362_v20 = vld [vmem:[#allocation6 + $0x32c] ss:$16 sps:$4 sm:$0xff]   ;;  %v5357_v21 = vld [vmem:[#allocation6 + $0x320] ss:$16 sps:$4 sm:$0xff]  }
 0x270   :  { %3583 = vmatprep.subr.bf16.mxu0 %v5305_v59  ;;  %3665 = vmatprep.subr.bf16.mxu1 %v5308_v22  ;;  %v5360_v59 = vld [vmem:[#allocation6 + $0x328] ss:$16 sps:$4 sm:$0xff]   ;;  %v5365_v22 = vld [vmem:[#allocation6 + $0x344] ss:$16 sps:$4 sm:$0xff]  }
 0x305   :  { %v2655_v27 = vpop.f32.mrb[4].mxu0  ;;  %v5671_v28 = vpop.f32.mrb[4].mxu1 }
 0x306   :  { %v4625_v29 = vadd.f32 %v2655_v27, %v1923_v24  ;;  %v2657_v30 = vpop.f32.mrb[5].mxu0  ;;  %v2739_v31 = vpop.f32.mrb[5].mxu1  ;;  %v5368_v24 = vld [vmem:[#allocation6 + $0x34c] ss:$16 sps:$4 sm:$0xff]   ;;  %v5371_v27 = vld [vmem:[#allocation6 + $0x364] ss:$16 sps:$4 sm:$0xff]  }
 0x307   :  { %v4626_v32 = vadd.f32 %v2657_v30, %v1927_v25  ;;  %v4628_v33 = vadd.f32 %v2739_v31, %v1935_v26  ;;  %v2659_v34 = vpop.f32.mrb[6].mxu0  ;;  %v2741_v35 = vpop.f32.mrb[6].mxu1  ;;  %v5363_v25 = vld [vmem:[#allocation6 + $0x340] ss:$16 sps:$4 sm:$0xff]   ;;  %v5366_v26 = vld [vmem:[#allocation6 + $0x348] ss:$16 sps:$4 sm:$0xff]  }
 0x308   :  { %v2744_v36 = vmax.f32 %v4625_v29, 0.0  ;;  %v2660_v37 = vpop.f32.mrb[7].mxu0  ;;  %v2742_v38 = vpop.f32.mrb[7].mxu1  ;;  %v5374_v29 = vld [vmem:[#allocation6 + $0x36c] ss:$16 sps:$4 sm:$0xff]  }
 0x309   :  { %v2745_v39 = vmax.f32 %v4626_v32, 0.0  ;;  %v2747_v40 = vmax.f32 %v4628_v33, 0.0  ;;  %v5369_v30 = vld [vmem:[#allocation6 + $0x360] ss:$16 sps:$4 sm:$0xff]   ;;  %v5372_v31 = vld [vmem:[#allocation6 + $0x368] ss:$16 sps:$4 sm:$0xff]  }
 0x30a   :  { %v2748_v44 = vpack.c.bf16 %v2744_v36, %v2744_v36  ;;  %v5377_v32 = vld [vmem:[#allocation6 + $0x384] ss:$16 sps:$4 sm:$0xff]   ;;  %v5380_v33 = vld [vmem:[#allocation6 + $0x38c] ss:$16 sps:$4 sm:$0xff]   ;;  %v5375_v34 = vld [vmem:[#allocation6 + $0x380] ss:$16 sps:$4 sm:$0xff]  }
 0x30b   :  { %v2749_v41 = vpack.c.bf16 %v2745_v39, %v2745_v39  ;;  %v2751_v47 = vpack.c.bf16 %v2747_v40, %v2747_v40  ;;  %v5378_v35 = vld [vmem:[#allocation6 + $0x388] ss:$16 sps:$4 sm:$0xff]   ;;  %v5383_v36 = vld [vmem:[#allocation6 + $0x3a4] ss:$16 sps:$4 sm:$0xff]   ;;  %v5386_v37 = vld [vmem:[#allocation6 + $0x3ac] ss:$16 sps:$4 sm:$0xff]   ;;  %v1931_v40 = vrot.slane %v5663_v23, %v5655_v3 }
 0x30c   :  { %v5381_v38 = vld [vmem:[#allocation6 + $0x3a0] ss:$16 sps:$4 sm:$0xff]   ;;  %v5384_v39 = vld [vmem:[#allocation6 + $0x3a8] ss:$16 sps:$4 sm:$0xff]  }
 0x30d   :  { %3574 = vmatprep.mubr.bf16.mxu0 %v2749_v41  ;;  %3656 = vmatprep.mubr.bf16.mxu1 %v2749_v41  ;;  %v5389_v41 = vld [vmem:[#allocation6 + $0x3c4] ss:$16 sps:$4 sm:$0xff]  }
 0x30e   :  { %3575 = vmatmul.mubr.bf16.vlgmr.msra.gmra.mrb[8].mxu0 %v2748_v44  ;;  %3657 = vmatmul.mubr.bf16.vlgmr.msra.gmra.mrb[8].mxu1 %v2748_v44  ;;  %v5390_v44 = vld [vmem:[#allocation6 + $0x3c8] ss:$16 sps:$4 sm:$0xff]   ;;  %v5399_v23 = vld [vmem:[%s5792_s7 + $0x40] sm:$0xff]  }
 0x30f   :  { %3584 = vmatpush1.bf16.msra.mxu0 %v5303_v42  ;;  %3666 = vmatpush1.bf16.msra.mxu1 %v5306_v43  ;;  %v5392_v42 = vld [vmem:[#allocation6 + $0x3cc] ss:$16 sps:$4 sm:$0xff]   ;;  %v5387_v43 = vld [vmem:[#allocation6 + $0x3c0] ss:$16 sps:$4 sm:$0xff]  }
 0x310   :  { %3615 = vmatprep.mubr.bf16.mxu0 %v2751_v47  ;;  %3697 = vmatprep.mubr.bf16.mxu1 %v2751_v47  ;;  %v5398_v47 = vld [vmem:[#allocation6 + $0x3ec] ss:$16 sps:$4 sm:$0xff]  }
 0x311   :  { %3585 = vmatprep.subr.bf16.mxu0 %v5311_v45  ;;  %3667 = vmatprep.subr.bf16.mxu1 %v5314_v46  ;;  %v4627_v45 = vadd.f32 %v5671_v28, %v1931_v40  ;;  %v5395_v46 = vld [vmem:[#allocation6 + $0x3e4] ss:$16 sps:$4 sm:$0xff]  }
 0x312   :  { %v5401_v28 = vld [vmem:[%s5792_s7] sm:$0xff]  }
 0x313   :  { %3586 = vmatpush1.bf16.msra.mxu0 %v5309_v48  ;;  %3668 = vmatpush1.bf16.msra.mxu1 %v5312_v49  ;;  %v5393_v48 = vld [vmem:[#allocation6 + $0x3e0] ss:$16 sps:$4 sm:$0xff]   ;;  %v5396_v49 = vld [vmem:[#allocation6 + $0x3e8] ss:$16 sps:$4 sm:$0xff]  }
 0x314   :  { %3587 = vmatprep.subr.bf16.mxu0 %v5317_v55  ;;  %3669 = vmatprep.subr.bf16.mxu1 %v5320_v56  ;;  %v2746_v55 = vmax.f32 %v4627_v45, 0.0  ;;  %v5400_v56 = vld [vmem:[%s5792_s7 + $0xc0] sm:$0xff]  }
 0x317   :  { %3588 = vmatpush1.bf16.msra.mxu0 %v5315_v57  ;;  %3670 = vmatpush1.bf16.msra.mxu1 %v5318_v58  ;;  %v5402_v57 = vld [vmem:[%s5792_s7 + $0x80] sm:$0xff]   ;;  %v2750_v58 = vpack.c.bf16 %v2746_v55, %v2746_v55 }
 0x318   :  { %3589 = vmatprep.subr.bf16.mxu0 %v5323_v60  ;;  %3671 = vmatprep.subr.bf16.mxu1 %v5326_v61  ;;  %v5403_v60 = vld [vmem:[%s5792_s7 + $0x48] sm:$0xff]  }
 0x319   :  { %v5404_v61 = vld [vmem:[%s5792_s7 + $0xc8] sm:$0xff]  }
 0x31b   :  { %3590 = vmatpush1.bf16.msra.mxu0 %v5321_v62  ;;  %3672 = vmatpush1.bf16.msra.mxu1 %v5324_v63  ;;  %v5405_v62 = vld [vmem:[%s5792_s7 + $0x8] sm:$0xff]  }
 0x31c   :  { %3591 = vmatprep.subr.bf16.mxu0 %v5329_v0  ;;  %3673 = vmatprep.subr.bf16.mxu1 %v5332_v1  ;;  %v5406_v63 = vld [vmem:[%s5792_s7 + $0x88] sm:$0xff]   ;;  %v5407_v0 = vld [vmem:[%s5792_s7 + $0x50] sm:$0xff]  }
 0x31d   :  { %v5408_v1 = vld [vmem:[%s5792_s7 + $0xd0] sm:$0xff]  }
 0x31f   :  { %3592 = vmatpush1.bf16.msra.mxu0 %v5327_v2  ;;  %3674 = vmatpush1.bf16.msra.mxu1 %v5330_v4  ;;  %v5409_v2 = vld [vmem:[%s5792_s7 + $0x10] sm:$0xff]  }
 0x320   :  { %3593 = vmatprep.subr.bf16.mxu0 %v5335_v5  ;;  %3675 = vmatprep.subr.bf16.mxu1 %v5338_v6  ;;  %v5410_v4 = vld [vmem:[%s5792_s7 + $0x90] sm:$0xff]   ;;  %v5411_v5 = vld [vmem:[%s5792_s7 + $0x58] sm:$0xff]  }
 0x321   :  { %v5412_v6 = vld [vmem:[%s5792_s7 + $0xd8] sm:$0xff]  }
 0x323   :  { %3594 = vmatpush1.bf16.msra.mxu0 %v5333_v7  ;;  %3676 = vmatpush1.bf16.msra.mxu1 %v5336_v8  ;;  %v5413_v7 = vld [vmem:[%s5792_s7 + $0x18] sm:$0xff]  }
 0x324   :  { %3595 = vmatprep.subr.bf16.mxu0 %v5341_v9  ;;  %3677 = vmatprep.subr.bf16.mxu1 %v5344_v10  ;;  %v5414_v8 = vld [vmem:[%s5792_s7 + $0x98] sm:$0xff]   ;;  %v5415_v9 = vld [vmem:[%s5792_s7 + $0x60] sm:$0xff]  }
 0x325   :  { %v5416_v10 = vld [vmem:[%s5792_s7 + $0xe0] sm:$0xff]  }
 0x327   :  { %3596 = vmatpush1.bf16.msra.mxu0 %v5339_v11  ;;  %3678 = vmatpush1.bf16.msra.mxu1 %v5342_v50  ;;  %v5417_v11 = vld [vmem:[%s5792_s7 + $0x20] sm:$0xff]  }
 0x328   :  { %3597 = vmatprep.subr.bf16.mxu0 %v5347_v12  ;;  %3679 = vmatprep.subr.bf16.mxu1 %v5350_v13  ;;  %v5418_v50 = vld [vmem:[%s5792_s7 + $0xa0] sm:$0xff]   ;;  %v5419_v12 = vld [vmem:[%s5792_s7 + $0x68] sm:$0xff]  }
 0x329   :  { %v5420_v13 = vld [vmem:[%s5792_s7 + $0xe8] sm:$0xff]  }
 0x32b   :  { %3598 = vmatpush1.bf16.msra.mxu0 %v5345_v14  ;;  %3680 = vmatpush1.bf16.msra.mxu1 %v5348_v15  ;;  %v5421_v14 = vld [vmem:[%s5792_s7 + $0x28] sm:$0xff]  }
 0x32c   :  { %3599 = vmatprep.subr.bf16.mxu0 %v5353_v16  ;;  %3681 = vmatprep.subr.bf16.mxu1 %v5356_v17  ;;  %v5422_v15 = vld [vmem:[%s5792_s7 + $0xa8] sm:$0xff]   ;;  %v5423_v16 = vld [vmem:[%s5792_s7 + $0x70] sm:$0xff]  }
 0x32d   :  { %v5424_v17 = vld [vmem:[%s5792_s7 + $0xf0] sm:$0xff]  }
 0x32f   :  { %3600 = vmatpush1.bf16.msra.mxu0 %v5351_v52  ;;  %3682 = vmatpush1.bf16.msra.mxu1 %v5354_v18  ;;  %v5425_v52 = vld [vmem:[%s5792_s7 + $0x30] sm:$0xff]  }
 0x330   :  { %3601 = vmatprep.subr.bf16.mxu0 %v5359_v19  ;;  %3683 = vmatprep.subr.bf16.mxu1 %v5362_v20  ;;  %v5426_v18 = vld [vmem:[%s5792_s7 + $0xb0] sm:$0xff]   ;;  %v5427_v19 = vld [vmem:[%s5792_s7 + $0x78] sm:$0xff]  }
 0x331   :  { %v5428_v20 = vld [vmem:[%s5792_s7 + $0xf8] sm:$0xff]  }
 0x333   :  { %3602 = vmatpush1.bf16.msra.mxu0 %v5357_v21  ;;  %3684 = vmatpush1.bf16.msra.mxu1 %v5360_v59  ;;  %v5429_v21 = vld [vmem:[%s5792_s7 + $0x38] sm:$0xff]  }
 0x334   :  { %3603 = vmatprep.subr.bf16.mxu0 %v5365_v22  ;;  %3685 = vmatprep.subr.bf16.mxu1 %v5368_v24  ;;  %v5430_v59 = vld [vmem:[%s5792_s7 + $0xb8] sm:$0xff]   ;;  %v2880_v22 = vld [vmem:[%s5791_s6] sm:$0xf] }
 0x335   :  { %v2885_v24 = vrot.slane %v2880_v22, %v5633_v51 }
 0x337   :  { %3604 = vmatpush1.bf16.msra.mxu0 %v5363_v25  ;;  %3686 = vmatpush1.bf16.msra.mxu1 %v5366_v26  ;;  %v2893_v25 = vrot.slane %v2880_v22, %v5655_v3  ;;  %v2889_v26 = vrot.slane %v2880_v22, %v5641_v53 }
 0x338   :  { %3605 = vmatprep.subr.bf16.mxu0 %v5371_v27  ;;  %3687 = vmatprep.subr.bf16.mxu1 %v5374_v29  ;;  %v2897_v27 = vrot.slane %v2880_v22, %v5644_v54 }
 0x33b   :  { %3606 = vmatpush1.bf16.msra.mxu0 %v5369_v30  ;;  %3688 = vmatpush1.bf16.msra.mxu1 %v5372_v31 }
 0x33c   :  { %3607 = vmatprep.subr.bf16.mxu0 %v5377_v32  ;;  %3689 = vmatprep.subr.bf16.mxu1 %v5380_v33 }
 0x33f   :  { %3608 = vmatpush1.bf16.msra.mxu0 %v5375_v34  ;;  %3690 = vmatpush1.bf16.msra.mxu1 %v5378_v35 }
 0x340   :  { %3609 = vmatprep.subr.bf16.mxu0 %v5383_v36  ;;  %3691 = vmatprep.subr.bf16.mxu1 %v5386_v37 }
 0x343   :  { %3610 = vmatpush1.bf16.msra.mxu0 %v5381_v38  ;;  %3692 = vmatpush1.bf16.msra.mxu1 %v5384_v39 }
 0x344   :  { %3611 = vmatprep.subr.bf16.mxu0 %v5389_v41  ;;  %3693 = vmatprep.subr.bf16.mxu1 %v5392_v42 }
 0x347   :  { %3612 = vmatpush1.bf16.msra.mxu0 %v5387_v43  ;;  %3694 = vmatpush1.bf16.msra.mxu1 %v5390_v44 }
 0x348   :  { %3613 = vmatprep.subr.bf16.mxu0 %v5395_v46  ;;  %3695 = vmatprep.subr.bf16.mxu1 %v5398_v47  ;;  %v4544_v47 = vld [vmem:[%s5793_s8] ss:$0 sm:$0xff] }
 0x34b   :  { %3614 = vmatpush1.bf16.msra.mxu0 %v5393_v48  ;;  %3696 = vmatpush1.bf16.msra.mxu1 %v5396_v49 }
 0x34c   :  { %4577 = vmatprep.subr.bf16.mxu0 %v5399_v23  ;;  %4599 = vmatprep.subr.bf16.mxu1 %v5400_v56 }
 0x34e   :  { %3616 = vmatmul.mubr.bf16.vlgmr.msra.gmra.mrb[8].mxu0 %v2750_v58  ;;  %3698 = vmatmul.mubr.bf16.vlgmr.msra.gmra.mrb[8].mxu1 %v2750_v58 }
 0x34f   :  { %4578 = vmatpush3.bf16.msra.mxu0 %v5401_v28  ;;  %4600 = vmatpush3.bf16.msra.mxu1 %v5402_v57 }
 0x350   :  { %4579 = vmatprep.subr.bf16.mxu0 %v5403_v60  ;;  %4601 = vmatprep.subr.bf16.mxu1 %v5404_v61 }
 0x353   :  { %4580 = vmatpush3.bf16.msra.mxu0 %v5405_v62  ;;  %4602 = vmatpush3.bf16.msra.mxu1 %v5406_v63 }
 0x354   :  { %4581 = vmatprep.subr.bf16.mxu0 %v5407_v0  ;;  %4603 = vmatprep.subr.bf16.mxu1 %v5408_v1 }
 0x357   :  { %4582 = vmatpush3.bf16.msra.mxu0 %v5409_v2  ;;  %4604 = vmatpush3.bf16.msra.mxu1 %v5410_v4 }
 0x358   :  { %4583 = vmatprep.subr.bf16.mxu0 %v5411_v5  ;;  %4605 = vmatprep.subr.bf16.mxu1 %v5412_v6 }
 0x35b   :  { %4584 = vmatpush3.bf16.msra.mxu0 %v5413_v7  ;;  %4606 = vmatpush3.bf16.msra.mxu1 %v5414_v8 }
 0x35c   :  { %4585 = vmatprep.subr.bf16.mxu0 %v5415_v9  ;;  %4607 = vmatprep.subr.bf16.mxu1 %v5416_v10 }
 0x35f   :  { %4586 = vmatpush3.bf16.msra.mxu0 %v5417_v11  ;;  %4608 = vmatpush3.bf16.msra.mxu1 %v5418_v50 }
 0x360   :  { %4587 = vmatprep.subr.bf16.mxu0 %v5419_v12  ;;  %4609 = vmatprep.subr.bf16.mxu1 %v5420_v13 }
 0x363   :  { %4588 = vmatpush3.bf16.msra.mxu0 %v5421_v14  ;;  %4610 = vmatpush3.bf16.msra.mxu1 %v5422_v15 }
 0x364   :  { %4589 = vmatprep.subr.bf16.mxu0 %v5423_v16  ;;  %4611 = vmatprep.subr.bf16.mxu1 %v5424_v17 }
 0x367   :  { %4590 = vmatpush3.bf16.msra.mxu0 %v5425_v52  ;;  %4612 = vmatpush3.bf16.msra.mxu1 %v5426_v18 }
 0x368   :  { %4591 = vmatprep.subr.bf16.mxu0 %v5427_v19  ;;  %4613 = vmatprep.subr.bf16.mxu1 %v5428_v20 }
 0x36b   :  { %4592 = vmatpush3.bf16.msra.mxu0 %v5429_v21  ;;  %4614 = vmatpush3.bf16.msra.mxu1 %v5430_v59 }
 0x421   :  { %v3617_v29 = vpop.f32.mrb[8].mxu0  ;;  %v3699_v30 = vpop.f32.mrb[8].mxu1 }
 0x422   :  { %v4629_v31 = vadd.f32 %v3617_v29, %v2885_v24  ;;  %v4631_v32 = vadd.f32 %v3699_v30, %v2893_v25  ;;  %v3619_v33 = vpop.f32.mrb[9].mxu0  ;;  %v3701_v34 = vpop.f32.mrb[9].mxu1 }
 0x423   :  { %v4630_v35 = vadd.f32 %v3619_v33, %v2889_v26  ;;  %v4632_v36 = vadd.f32 %v3701_v34, %v2897_v27  ;;  %v3621_v37 = vpop.f32.mrb[10].mxu0  ;;  %v3703_v38 = vpop.f32.mrb[10].mxu1 }
 0x424   :  { %v3706_v39 = vmax.f32 %v4629_v31, 0.0  ;;  %v3708_v40 = vmax.f32 %v4631_v32, 0.0  ;;  %v3622_v41 = vpop.f32.mrb[11].mxu0  ;;  %v3704_v51 = vpop.f32.mrb[11].mxu1 }
 0x425   :  { %v3707_v42 = vmax.f32 %v4630_v35, 0.0  ;;  %v3709_v3 = vmax.f32 %v4632_v36, 0.0 }
 0x426   :  { %v3710_v44 = vpack.c.bf16 %v3706_v39, %v3706_v39  ;;  %v3712_v54 = vpack.c.bf16 %v3708_v40, %v3708_v40 }
 0x427   :  { %v3711_v43 = vpack.c.bf16 %v3707_v42, %v3707_v42  ;;  %v3713_v53 = vpack.c.bf16 %v3709_v3, %v3709_v3 }
 0x429   :  { %4009 = vmatprep.mubr.bf16.mxu0 %v3711_v43  ;;  %4049 = vmatprep.mubr.bf16.mxu1 %v3713_v53 }
 0x42a   :  { %4010 = vmatmul.mubr.bf16.vlgmr.msra.gmra.mrb[12].mxu0 %v3710_v44  ;;  %4050 = vmatmul.mubr.bf16.vlgmr.msra.gmra.mrb[12].mxu1 %v3712_v54 }
 0x4fd   :  { %v4593_v45 = vpop.f32.mrb[12].mxu0  ;;  %v4615_v46 = vpop.f32.mrb[12].mxu1 }
 0x4fe   :  { %v4594_v48 = vpop.f32.mrb[13].mxu0  ;;  %v4616_v49 = vpop.f32.mrb[13].mxu1 }
 0x4ff   :  { %v4595_v55 = vadd.f32 %v4594_v48, %v4593_v45  ;;  %v4617_v23 = vadd.f32 %v4616_v49, %v4615_v46  ;;  %v4596_v56 = vpop.f32.mrb[14].mxu0  ;;  %v4618_v28 = vpop.f32.mrb[14].mxu1 }
 0x500   :  { %v4597_v57 = vpop.f32.mrb[15].mxu0  ;;  %v4619_v58 = vpop.f32.mrb[15].mxu1 }
 0x501   :  { %v4012_v60 = vadd.f32 %v4595_v55, %v4544_v47 }
 0x503   :  { %v4052_v61 = vadd.f32 %v4617_v23, %v4012_v60 }
 0x505   :  { %4057 = vst [vmem:[%s5794_s9] sm:$0xff] %v4052_v61 }
 0x506   :  { %4062 = vsyncpa [#allocation3], 1 }
 0x507   :  { %4063 = vsyncpa [#allocation5], 1 }

// kernel: fnn_forward.1
= control target key start
LH: loop header
LB: loop body
LE: loop exit
PB: predicated region body
PF: predicated region fallthrough
CT: control target
= control target key end

     0   :  { %14 = vsyncpa [#allocation3], 0  ;;  %s5785_s0 = inlined_call_operand.vmem [shape: f32[8,896], index: 0, kind: input, shape index: {}]   ;;  %s5786_s1 = inlined_call_operand.hbm [shape: bf16[896,512], index: 1, kind: input, shape index: {}]   ;;  %s5787_s2 = inlined_call_operand.vmem [shape: f32[1,512], index: 2, kind: input, shape index: {}]   ;;  %s5788_s3 = inlined_call_operand.hbm [shape: bf16[512,512], index: 3, kind: input, shape index: {}]   ;;  %s5789_s4 = inlined_call_operand.vmem [shape: f32[1,512], index: 4, kind: input, shape index: {}]   ;;  %s5790_s5 = inlined_call_operand.hbm [shape: bf16[512,512], index: 5, kind: input, shape index: {}]   ;;  %s5791_s6 = inlined_call_operand.vmem [shape: f32[1,512], index: 6, kind: input, shape index: {}]   ;;  %s5792_s7 = inlined_call_operand.vmem [shape: bf16[512,128], index: 7, kind: input, shape index: {}]   ;;  %s5793_s8 = inlined_call_operand.vmem [shape: f32[1,128], index: 8, kind: input, shape index: {}]   ;;  %s5794_s9 = inlined_call_operand.vmem [shape: f32[8,128], index: 9, kind: output, shape index: {}]  }
   0x1   :  { %15 = vsyncpa [#allocation5], 0  ;;  %s5501_s30 = smov [#allocation4]   ;;  %s5502_s11 = smov [#allocation2]  }
   0x2   :  { %s37_s10 = sshll.u32 %s5501_s30, 4  ;;  %s23_s12 = sshll.u32 %s5502_s11, 4  ;;  %s38_s10 = int_to_ptr.vmem [resolvable:$true] %s37_s10  ;;  %s5557_s12 = int_to_ptr.vmem [resolvable:$true] %s23_s12 }
   0x3   :  { %s5431_s15 = scalar_lea.hbm %s5788_s3, 16384 }
   0x4   :  { %p5432_p0 = scmp.ne.s32.totalorder %s5788_s3, %s5431_s15  ;;  %p5435_p1 = scmp.lt.u32.totalorder %s5431_s15, %s5788_s3 }
   0x6   :  { %p5437_p2 = pnand %p5435_p1, %p5432_p0 }
   0x8   :  { %5440 = shalt.err (!%p5437_p2)
}
   0x9   :  { %s5441_s20 = scalar_lea.vmem %s38_s10, 16384  ;;  %p5446_p4 = scmp.lt.s32.totalorder %s38_s10, %s38_s10 }
   0xa   :  { %p5442_p3 = scmp.ne.s32.totalorder %s38_s10, %s5441_s20  ;;  %p5447_p5 = scmp.lt.s32.totalorder %s5441_s20, %s5441_s20 }
   0xc   :  { %p5448_p6 = por %p5447_p5, %p5446_p4 }
   0xe   :  { %p5449_p7 = pnand %p5448_p6, %p5442_p3 }
  0x10   :  { %5452 = shalt.err (!%p5449_p7)
}
  0x11   :  { %s5503_s21 = smov 256   ;;  %s5504_s22 = smov 16  }
  0x12   :  { %43 = dma.hbm_to_vmem [thread:$0]  %s5788_s3, 16384, %s38_s10, [#allocation5], %s5503_s21, %s5503_s21, %s5504_s22  }
  0x13   :  { %s5453_s27 = scalar_lea.hbm %s5786_s1, 28672 }
  0x14   :  { %p5454_p8 = scmp.ne.s32.totalorder %s5786_s1, %s5453_s27  ;;  %p5457_p9 = scmp.lt.u32.totalorder %s5453_s27, %s5786_s1 }
  0x16   :  { %p5459_p10 = pnand %p5457_p9, %p5454_p8 }
  0x18   :  { %5462 = shalt.err (!%p5459_p10)
}
  0x19   :  { %s5463_s13 = scalar_lea.vmem %s5557_s12, 28672  ;;  %p5468_p12 = scmp.lt.s32.totalorder %s5557_s12, %s5557_s12 }
  0x1a   :  { %p5464_p11 = scmp.ne.s32.totalorder %s5557_s12, %s5463_s13  ;;  %p5469_p13 = scmp.lt.s32.totalorder %s5463_s13, %s5463_s13 }
  0x1c   :  { %p5470_p0 = por %p5469_p13, %p5468_p12 }
  0x1e   :  { %p5471_p1 = pnand %p5470_p0, %p5464_p11 }
  0x20   :  { %5474 = shalt.err (!%p5471_p1)
}
  0x21   :  { %29 = dma.hbm_to_vmem [thread:$0]  %s5786_s1, 28672, %s5557_s12, [#allocation3], %s5503_s21, %s5503_s21, %s5504_s22  }
  0x22   :  { %s5505_s14 = smov [#allocation6]   ;;  %s5475_s18 = scalar_lea.hbm %s5790_s5, 16384 }
  0x23   :  { %s51_s15 = sshll.u32 %s5505_s14, 4  ;;  %p5476_p2 = scmp.ne.s32.totalorder %s5790_s5, %s5475_s18  ;;  %s52_s15 = int_to_ptr.vmem [resolvable:$true] %s51_s15 }
  0x24   :  { %p5479_p3 = scmp.lt.u32.totalorder %s5475_s18, %s5790_s5 }
  0x26   :  { %p5481_p4 = pnand %p5479_p3, %p5476_p2 }
  0x28   :  { %5484 = shalt.err (!%p5481_p4)
}
  0x29   :  { %s5485_s25 = scalar_lea.vmem %s52_s15, 16384  ;;  %p5490_p6 = scmp.lt.s32.totalorder %s52_s15, %s52_s15 }
  0x2a   :  { %p5486_p5 = scmp.ne.s32.totalorder %s52_s15, %s5485_s25  ;;  %p5491_p7 = scmp.lt.s32.totalorder %s5485_s25, %s5485_s25 }
  0x2c   :  { %p5492_p8 = por %p5491_p7, %p5490_p6 }
  0x2e   :  { %p5493_p9 = pnand %p5492_p8, %p5486_p5 }
  0x30   :  { %5496 = shalt.err (!%p5493_p9)
}
  0x31   :  { %57 = dma.hbm_to_vmem [thread:$0]  %s5790_s5, 16384, %s52_s15, [#allocation5], %s5503_s21, %s5503_s21, %s5504_s22  }
  0x32   :  { %5497 = dma.done.wait [#allocation3], 28672  }
  0x33   :  { %5498 = vsyncadd [#allocation3], 4294938624 }
  0x34   :  { %5499 = dma.done.wait [#allocation5], 32768  }
  0x35   :  { %5500 = vsyncadd [#allocation5], 4294934528  ;;  %v4679_v0 = vld [vmem:[#allocation2 + $0x4] ss:$16 sps:$4 sm:$0xff]   ;;  %v4681_v1 = vld [vmem:[#allocation2 + $0xc] ss:$16 sps:$4 sm:$0xff]  }
  0x36   :  { %1454 = vmatprep.subr.bf16.mxu0 %v4679_v0  ;;  %v4683_v2 = vld [vmem:[#allocation2] ss:$16 sps:$4 sm:$0xff]   ;;  %v4684_v3 = vld [vmem:[#allocation2 + $0x8] ss:$16 sps:$4 sm:$0xff]   ;;  %1618 = vmatprep.subr.bf16.mxu1 %v4681_v1  ;;  %v4685_v4 = vld [vmem:[#allocation2 + $0x24] ss:$16 sps:$4 sm:$0xff]  }
  0x37   :  { %1455 = vmatpush1.bf16.msra.mxu0 %v4683_v2  ;;  %1619 = vmatpush1.bf16.msra.mxu1 %v4684_v3  ;;  %v4687_v5 = vld [vmem:[#allocation2 + $0x2c] ss:$16 sps:$4 sm:$0xff]   ;;  %v4689_v6 = vld [vmem:[#allocation2 + $0x20] ss:$16 sps:$4 sm:$0xff]   ;;  %v4690_v7 = vld [vmem:[#allocation2 + $0x28] ss:$16 sps:$4 sm:$0xff]  }
  0x38   :  { %1456 = vmatprep.subr.bf16.mxu0 %v4685_v4  ;;  %1620 = vmatprep.subr.bf16.mxu1 %v4687_v5  ;;  %v4691_v8 = vld [vmem:[#allocation2 + $0x44] ss:$16 sps:$4 sm:$0xff]   ;;  %v4693_v9 = vld [vmem:[#allocation2 + $0x4c] ss:$16 sps:$4 sm:$0xff]   ;;  %v4695_v10 = vld [vmem:[#allocation2 + $0x40] ss:$16 sps:$4 sm:$0xff]  }
  0x39   :  { %v4696_v11 = vld [vmem:[#allocation2 + $0x48] ss:$16 sps:$4 sm:$0xff]   ;;  %v4697_v12 = vld [vmem:[#allocation2 + $0x64] ss:$16 sps:$4 sm:$0xff]   ;;  %v4699_v13 = vld [vmem:[#allocation2 + $0x6c] ss:$16 sps:$4 sm:$0xff]  }
  0x3a   :  { %v4701_v14 = vld [vmem:[#allocation2 + $0x60] ss:$16 sps:$4 sm:$0xff]   ;;  %v4702_v15 = vld [vmem:[#allocation2 + $0x68] ss:$16 sps:$4 sm:$0xff]   ;;  %v4703_v16 = vld [vmem:[#allocation2 + $0x84] ss:$16 sps:$4 sm:$0xff]  }
  0x3b   :  { %1457 = vmatpush1.bf16.msra.mxu0 %v4689_v6  ;;  %1621 = vmatpush1.bf16.msra.mxu1 %v4690_v7  ;;  %v4705_v17 = vld [vmem:[#allocation2 + $0x8c] ss:$16 sps:$4 sm:$0xff]   ;;  %v4707_v18 = vld [vmem:[#allocation2 + $0x80] ss:$16 sps:$4 sm:$0xff]   ;;  %v4708_v19 = vld [vmem:[#allocation2 + $0x88] ss:$16 sps:$4 sm:$0xff]  }
  0x3c   :  { %1458 = vmatprep.subr.bf16.mxu0 %v4691_v8  ;;  %1622 = vmatprep.subr.bf16.mxu1 %v4693_v9  ;;  %v4709_v20 = vld [vmem:[#allocation2 + $0xa4] ss:$16 sps:$4 sm:$0xff]   ;;  %v4711_v21 = vld [vmem:[#allocation2 + $0xac] ss:$16 sps:$4 sm:$0xff]   ;;  %v4713_v22 = vld [vmem:[#allocation2 + $0xa0] ss:$16 sps:$4 sm:$0xff]  }
  0x3d   :  { %v4714_v23 = vld [vmem:[#allocation2 + $0xa8] ss:$16 sps:$4 sm:$0xff]   ;;  %v4715_v24 = vld [vmem:[#allocation2 + $0xc4] ss:$16 sps:$4 sm:$0xff]   ;;  %v4717_v25 = vld [vmem:[#allocation2 + $0xcc] ss:$16 sps:$4 sm:$0xff]  }
  0x3e   :  { %v4719_v26 = vld [vmem:[#allocation2 + $0xc0] ss:$16 sps:$4 sm:$0xff]   ;;  %v4720_v27 = vld [vmem:[#allocation2 + $0xc8] ss:$16 sps:$4 sm:$0xff]   ;;  %v4721_v28 = vld [vmem:[#allocation2 + $0xe4] ss:$16 sps:$4 sm:$0xff]  }
  0x3f   :  { %1459 = vmatpush1.bf16.msra.mxu0 %v4695_v10  ;;  %1623 = vmatpush1.bf16.msra.mxu1 %v4696_v11  ;;  %v4723_v29 = vld [vmem:[#allocation2 + $0xec] ss:$16 sps:$4 sm:$0xff]   ;;  %v4725_v30 = vld [vmem:[#allocation2 + $0xe0] ss:$16 sps:$4 sm:$0xff]   ;;  %v4726_v31 = vld [vmem:[#allocation2 + $0xe8] ss:$16 sps:$4 sm:$0xff]  }
  0x40   :  { %1460 = vmatprep.subr.bf16.mxu0 %v4697_v12  ;;  %1624 = vmatprep.subr.bf16.mxu1 %v4699_v13  ;;  %v4727_v32 = vld [vmem:[#allocation2 + $0x104] ss:$16 sps:$4 sm:$0xff]   ;;  %v4729_v33 = vld [vmem:[#allocation2 + $0x10c] ss:$16 sps:$4 sm:$0xff]   ;;  %v4731_v34 = vld [vmem:[#allocation2 + $0x100] ss:$16 sps:$4 sm:$0xff]  }
  0x41   :  { %v4732_v35 = vld [vmem:[#allocation2 + $0x108] ss:$16 sps:$4 sm:$0xff]   ;;  %v4733_v36 = vld [vmem:[#allocation2 + $0x124] ss:$16 sps:$4 sm:$0xff]   ;;  %v4735_v37 = vld [vmem:[#allocation2 + $0x12c] ss:$16 sps:$4 sm:$0xff]  }
  0x42   :  { %v4737_v38 = vld [vmem:[#allocation2 + $0x120] ss:$16 sps:$4 sm:$0xff]   ;;  %v4738_v39 = vld [vmem:[#allocation2 + $0x128] ss:$16 sps:$4 sm:$0xff]   ;;  %v4739_v40 = vld [vmem:[#allocation2 + $0x144] ss:$16 sps:$4 sm:$0xff]  }
  0x43   :  { %1461 = vmatpush1.bf16.msra.mxu0 %v4701_v14  ;;  %1625 = vmatpush1.bf16.msra.mxu1 %v4702_v15  ;;  %v4741_v41 = vld [vmem:[#allocation2 + $0x14c] ss:$16 sps:$4 sm:$0xff]   ;;  %v4743_v42 = vld [vmem:[#allocation2 + $0x140] ss:$16 sps:$4 sm:$0xff]   ;;  %v4744_v43 = vld [vmem:[#allocation2 + $0x148] ss:$16 sps:$4 sm:$0xff]  }
  0x44   :  { %1462 = vmatprep.subr.bf16.mxu0 %v4703_v16  ;;  %1626 = vmatprep.subr.bf16.mxu1 %v4705_v17  ;;  %v4745_v44 = vld [vmem:[#allocation2 + $0x164] ss:$16 sps:$4 sm:$0xff]   ;;  %v4747_v45 = vld [vmem:[#allocation2 + $0x16c] ss:$16 sps:$4 sm:$0xff]   ;;  %v4749_v47 = vld [vmem:[#allocation2 + $0x160] ss:$16 sps:$4 sm:$0xff]  }
  0x45   :  { %v75_v46 = vld [vmem:[%s5785_s0 + $0x8] sm:$0xff]  ;;  %v4751_v50 = vld [vmem:[#allocation2 + $0x184] ss:$16 sps:$4 sm:$0xff]   ;;  %v4755_v52 = vld [vmem:[#allocation2 + $0x180] ss:$16 sps:$4 sm:$0xff]  }
  0x46   :  { %v82_v48 = vpack.c.bf16 %v75_v46, %v75_v46  ;;  %v4750_v49 = vld [vmem:[#allocation2 + $0x168] ss:$16 sps:$4 sm:$0xff]   ;;  %v4753_v51 = vld [vmem:[#allocation2 + $0x18c] ss:$16 sps:$4 sm:$0xff]   ;;  %v4757_v54 = vld [vmem:[#allocation2 + $0x1a4] ss:$16 sps:$4 sm:$0xff]  }
  0x47   :  { %1463 = vmatpush1.bf16.msra.mxu0 %v4707_v18  ;;  %1627 = vmatpush1.bf16.msra.mxu1 %v4708_v19  ;;  %v4756_v53 = vld [vmem:[#allocation2 + $0x188] ss:$16 sps:$4 sm:$0xff]   ;;  %v4759_v55 = vld [vmem:[#allocation2 + $0x1ac] ss:$16 sps:$4 sm:$0xff]   ;;  %v4761_v56 = vld [vmem:[#allocation2 + $0x1a0] ss:$16 sps:$4 sm:$0xff]  }
  0x48   :  { %1464 = vmatprep.subr.bf16.mxu0 %v4709_v20  ;;  %1628 = vmatprep.subr.bf16.mxu1 %v4711_v21  ;;  %v4762_v57 = vld [vmem:[#allocation2 + $0x1a8] ss:$16 sps:$4 sm:$0xff]   ;;  %v4763_v58 = vld [vmem:[#allocation2 + $0x1c4] ss:$16 sps:$4 sm:$0xff]   ;;  %v4765_v59 = vld [vmem:[#allocation2 + $0x1cc] ss:$16 sps:$4 sm:$0xff]  }
  0x49   :  { %1486 = vmatprep.mubr.bf16.mxu0 %v82_v48  ;;  %1650 = vmatprep.mubr.bf16.mxu1 %v82_v48  ;;  %v4767_v60 = vld [vmem:[#allocation2 + $0x1c0] ss:$16 sps:$4 sm:$0xff]   ;;  %v4768_v61 = vld [vmem:[#allocation2 + $0x1c8] ss:$16 sps:$4 sm:$0xff]   ;;  %v4769_v62 = vld [vmem:[#allocation2 + $0x1e4] ss:$16 sps:$4 sm:$0xff]  }
  0x4a   :  { %v4771_v63 = vld [vmem:[#allocation2 + $0x1ec] ss:$16 sps:$4 sm:$0xff]   ;;  %v4773_v0 = vld [vmem:[#allocation2 + $0x1e0] ss:$16 sps:$4 sm:$0xff]   ;;  %v4774_v1 = vld [vmem:[#allocation2 + $0x1e8] ss:$16 sps:$4 sm:$0xff]  }
  0x4b   :  { %1465 = vmatpush1.bf16.msra.mxu0 %v4713_v22  ;;  %1629 = vmatpush1.bf16.msra.mxu1 %v4714_v23  ;;  %v74_v2 = vld [vmem:[%s5785_s0] sm:$0xff]  ;;  %v4780_v4 = vld [vmem:[#allocation2 + $0x20c] ss:$16 sps:$4 sm:$0xff]   ;;  %v4778_v7 = vld [vmem:[#allocation2 + $0x208] ss:$16 sps:$4 sm:$0xff]  }
  0x4c   :  { %1466 = vmatprep.subr.bf16.mxu0 %v4715_v24  ;;  %1630 = vmatprep.subr.bf16.mxu1 %v4717_v25  ;;  %v4777_v3 = vld [vmem:[#allocation2 + $0x204] ss:$16 sps:$4 sm:$0xff]   ;;  %v81_v5 = vpack.c.bf16 %v74_v2, %v74_v2  ;;  %v4775_v6 = vld [vmem:[#allocation2 + $0x200] ss:$16 sps:$4 sm:$0xff]   ;;  %v4786_v9 = vld [vmem:[#allocation2 + $0x22c] ss:$16 sps:$4 sm:$0xff]  }
  0x4d   :  { %v4783_v8 = vld [vmem:[#allocation2 + $0x224] ss:$16 sps:$4 sm:$0xff]   ;;  %v4781_v10 = vld [vmem:[#allocation2 + $0x220] ss:$16 sps:$4 sm:$0xff]   ;;  %v4784_v11 = vld [vmem:[#allocation2 + $0x228] ss:$16 sps:$4 sm:$0xff]  }
  0x4e   :  { %v4789_v12 = vld [vmem:[#allocation2 + $0x244] ss:$16 sps:$4 sm:$0xff]   ;;  %v4792_v13 = vld [vmem:[#allocation2 + $0x24c] ss:$16 sps:$4 sm:$0xff]   ;;  %v4787_v14 = vld [vmem:[#allocation2 + $0x240] ss:$16 sps:$4 sm:$0xff]  }
  0x4f   :  { %1467 = vmatpush1.bf16.msra.mxu0 %v4719_v26  ;;  %1631 = vmatpush1.bf16.msra.mxu1 %v4720_v27  ;;  %v4790_v15 = vld [vmem:[#allocation2 + $0x248] ss:$16 sps:$4 sm:$0xff]   ;;  %v4795_v16 = vld [vmem:[#allocation2 + $0x264] ss:$16 sps:$4 sm:$0xff]   ;;  %v4798_v17 = vld [vmem:[#allocation2 + $0x26c] ss:$16 sps:$4 sm:$0xff]  }
  0x50   :  { %1468 = vmatprep.subr.bf16.mxu0 %v4721_v28  ;;  %1632 = vmatprep.subr.bf16.mxu1 %v4723_v29  ;;  %v4793_v18 = vld [vmem:[#allocation2 + $0x260] ss:$16 sps:$4 sm:$0xff]   ;;  %v4796_v19 = vld [vmem:[#allocation2 + $0x268] ss:$16 sps:$4 sm:$0xff]   ;;  %v4801_v20 = vld [vmem:[#allocation2 + $0x284] ss:$16 sps:$4 sm:$0xff]  }
  0x51   :  { %v4804_v21 = vld [vmem:[#allocation2 + $0x28c] ss:$16 sps:$4 sm:$0xff]   ;;  %v4799_v22 = vld [vmem:[#allocation2 + $0x280] ss:$16 sps:$4 sm:$0xff]   ;;  %v4802_v23 = vld [vmem:[#allocation2 + $0x288] ss:$16 sps:$4 sm:$0xff]  }
  0x52   :  { %v4807_v24 = vld [vmem:[#allocation2 + $0x2a4] ss:$16 sps:$4 sm:$0xff]   ;;  %v4810_v25 = vld [vmem:[#allocation2 + $0x2ac] ss:$16 sps:$4 sm:$0xff]   ;;  %v4805_v26 = vld [vmem:[#allocation2 + $0x2a0] ss:$16 sps:$4 sm:$0xff]  }
  0x53   :  { %1469 = vmatpush1.bf16.msra.mxu0 %v4725_v30  ;;  %1633 = vmatpush1.bf16.msra.mxu1 %v4726_v31  ;;  %v4808_v27 = vld [vmem:[#allocation2 + $0x2a8] ss:$16 sps:$4 sm:$0xff]   ;;  %v4813_v28 = vld [vmem:[#allocation2 + $0x2c4] ss:$16 sps:$4 sm:$0xff]   ;;  %v4816_v29 = vld [vmem:[#allocation2 + $0x2cc] ss:$16 sps:$4 sm:$0xff]  }
  0x54   :  { %1470 = vmatprep.subr.bf16.mxu0 %v4727_v32  ;;  %1634 = vmatprep.subr.bf16.mxu1 %v4729_v33  ;;  %v77_v30 = vld [vmem:[%s5785_s0 + $0x18] sm:$0xff]  ;;  %v4811_v31 = vld [vmem:[#allocation2 + $0x2c0] ss:$16 sps:$4 sm:$0xff]   ;;  %v4837_v46 = vld [vmem:[#allocation2 + $0x344] ss:$16 sps:$4 sm:$0xff]  }
  0x55   :  { %v84_v32 = vpack.c.bf16 %v77_v30, %v77_v30  ;;  %v4814_v33 = vld [vmem:[#allocation2 + $0x2c8] ss:$16 sps:$4 sm:$0xff]   ;;  %v4835_v48 = vld [vmem:[#allocation2 + $0x340] ss:$16 sps:$4 sm:$0xff]   ;;  %v4867_v2 = vld [vmem:[#allocation2 + $0x3e4] ss:$16 sps:$4 sm:$0xff]  }
  0x56   :  { %v4903_v30 = vld [vmem:[#allocation2 + $0x4a4] ss:$16 sps:$4 sm:$0xff]  }
  0x57   :  { %1471 = vmatpush1.bf16.msra.mxu0 %v4731_v34  ;;  %1635 = vmatpush1.bf16.msra.mxu1 %v4732_v35  ;;  %v4819_v34 = vld [vmem:[#allocation2 + $0x2e4] ss:$16 sps:$4 sm:$0xff]   ;;  %v4822_v35 = vld [vmem:[#allocation2 + $0x2ec] ss:$16 sps:$4 sm:$0xff]  }
  0x58   :  { %1472 = vmatprep.subr.bf16.mxu0 %v4733_v36  ;;  %1636 = vmatprep.subr.bf16.mxu1 %v4735_v37  ;;  %v4817_v36 = vld [vmem:[#allocation2 + $0x2e0] ss:$16 sps:$4 sm:$0xff]   ;;  %v4820_v37 = vld [vmem:[#allocation2 + $0x2e8] ss:$16 sps:$4 sm:$0xff]  }
  0x5b   :  { %1473 = vmatpush1.bf16.msra.mxu0 %v4737_v38  ;;  %1637 = vmatpush1.bf16.msra.mxu1 %v4738_v39  ;;  %v4825_v38 = vld [vmem:[#allocation2 + $0x304] ss:$16 sps:$4 sm:$0xff]   ;;  %v4828_v39 = vld [vmem:[#allocation2 + $0x30c] ss:$16 sps:$4 sm:$0xff]  }
  0x5c   :  { %1474 = vmatprep.subr.bf16.mxu0 %v4739_v40  ;;  %1638 = vmatprep.subr.bf16.mxu1 %v4741_v41  ;;  %v4823_v40 = vld [vmem:[#allocation2 + $0x300] ss:$16 sps:$4 sm:$0xff]   ;;  %v4826_v41 = vld [vmem:[#allocation2 + $0x308] ss:$16 sps:$4 sm:$0xff]  }
  0x5f   :  { %1475 = vmatpush1.bf16.msra.mxu0 %v4743_v42  ;;  %1639 = vmatpush1.bf16.msra.mxu1 %v4744_v43  ;;  %v4831_v42 = vld [vmem:[#allocation2 + $0x324] ss:$16 sps:$4 sm:$0xff]   ;;  %v4834_v43 = vld [vmem:[#allocation2 + $0x32c] ss:$16 sps:$4 sm:$0xff]  }
  0x60   :  { %1476 = vmatprep.subr.bf16.mxu0 %v4745_v44  ;;  %1640 = vmatprep.subr.bf16.mxu1 %v4747_v45  ;;  %v4829_v44 = vld [vmem:[#allocation2 + $0x320] ss:$16 sps:$4 sm:$0xff]   ;;  %v4832_v45 = vld [vmem:[#allocation2 + $0x328] ss:$16 sps:$4 sm:$0xff]  }
  0x63   :  { %1477 = vmatpush1.bf16.msra.mxu0 %v4749_v47  ;;  %1641 = vmatpush1.bf16.msra.mxu1 %v4750_v49  ;;  %v4840_v47 = vld [vmem:[#allocation2 + $0x34c] ss:$16 sps:$4 sm:$0xff]   ;;  %v4838_v49 = vld [vmem:[#allocation2 + $0x348] ss:$16 sps:$4 sm:$0xff]  }
  0x64   :  { %1478 = vmatprep.subr.bf16.mxu0 %v4751_v50  ;;  %1642 = vmatprep.subr.bf16.mxu1 %v4753_v51  ;;  %v4843_v50 = vld [vmem:[#allocation2 + $0x364] ss:$16 sps:$4 sm:$0xff]   ;;  %v4846_v51 = vld [vmem:[#allocation2 + $0x36c] ss:$16 sps:$4 sm:$0xff]  }
  0x67   :  { %1479 = vmatpush1.bf16.msra.mxu0 %v4755_v52  ;;  %1643 = vmatpush1.bf16.msra.mxu1 %v4756_v53  ;;  %v4841_v52 = vld [vmem:[#allocation2 + $0x360] ss:$16 sps:$4 sm:$0xff]   ;;  %v4844_v53 = vld [vmem:[#allocation2 + $0x368] ss:$16 sps:$4 sm:$0xff]  }
  0x68   :  { %1480 = vmatprep.subr.bf16.mxu0 %v4757_v54  ;;  %1644 = vmatprep.subr.bf16.mxu1 %v4759_v55  ;;  %v4849_v54 = vld [vmem:[#allocation2 + $0x384] ss:$16 sps:$4 sm:$0xff]   ;;  %v4852_v55 = vld [vmem:[#allocation2 + $0x38c] ss:$16 sps:$4 sm:$0xff]  }
  0x6b   :  { %1481 = vmatpush1.bf16.msra.mxu0 %v4761_v56  ;;  %1645 = vmatpush1.bf16.msra.mxu1 %v4762_v57  ;;  %v4847_v56 = vld [vmem:[#allocation2 + $0x380] ss:$16 sps:$4 sm:$0xff]   ;;  %v4850_v57 = vld [vmem:[#allocation2 + $0x388] ss:$16 sps:$4 sm:$0xff]  }
  0x6c   :  { %1482 = vmatprep.subr.bf16.mxu0 %v4763_v58  ;;  %1646 = vmatprep.subr.bf16.mxu1 %v4765_v59  ;;  %v4855_v58 = vld [vmem:[#allocation2 + $0x3a4] ss:$16 sps:$4 sm:$0xff]   ;;  %v4858_v59 = vld [vmem:[#allocation2 + $0x3ac] ss:$16 sps:$4 sm:$0xff]  }
  0x6f   :  { %1483 = vmatpush1.bf16.msra.mxu0 %v4767_v60  ;;  %1647 = vmatpush1.bf16.msra.mxu1 %v4768_v61  ;;  %v4853_v60 = vld [vmem:[#allocation2 + $0x3a0] ss:$16 sps:$4 sm:$0xff]   ;;  %v4856_v61 = vld [vmem:[#allocation2 + $0x3a8] ss:$16 sps:$4 sm:$0xff]  }
  0x70   :  { %1484 = vmatprep.subr.bf16.mxu0 %v4769_v62  ;;  %1648 = vmatprep.subr.bf16.mxu1 %v4771_v63  ;;  %v4861_v62 = vld [vmem:[#allocation2 + $0x3c4] ss:$16 sps:$4 sm:$0xff]   ;;  %v4864_v63 = vld [vmem:[#allocation2 + $0x3cc] ss:$16 sps:$4 sm:$0xff]  }
  0x73   :  { %1485 = vmatpush1.bf16.msra.mxu0 %v4773_v0  ;;  %1649 = vmatpush1.bf16.msra.mxu1 %v4774_v1  ;;  %v4859_v0 = vld [vmem:[#allocation2 + $0x3c0] ss:$16 sps:$4 sm:$0xff]   ;;  %v4862_v1 = vld [vmem:[#allocation2 + $0x3c8] ss:$16 sps:$4 sm:$0xff]  }
  0x74   :  { %1495 = vmatprep.subr.bf16.mxu0 %v4777_v3  ;;  %1659 = vmatprep.subr.bf16.mxu1 %v4780_v4  ;;  %v4870_v3 = vld [vmem:[#allocation2 + $0x3ec] ss:$16 sps:$4 sm:$0xff]   ;;  %v4865_v4 = vld [vmem:[#allocation2 + $0x3e0] ss:$16 sps:$4 sm:$0xff]  }
  0x76   :  { %1487 = vmatmul.mubr.bf16.vlgmr.msra.gmra.mrb[0].mxu0 %v81_v5  ;;  %1651 = vmatmul.mubr.bf16.vlgmr.msra.gmra.mrb[0].mxu1 %v81_v5  ;;  %v4868_v5 = vld [vmem:[#allocation2 + $0x3e8] ss:$16 sps:$4 sm:$0xff]  }
  0x77   :  { %1496 = vmatpush1.bf16.msra.mxu0 %v4775_v6  ;;  %1660 = vmatpush1.bf16.msra.mxu1 %v4778_v7  ;;  %v4873_v6 = vld [vmem:[#allocation2 + $0x404] ss:$16 sps:$4 sm:$0xff]  }
  0x78   :  { %1497 = vmatprep.subr.bf16.mxu0 %v4783_v8  ;;  %1661 = vmatprep.subr.bf16.mxu1 %v4786_v9  ;;  %v76_v7 = vld [vmem:[%s5785_s0 + $0x10] sm:$0xff]  ;;  %v4876_v8 = vld [vmem:[#allocation2 + $0x40c] ss:$16 sps:$4 sm:$0xff]  }
  0x79   :  { %1527 = vmatprep.mubr.bf16.mxu0 %v84_v32  ;;  %1691 = vmatprep.mubr.bf16.mxu1 %v84_v32  ;;  %v4871_v9 = vld [vmem:[#allocation2 + $0x400] ss:$16 sps:$4 sm:$0xff]  }
  0x7a   :  { %v4901_v32 = vld [vmem:[#allocation2 + $0x4a0] ss:$16 sps:$4 sm:$0xff]  }
  0x7b   :  { %1498 = vmatpush1.bf16.msra.mxu0 %v4781_v10  ;;  %1662 = vmatpush1.bf16.msra.mxu1 %v4784_v11  ;;  %v4874_v10 = vld [vmem:[#allocation2 + $0x408] ss:$16 sps:$4 sm:$0xff]   ;;  %v83_v11 = vpack.c.bf16 %v76_v7, %v76_v7  ;;  %v4966_v7 = vld [vmem:[#allocation2 + $0x5ec] ss:$16 sps:$4 sm:$0xff]  }
  0x7c   :  { %1499 = vmatprep.subr.bf16.mxu0 %v4789_v12  ;;  %1663 = vmatprep.subr.bf16.mxu1 %v4792_v13  ;;  %v4879_v12 = vld [vmem:[#allocation2 + $0x424] ss:$16 sps:$4 sm:$0xff]   ;;  %v4882_v13 = vld [vmem:[#allocation2 + $0x42c] ss:$16 sps:$4 sm:$0xff]  }
  0x7f   :  { %1500 = vmatpush1.bf16.msra.mxu0 %v4787_v14  ;;  %1664 = vmatpush1.bf16.msra.mxu1 %v4790_v15  ;;  %v79_v14 = vld [vmem:[%s5785_s0 + $0x28] sm:$0xff] }
  0x80   :  { %1501 = vmatprep.subr.bf16.mxu0 %v4795_v16  ;;  %1665 = vmatprep.subr.bf16.mxu1 %v4798_v17  ;;  %v86_v15 = vpack.c.bf16 %v79_v14, %v79_v14  ;;  %v4877_v16 = vld [vmem:[#allocation2 + $0x420] ss:$16 sps:$4 sm:$0xff]   ;;  %v4880_v17 = vld [vmem:[#allocation2 + $0x428] ss:$16 sps:$4 sm:$0xff]  }
  0x81   :  { %v4970_v14 = vld [vmem:[#allocation2 + $0x608] ss:$16 sps:$4 sm:$0xff]  }
  0x83   :  { %1502 = vmatpush1.bf16.msra.mxu0 %v4793_v18  ;;  %1666 = vmatpush1.bf16.msra.mxu1 %v4796_v19  ;;  %v4885_v18 = vld [vmem:[#allocation2 + $0x444] ss:$16 sps:$4 sm:$0xff]   ;;  %v4888_v19 = vld [vmem:[#allocation2 + $0x44c] ss:$16 sps:$4 sm:$0xff]  }
  0x84   :  { %1503 = vmatprep.subr.bf16.mxu0 %v4801_v20  ;;  %1667 = vmatprep.subr.bf16.mxu1 %v4804_v21  ;;  %v4883_v20 = vld [vmem:[#allocation2 + $0x440] ss:$16 sps:$4 sm:$0xff]   ;;  %v4886_v21 = vld [vmem:[#allocation2 + $0x448] ss:$16 sps:$4 sm:$0xff]  }
  0x87   :  { %1504 = vmatpush1.bf16.msra.mxu0 %v4799_v22  ;;  %1668 = vmatpush1.bf16.msra.mxu1 %v4802_v23  ;;  %v4891_v22 = vld [vmem:[#allocation2 + $0x464] ss:$16 sps:$4 sm:$0xff]   ;;  %v4894_v23 = vld [vmem:[#allocation2 + $0x46c] ss:$16 sps:$4 sm:$0xff]  }
  0x88   :  { %1505 = vmatprep.subr.bf16.mxu0 %v4807_v24  ;;  %1669 = vmatprep.subr.bf16.mxu1 %v4810_v25  ;;  %v4889_v24 = vld [vmem:[#allocation2 + $0x460] ss:$16 sps:$4 sm:$0xff]   ;;  %v4892_v25 = vld [vmem:[#allocation2 + $0x468] ss:$16 sps:$4 sm:$0xff]  }
  0x8b   :  { %1506 = vmatpush1.bf16.msra.mxu0 %v4805_v26  ;;  %1670 = vmatpush1.bf16.msra.mxu1 %v4808_v27  ;;  %v4897_v26 = vld [vmem:[#allocation2 + $0x484] ss:$16 sps:$4 sm:$0xff]   ;;  %v4900_v27 = vld [vmem:[#allocation2 + $0x48c] ss:$16 sps:$4 sm:$0xff]  }
  0x8c   :  { %1507 = vmatprep.subr.bf16.mxu0 %v4813_v28  ;;  %1671 = vmatprep.subr.bf16.mxu1 %v4816_v29  ;;  %v4895_v28 = vld [vmem:[#allocation2 + $0x480] ss:$16 sps:$4 sm:$0xff]   ;;  %v4898_v29 = vld [vmem:[#allocation2 + $0x488] ss:$16 sps:$4 sm:$0xff]  }
  0x8f   :  { %1508 = vmatpush1.bf16.msra.mxu0 %v4811_v31  ;;  %1672 = vmatpush1.bf16.msra.mxu1 %v4814_v33  ;;  %v4906_v31 = vld [vmem:[#allocation2 + $0x4ac] ss:$16 sps:$4 sm:$0xff]   ;;  %v4904_v33 = vld [vmem:[#allocation2 + $0x4a8] ss:$16 sps:$4 sm:$0xff]  }
  0x90   :  { %1509 = vmatprep.subr.bf16.mxu0 %v4819_v34  ;;  %1673 = vmatprep.subr.bf16.mxu1 %v4822_v35  ;;  %v4909_v34 = vld [vmem:[#allocation2 + $0x4c4] ss:$16 sps:$4 sm:$0xff]   ;;  %v4912_v35 = vld [vmem:[#allocation2 + $0x4cc] ss:$16 sps:$4 sm:$0xff]  }
  0x93   :  { %1510 = vmatpush1.bf16.msra.mxu0 %v4817_v36  ;;  %1674 = vmatpush1.bf16.msra.mxu1 %v4820_v37  ;;  %v4907_v36 = vld [vmem:[#allocation2 + $0x4c0] ss:$16 sps:$4 sm:$0xff]   ;;  %v4910_v37 = vld [vmem:[#allocation2 + $0x4c8] ss:$16 sps:$4 sm:$0xff]  }
  0x94   :  { %1511 = vmatprep.subr.bf16.mxu0 %v4825_v38  ;;  %1675 = vmatprep.subr.bf16.mxu1 %v4828_v39  ;;  %v4915_v38 = vld [vmem:[#allocation2 + $0x4e4] ss:$16 sps:$4 sm:$0xff]   ;;  %v4918_v39 = vld [vmem:[#allocation2 + $0x4ec] ss:$16 sps:$4 sm:$0xff]  }
  0x97   :  { %1512 = vmatpush1.bf16.msra.mxu0 %v4823_v40  ;;  %1676 = vmatpush1.bf16.msra.mxu1 %v4826_v41  ;;  %v4913_v40 = vld [vmem:[#allocation2 + $0x4e0] ss:$16 sps:$4 sm:$0xff]   ;;  %v4916_v41 = vld [vmem:[#allocation2 + $0x4e8] ss:$16 sps:$4 sm:$0xff]  }
  0x98   :  { %1513 = vmatprep.subr.bf16.mxu0 %v4831_v42  ;;  %1677 = vmatprep.subr.bf16.mxu1 %v4834_v43  ;;  %v4921_v42 = vld [vmem:[#allocation2 + $0x504] ss:$16 sps:$4 sm:$0xff]   ;;  %v4924_v43 = vld [vmem:[#allocation2 + $0x50c] ss:$16 sps:$4 sm:$0xff]  }
  0x9b   :  { %1514 = vmatpush1.bf16.msra.mxu0 %v4829_v44  ;;  %1678 = vmatpush1.bf16.msra.mxu1 %v4832_v45  ;;  %v4919_v44 = vld [vmem:[#allocation2 + $0x500] ss:$16 sps:$4 sm:$0xff]   ;;  %v4922_v45 = vld [vmem:[#allocation2 + $0x508] ss:$16 sps:$4 sm:$0xff]  }
  0x9c   :  { %1515 = vmatprep.subr.bf16.mxu0 %v4837_v46  ;;  %1679 = vmatprep.subr.bf16.mxu1 %v4840_v47  ;;  %v4927_v46 = vld [vmem:[#allocation2 + $0x524] ss:$16 sps:$4 sm:$0xff]   ;;  %v4930_v47 = vld [vmem:[#allocation2 + $0x52c] ss:$16 sps:$4 sm:$0xff]  }
  0x9f   :  { %1516 = vmatpush1.bf16.msra.mxu0 %v4835_v48  ;;  %1680 = vmatpush1.bf16.msra.mxu1 %v4838_v49  ;;  %v4925_v48 = vld [vmem:[#allocation2 + $0x520] ss:$16 sps:$4 sm:$0xff]   ;;  %v4928_v49 = vld [vmem:[#allocation2 + $0x528] ss:$16 sps:$4 sm:$0xff]  }
  0xa0   :  { %1517 = vmatprep.subr.bf16.mxu0 %v4843_v50  ;;  %1681 = vmatprep.subr.bf16.mxu1 %v4846_v51  ;;  %v4933_v50 = vld [vmem:[#allocation2 + $0x544] ss:$16 sps:$4 sm:$0xff]   ;;  %v4936_v51 = vld [vmem:[#allocation2 + $0x54c] ss:$16 sps:$4 sm:$0xff]  }
  0xa3   :  { %1518 = vmatpush1.bf16.msra.mxu0 %v4841_v52  ;;  %1682 = vmatpush1.bf16.msra.mxu1 %v4844_v53  ;;  %v4931_v52 = vld [vmem:[#allocation2 + $0x540] ss:$16 sps:$4 sm:$0xff]   ;;  %v4934_v53 = vld [vmem:[#allocation2 + $0x548] ss:$16 sps:$4 sm:$0xff]  }
  0xa4   :  { %1519 = vmatprep.subr.bf16.mxu0 %v4849_v54  ;;  %1683 = vmatprep.subr.bf16.mxu1 %v4852_v55  ;;  %v4939_v54 = vld [vmem:[#allocation2 + $0x564] ss:$16 sps:$4 sm:$0xff]   ;;  %v4942_v55 = vld [vmem:[#allocation2 + $0x56c] ss:$16 sps:$4 sm:$0xff]  }
  0xa7   :  { %1520 = vmatpush1.bf16.msra.mxu0 %v4847_v56  ;;  %1684 = vmatpush1.bf16.msra.mxu1 %v4850_v57  ;;  %v4937_v56 = vld [vmem:[#allocation2 + $0x560] ss:$16 sps:$4 sm:$0xff]   ;;  %v4940_v57 = vld [vmem:[#allocation2 + $0x568] ss:$16 sps:$4 sm:$0xff]  }
  0xa8   :  { %1521 = vmatprep.subr.bf16.mxu0 %v4855_v58  ;;  %1685 = vmatprep.subr.bf16.mxu1 %v4858_v59  ;;  %v4945_v58 = vld [vmem:[#allocation2 + $0x584] ss:$16 sps:$4 sm:$0xff]   ;;  %v4948_v59 = vld [vmem:[#allocation2 + $0x58c] ss:$16 sps:$4 sm:$0xff]  }
  0xab   :  { %1522 = vmatpush1.bf16.msra.mxu0 %v4853_v60  ;;  %1686 = vmatpush1.bf16.msra.mxu1 %v4856_v61  ;;  %v4943_v60 = vld [vmem:[#allocation2 + $0x580] ss:$16 sps:$4 sm:$0xff]   ;;  %v4946_v61 = vld [vmem:[#allocation2 + $0x588] ss:$16 sps:$4 sm:$0xff]  }
  0xac   :  { %1523 = vmatprep.subr.bf16.mxu0 %v4861_v62  ;;  %1687 = vmatprep.subr.bf16.mxu1 %v4864_v63  ;;  %v4951_v62 = vld [vmem:[#allocation2 + $0x5a4] ss:$16 sps:$4 sm:$0xff]   ;;  %v4954_v63 = vld [vmem:[#allocation2 + $0x5ac] ss:$16 sps:$4 sm:$0xff]  }
  0xaf   :  { %1524 = vmatpush1.bf16.msra.mxu0 %v4859_v0  ;;  %1688 = vmatpush1.bf16.msra.mxu1 %v4862_v1  ;;  %v4949_v0 = vld [vmem:[#allocation2 + $0x5a0] ss:$16 sps:$4 sm:$0xff]   ;;  %v4952_v1 = vld [vmem:[#allocation2 + $0x5a8] ss:$16 sps:$4 sm:$0xff]  }
  0xb0   :  { %1525 = vmatprep.subr.bf16.mxu0 %v4867_v2  ;;  %1689 = vmatprep.subr.bf16.mxu1 %v4870_v3  ;;  %v4957_v2 = vld [vmem:[#allocation2 + $0x5c4] ss:$16 sps:$4 sm:$0xff]   ;;  %v4960_v3 = vld [vmem:[#allocation2 + $0x5cc] ss:$16 sps:$4 sm:$0xff]  }
  0xb3   :  { %1526 = vmatpush1.bf16.msra.mxu0 %v4865_v4  ;;  %1690 = vmatpush1.bf16.msra.mxu1 %v4868_v5  ;;  %v4955_v4 = vld [vmem:[#allocation2 + $0x5c0] ss:$16 sps:$4 sm:$0xff]   ;;  %v4958_v5 = vld [vmem:[#allocation2 + $0x5c8] ss:$16 sps:$4 sm:$0xff]  }
  0xb4   :  { %1536 = vmatprep.subr.bf16.mxu0 %v4873_v6  ;;  %1700 = vmatprep.subr.bf16.mxu1 %v4876_v8  ;;  %v4963_v6 = vld [vmem:[#allocation2 + $0x5e4] ss:$16 sps:$4 sm:$0xff]   ;;  %v4961_v8 = vld [vmem:[#allocation2 + $0x5e0] ss:$16 sps:$4 sm:$0xff]  }
  0xb6   :  { %1528 = vmatmul.mubr.bf16.vlgmr.msra.gmra.mrb[0].mxu0 %v83_v11  ;;  %1692 = vmatmul.mubr.bf16.vlgmr.msra.gmra.mrb[0].mxu1 %v83_v11  ;;  %v78_v11 = vld [vmem:[%s5785_s0 + $0x20] sm:$0xff] }
  0xb7   :  { %1537 = vmatpush1.bf16.msra.mxu0 %v4871_v9  ;;  %1701 = vmatpush1.bf16.msra.mxu1 %v4874_v10  ;;  %v4964_v9 = vld [vmem:[#allocation2 + $0x5e8] ss:$16 sps:$4 sm:$0xff]   ;;  %v4969_v10 = vld [vmem:[#allocation2 + $0x604] ss:$16 sps:$4 sm:$0xff]  }
  0xb8   :  { %1538 = vmatprep.subr.bf16.mxu0 %v4879_v12  ;;  %1702 = vmatprep.subr.bf16.mxu1 %v4882_v13  ;;  %v4972_v12 = vld [vmem:[#allocation2 + $0x60c] ss:$16 sps:$4 sm:$0xff]   ;;  %v4967_v13 = vld [vmem:[#allocation2 + $0x600] ss:$16 sps:$4 sm:$0xff]  }
  0xb9   :  { %1568 = vmatprep.mubr.bf16.mxu0 %v86_v15  ;;  %1732 = vmatprep.mubr.bf16.mxu1 %v86_v15  ;;  %v85_v15 = vpack.c.bf16 %v78_v11, %v78_v11  ;;  %v5059_v11 = vld [vmem:[#allocation4 + $0xe4] ss:$16 sps:$4 sm:$0xff]  }
  0xbb   :  { %1539 = vmatpush1.bf16.msra.mxu0 %v4877_v16  ;;  %1703 = vmatpush1.bf16.msra.mxu1 %v4880_v17  ;;  %v4975_v16 = vld [vmem:[#allocation2 + $0x624] ss:$16 sps:$4 sm:$0xff]   ;;  %v4978_v17 = vld [vmem:[#allocation2 + $0x62c] ss:$16 sps:$4 sm:$0xff]  }
  0xbc   :  { %1540 = vmatprep.subr.bf16.mxu0 %v4885_v18  ;;  %1704 = vmatprep.subr.bf16.mxu1 %v4888_v19  ;;  %v4973_v18 = vld [vmem:[#allocation2 + $0x620] ss:$16 sps:$4 sm:$0xff]   ;;  %v4976_v19 = vld [vmem:[#allocation2 + $0x628] ss:$16 sps:$4 sm:$0xff]  }
  0xbf   :  { %1541 = vmatpush1.bf16.msra.mxu0 %v4883_v20  ;;  %1705 = vmatpush1.bf16.msra.mxu1 %v4886_v21  ;;  %v4981_v20 = vld [vmem:[#allocation2 + $0x644] ss:$16 sps:$4 sm:$0xff]   ;;  %v4984_v21 = vld [vmem:[#allocation2 + $0x64c] ss:$16 sps:$4 sm:$0xff]  }
  0xc0   :  { %1542 = vmatprep.subr.bf16.mxu0 %v4891_v22  ;;  %1706 = vmatprep.subr.bf16.mxu1 %v4894_v23  ;;  %v4979_v22 = vld [vmem:[#allocation2 + $0x640] ss:$16 sps:$4 sm:$0xff]   ;;  %v4982_v23 = vld [vmem:[#allocation2 + $0x648] ss:$16 sps:$4 sm:$0xff]  }
  0xc3   :  { %1543 = vmatpush1.bf16.msra.mxu0 %v4889_v24  ;;  %1707 = vmatpush1.bf16.msra.mxu1 %v4892_v25  ;;  %v5506_v24 = vmov 0   ;;  %v4987_v25 = vld [vmem:[#allocation2 + $0x664] ss:$16 sps:$4 sm:$0xff]  }
  0xc4   :  { %1544 = vmatprep.subr.bf16.mxu0 %v4897_v26  ;;  %1708 = vmatprep.subr.bf16.mxu1 %v4900_v27  ;;  %v4990_v26 = vld [vmem:[#allocation2 + $0x66c] ss:$16 sps:$4 sm:$0xff]   ;;  %v4985_v27 = vld [vmem:[#allocation2 + $0x660] ss:$16 sps:$4 sm:$0xff]  }
  0xc7   :  { %1545 = vmatpush1.bf16.msra.mxu0 %v4895_v28  ;;  %1709 = vmatpush1.bf16.msra.mxu1 %v4898_v29  ;;  %v4988_v28 = vld [vmem:[#allocation2 + $0x668] ss:$16 sps:$4 sm:$0xff]   ;;  %v4993_v29 = vld [vmem:[#allocation2 + $0x684] ss:$16 sps:$4 sm:$0xff]  }
  0xc8   :  { %1546 = vmatprep.subr.bf16.mxu0 %v4903_v30  ;;  %1710 = vmatprep.subr.bf16.mxu1 %v4906_v31  ;;  %v4996_v30 = vld [vmem:[#allocation2 + $0x68c] ss:$16 sps:$4 sm:$0xff]   ;;  %v4991_v31 = vld [vmem:[#allocation2 + $0x680] ss:$16 sps:$4 sm:$0xff]  }
  0xcb   :  { %1547 = vmatpush1.bf16.msra.mxu0 %v4901_v32  ;;  %1711 = vmatpush1.bf16.msra.mxu1 %v4904_v33  ;;  %v4994_v32 = vld [vmem:[#allocation2 + $0x688] ss:$16 sps:$4 sm:$0xff]   ;;  %v4999_v33 = vld [vmem:[#allocation2 + $0x6a4] ss:$16 sps:$4 sm:$0xff]  }
  0xcc   :  { %1548 = vmatprep.subr.bf16.mxu0 %v4909_v34  ;;  %1712 = vmatprep.subr.bf16.mxu1 %v4912_v35  ;;  %v5002_v34 = vld [vmem:[#allocation2 + $0x6ac] ss:$16 sps:$4 sm:$0xff]   ;;  %v4997_v35 = vld [vmem:[#allocation2 + $0x6a0] ss:$16 sps:$4 sm:$0xff]  }
  0xcf   :  { %1549 = vmatpush1.bf16.msra.mxu0 %v4907_v36  ;;  %1713 = vmatpush1.bf16.msra.mxu1 %v4910_v37  ;;  %v5000_v36 = vld [vmem:[#allocation2 + $0x6a8] ss:$16 sps:$4 sm:$0xff]   ;;  %v5005_v37 = vld [vmem:[#allocation2 + $0x6c4] ss:$16 sps:$4 sm:$0xff]  }
  0xd0   :  { %1550 = vmatprep.subr.bf16.mxu0 %v4915_v38  ;;  %1714 = vmatprep.subr.bf16.mxu1 %v4918_v39  ;;  %v5008_v38 = vld [vmem:[#allocation2 + $0x6cc] ss:$16 sps:$4 sm:$0xff]   ;;  %v5003_v39 = vld [vmem:[#allocation2 + $0x6c0] ss:$16 sps:$4 sm:$0xff]  }
  0xd3   :  { %1551 = vmatpush1.bf16.msra.mxu0 %v4913_v40  ;;  %1715 = vmatpush1.bf16.msra.mxu1 %v4916_v41  ;;  %v5006_v40 = vld [vmem:[#allocation2 + $0x6c8] ss:$16 sps:$4 sm:$0xff]   ;;  %v5011_v41 = vld [vmem:[#allocation2 + $0x6e4] ss:$16 sps:$4 sm:$0xff]  }
  0xd4   :  { %1552 = vmatprep.subr.bf16.mxu0 %v4921_v42  ;;  %1716 = vmatprep.subr.bf16.mxu1 %v4924_v43  ;;  %v5014_v42 = vld [vmem:[#allocation2 + $0x6ec] ss:$16 sps:$4 sm:$0xff]   ;;  %v5009_v43 = vld [vmem:[#allocation2 + $0x6e0] ss:$16 sps:$4 sm:$0xff]  }
  0xd7   :  { %1553 = vmatpush1.bf16.msra.mxu0 %v4919_v44  ;;  %1717 = vmatpush1.bf16.msra.mxu1 %v4922_v45  ;;  %v5012_v44 = vld [vmem:[#allocation2 + $0x6e8] ss:$16 sps:$4 sm:$0xff]   ;;  %v80_v45 = vld [vmem:[%s5785_s0 + $0x30] sm:$0xff] }
  0xd8   :  { %1554 = vmatprep.subr.bf16.mxu0 %v4927_v46  ;;  %1718 = vmatprep.subr.bf16.mxu1 %v4930_v47  ;;  %v5017_v46 = vld [vmem:[#allocation4 + $0x4] ss:$16 sps:$4 sm:$0xff]   ;;  %v5020_v47 = vld [vmem:[#allocation4 + $0xc] ss:$16 sps:$4 sm:$0xff]  }
  0xdb   :  { %1555 = vmatpush1.bf16.msra.mxu0 %v4925_v48  ;;  %1719 = vmatpush1.bf16.msra.mxu1 %v4928_v49  ;;  %v5015_v48 = vld [vmem:[#allocation4] ss:$16 sps:$4 sm:$0xff]   ;;  %v5018_v49 = vld [vmem:[#allocation4 + $0x8] ss:$16 sps:$4 sm:$0xff]  }
  0xdc   :  { %1556 = vmatprep.subr.bf16.mxu0 %v4933_v50  ;;  %1720 = vmatprep.subr.bf16.mxu1 %v4936_v51  ;;  %v87_v50 = vpack.c.bf16 %v80_v45, %v80_v45  ;;  %v5023_v51 = vld [vmem:[#allocation4 + $0x24] ss:$16 sps:$4 sm:$0xff]   ;;  %v5105_v45 = vld [vmem:[#allocation4 + $0x1e0] ss:$16 sps:$4 sm:$0xff]  }
  0xdf   :  { %1557 = vmatpush1.bf16.msra.mxu0 %v4931_v52  ;;  %1721 = vmatpush1.bf16.msra.mxu1 %v4934_v53  ;;  %v5026_v52 = vld [vmem:[#allocation4 + $0x2c] ss:$16 sps:$4 sm:$0xff]   ;;  %v5021_v53 = vld [vmem:[#allocation4 + $0x20] ss:$16 sps:$4 sm:$0xff]  }
  0xe0   :  { %1558 = vmatprep.subr.bf16.mxu0 %v4939_v54  ;;  %1722 = vmatprep.subr.bf16.mxu1 %v4942_v55  ;;  %v5024_v54 = vld [vmem:[#allocation4 + $0x28] ss:$16 sps:$4 sm:$0xff]   ;;  %v5029_v55 = vld [vmem:[#allocation4 + $0x44] ss:$16 sps:$4 sm:$0xff]  }
  0xe3   :  { %1559 = vmatpush1.bf16.msra.mxu0 %v4937_v56  ;;  %1723 = vmatpush1.bf16.msra.mxu1 %v4940_v57  ;;  %v5032_v56 = vld [vmem:[#allocation4 + $0x4c] ss:$16 sps:$4 sm:$0xff]   ;;  %v5027_v57 = vld [vmem:[#allocation4 + $0x40] ss:$16 sps:$4 sm:$0xff]  }
  0xe4   :  { %1560 = vmatprep.subr.bf16.mxu0 %v4945_v58  ;;  %1724 = vmatprep.subr.bf16.mxu1 %v4948_v59  ;;  %v5030_v58 = vld [vmem:[#allocation4 + $0x48] ss:$16 sps:$4 sm:$0xff]   ;;  %v5035_v59 = vld [vmem:[#allocation4 + $0x64] ss:$16 sps:$4 sm:$0xff]  }
  0xe7   :  { %1561 = vmatpush1.bf16.msra.mxu0 %v4943_v60  ;;  %1725 = vmatpush1.bf16.msra.mxu1 %v4946_v61  ;;  %v5038_v60 = vld [vmem:[#allocation4 + $0x6c] ss:$16 sps:$4 sm:$0xff]   ;;  %v5033_v61 = vld [vmem:[#allocation4 + $0x60] ss:$16 sps:$4 sm:$0xff]  }
  0xe8   :  { %1562 = vmatprep.subr.bf16.mxu0 %v4951_v62  ;;  %1726 = vmatprep.subr.bf16.mxu1 %v4954_v63  ;;  %v5036_v62 = vld [vmem:[#allocation4 + $0x68] ss:$16 sps:$4 sm:$0xff]   ;;  %v5041_v63 = vld [vmem:[#allocation4 + $0x84] ss:$16 sps:$4 sm:$0xff]  }
  0xeb   :  { %1563 = vmatpush1.bf16.msra.mxu0 %v4949_v0  ;;  %1727 = vmatpush1.bf16.msra.mxu1 %v4952_v1  ;;  %v5044_v0 = vld [vmem:[#allocation4 + $0x8c] ss:$16 sps:$4 sm:$0xff]   ;;  %v5039_v1 = vld [vmem:[#allocation4 + $0x80] ss:$16 sps:$4 sm:$0xff]  }
  0xec   :  { %1564 = vmatprep.subr.bf16.mxu0 %v4957_v2  ;;  %1728 = vmatprep.subr.bf16.mxu1 %v4960_v3  ;;  %v5042_v2 = vld [vmem:[#allocation4 + $0x88] ss:$16 sps:$4 sm:$0xff]   ;;  %v5047_v3 = vld [vmem:[#allocation4 + $0xa4] ss:$16 sps:$4 sm:$0xff]  }
  0xef   :  { %1565 = vmatpush1.bf16.msra.mxu0 %v4955_v4  ;;  %1729 = vmatpush1.bf16.msra.mxu1 %v4958_v5  ;;  %v5050_v4 = vld [vmem:[#allocation4 + $0xac] ss:$16 sps:$4 sm:$0xff]   ;;  %v5045_v5 = vld [vmem:[#allocation4 + $0xa0] ss:$16 sps:$4 sm:$0xff]  }
  0xf0   :  { %1566 = vmatprep.subr.bf16.mxu0 %v4963_v6  ;;  %1730 = vmatprep.subr.bf16.mxu1 %v4966_v7  ;;  %v5048_v6 = vld [vmem:[#allocation4 + $0xa8] ss:$16 sps:$4 sm:$0xff]   ;;  %v5053_v7 = vld [vmem:[#allocation4 + $0xc4] ss:$16 sps:$4 sm:$0xff]  }
  0xf3   :  { %1567 = vmatpush1.bf16.msra.mxu0 %v4961_v8  ;;  %1731 = vmatpush1.bf16.msra.mxu1 %v4964_v9  ;;  %v5056_v8 = vld [vmem:[#allocation4 + $0xcc] ss:$16 sps:$4 sm:$0xff]   ;;  %v5051_v9 = vld [vmem:[#allocation4 + $0xc0] ss:$16 sps:$4 sm:$0xff]  }
  0xf4   :  { %1577 = vmatprep.subr.bf16.mxu0 %v4969_v10  ;;  %1741 = vmatprep.subr.bf16.mxu1 %v4972_v12  ;;  %v5054_v10 = vld [vmem:[#allocation4 + $0xc8] ss:$16 sps:$4 sm:$0xff]   ;;  %v5062_v12 = vld [vmem:[#allocation4 + $0xec] ss:$16 sps:$4 sm:$0xff]  }
  0xf6   :  { %1569 = vmatmul.mubr.bf16.vlgmr.msra.gmra.mrb[0].mxu0 %v85_v15  ;;  %1733 = vmatmul.mubr.bf16.vlgmr.msra.gmra.mrb[0].mxu1 %v85_v15  ;;  %v5065_v15 = vld [vmem:[#allocation4 + $0x104] ss:$16 sps:$4 sm:$0xff]  }
  0xf7   :  { %1578 = vmatpush1.bf16.msra.mxu0 %v4967_v13  ;;  %1742 = vmatpush1.bf16.msra.mxu1 %v4970_v14  ;;  %v5057_v13 = vld [vmem:[#allocation4 + $0xe0] ss:$16 sps:$4 sm:$0xff]   ;;  %v5060_v14 = vld [vmem:[#allocation4 + $0xe8] ss:$16 sps:$4 sm:$0xff]  }
  0xf8   :  { %1579 = vmatprep.subr.bf16.mxu0 %v4975_v16  ;;  %1743 = vmatprep.subr.bf16.mxu1 %v4978_v17  ;;  %v5068_v16 = vld [vmem:[#allocation4 + $0x10c] ss:$16 sps:$4 sm:$0xff]   ;;  %v5063_v17 = vld [vmem:[#allocation4 + $0x100] ss:$16 sps:$4 sm:$0xff]  }
  0xf9   :  { %1609 = vmatprep.mubr.bf16.mxu0 %v5506_v24  ;;  %1773 = vmatprep.mubr.bf16.mxu1 %v5506_v24  ;;  %v5080_v24 = vld [vmem:[#allocation4 + $0x14c] ss:$16 sps:$4 sm:$0xff]  }
  0xfb   :  { %1580 = vmatpush1.bf16.msra.mxu0 %v4973_v18  ;;  %1744 = vmatpush1.bf16.msra.mxu1 %v4976_v19  ;;  %v5066_v18 = vld [vmem:[#allocation4 + $0x108] ss:$16 sps:$4 sm:$0xff]   ;;  %v5071_v19 = vld [vmem:[#allocation4 + $0x124] ss:$16 sps:$4 sm:$0xff]  }
  0xfc   :  { %1581 = vmatprep.subr.bf16.mxu0 %v4981_v20  ;;  %1745 = vmatprep.subr.bf16.mxu1 %v4984_v21  ;;  %v5074_v20 = vld [vmem:[#allocation4 + $0x12c] ss:$16 sps:$4 sm:$0xff]   ;;  %v5069_v21 = vld [vmem:[#allocation4 + $0x120] ss:$16 sps:$4 sm:$0xff]  }
  0xff   :  { %1582 = vmatpush1.bf16.msra.mxu0 %v4979_v22  ;;  %1746 = vmatpush1.bf16.msra.mxu1 %v4982_v23  ;;  %v5072_v22 = vld [vmem:[#allocation4 + $0x128] ss:$16 sps:$4 sm:$0xff]   ;;  %v5077_v23 = vld [vmem:[#allocation4 + $0x144] ss:$16 sps:$4 sm:$0xff]  }
 0x100   :  { %1583 = vmatprep.subr.bf16.mxu0 %v4987_v25  ;;  %1747 = vmatprep.subr.bf16.mxu1 %v4990_v26  ;;  %v5075_v25 = vld [vmem:[#allocation4 + $0x140] ss:$16 sps:$4 sm:$0xff]   ;;  %v5078_v26 = vld [vmem:[#allocation4 + $0x148] ss:$16 sps:$4 sm:$0xff]  }
 0x103   :  { %1584 = vmatpush1.bf16.msra.mxu0 %v4985_v27  ;;  %1748 = vmatpush1.bf16.msra.mxu1 %v4988_v28  ;;  %v5083_v27 = vld [vmem:[#allocation4 + $0x164] ss:$16 sps:$4 sm:$0xff]   ;;  %v5086_v28 = vld [vmem:[#allocation4 + $0x16c] ss:$16 sps:$4 sm:$0xff]  }
 0x104   :  { %1585 = vmatprep.subr.bf16.mxu0 %v4993_v29  ;;  %1749 = vmatprep.subr.bf16.mxu1 %v4996_v30  ;;  %v5081_v29 = vld [vmem:[#allocation4 + $0x160] ss:$16 sps:$4 sm:$0xff]   ;;  %v5084_v30 = vld [vmem:[#allocation4 + $0x168] ss:$16 sps:$4 sm:$0xff]  }
 0x107   :  { %1586 = vmatpush1.bf16.msra.mxu0 %v4991_v31  ;;  %1750 = vmatpush1.bf16.msra.mxu1 %v4994_v32  ;;  %v5089_v31 = vld [vmem:[#allocation4 + $0x184] ss:$16 sps:$4 sm:$0xff]   ;;  %v5092_v32 = vld [vmem:[#allocation4 + $0x18c] ss:$16 sps:$4 sm:$0xff]  }
 0x108   :  { %1587 = vmatprep.subr.bf16.mxu0 %v4999_v33  ;;  %1751 = vmatprep.subr.bf16.mxu1 %v5002_v34  ;;  %v5087_v33 = vld [vmem:[#allocation4 + $0x180] ss:$16 sps:$4 sm:$0xff]   ;;  %v5090_v34 = vld [vmem:[#allocation4 + $0x188] ss:$16 sps:$4 sm:$0xff]  }
 0x10b   :  { %1588 = vmatpush1.bf16.msra.mxu0 %v4997_v35  ;;  %1752 = vmatpush1.bf16.msra.mxu1 %v5000_v36  ;;  %v5095_v35 = vld [vmem:[#allocation4 + $0x1a4] ss:$16 sps:$4 sm:$0xff]   ;;  %v5098_v36 = vld [vmem:[#allocation4 + $0x1ac] ss:$16 sps:$4 sm:$0xff]  }
 0x10c   :  { %1589 = vmatprep.subr.bf16.mxu0 %v5005_v37  ;;  %1753 = vmatprep.subr.bf16.mxu1 %v5008_v38  ;;  %v5093_v37 = vld [vmem:[#allocation4 + $0x1a0] ss:$16 sps:$4 sm:$0xff]   ;;  %v5096_v38 = vld [vmem:[#allocation4 + $0x1a8] ss:$16 sps:$4 sm:$0xff]  }
 0x10f   :  { %1590 = vmatpush1.bf16.msra.mxu0 %v5003_v39  ;;  %1754 = vmatpush1.bf16.msra.mxu1 %v5006_v40  ;;  %v5101_v39 = vld [vmem:[#allocation4 + $0x1c4] ss:$16 sps:$4 sm:$0xff]   ;;  %v5104_v40 = vld [vmem:[#allocation4 + $0x1cc] ss:$16 sps:$4 sm:$0xff]  }
 0x110   :  { %1591 = vmatprep.subr.bf16.mxu0 %v5011_v41  ;;  %1755 = vmatprep.subr.bf16.mxu1 %v5014_v42  ;;  %v5099_v41 = vld [vmem:[#allocation4 + $0x1c0] ss:$16 sps:$4 sm:$0xff]   ;;  %v5102_v42 = vld [vmem:[#allocation4 + $0x1c8] ss:$16 sps:$4 sm:$0xff]  }
 0x113   :  { %1592 = vmatpush1.bf16.msra.mxu0 %v5009_v43  ;;  %1756 = vmatpush1.bf16.msra.mxu1 %v5012_v44  ;;  %v5107_v43 = vld [vmem:[#allocation4 + $0x1e4] ss:$16 sps:$4 sm:$0xff]   ;;  %v5110_v44 = vld [vmem:[#allocation4 + $0x1ec] ss:$16 sps:$4 sm:$0xff]  }
 0x114   :  { %2580 = vmatprep.subr.bf16.mxu0 %v5017_v46  ;;  %2662 = vmatprep.subr.bf16.mxu1 %v5020_v47  ;;  %v5108_v46 = vld [vmem:[#allocation4 + $0x1e8] ss:$16 sps:$4 sm:$0xff]   ;;  %v5113_v47 = vld [vmem:[#allocation4 + $0x204] ss:$16 sps:$4 sm:$0xff]  }
 0x116   :  { %1610 = vmatmul.mubr.bf16.vlgmr.msra.gmra.mrb[0].mxu0 %v87_v50  ;;  %1774 = vmatmul.mubr.bf16.vlgmr.msra.gmra.mrb[0].mxu1 %v87_v50 }
 0x117   :  { %2581 = vmatpush1.bf16.msra.mxu0 %v5015_v48  ;;  %2663 = vmatpush1.bf16.msra.mxu1 %v5018_v49  ;;  %v5116_v48 = vld [vmem:[#allocation4 + $0x20c] ss:$16 sps:$4 sm:$0xff]   ;;  %v314_v49 = vlaneseq }
 0x118   :  { %2582 = vmatprep.subr.bf16.mxu0 %v5023_v51  ;;  %2664 = vmatprep.subr.bf16.mxu1 %v5026_v52  ;;  %v5638_v52 = vld [vmem:[%s5787_s2] sm:$0xf] }
 0x119   :  { %v5630_v50 = vshrl.u32 %v314_v49, 7  ;;  %v5173_v49 = vld [vmem:[#allocation4 + $0x344] ss:$16 sps:$4 sm:$0xff]  }
 0x11b   :  { %2583 = vmatpush1.bf16.msra.mxu0 %v5021_v53  ;;  %2665 = vmatpush1.bf16.msra.mxu1 %v5024_v54  ;;  %v5633_v51 = vsub.s32 0, %v5630_v50  ;;  %v5641_v53 = vsub.s32 1, %v5630_v50  ;;  %v5644_v54 = vsub.s32 3, %v5630_v50 }
 0x11c   :  { %2584 = vmatprep.subr.bf16.mxu0 %v5029_v55  ;;  %2666 = vmatprep.subr.bf16.mxu1 %v5032_v56 }
 0x11d   :  { %v317_v55 = vrot.slane %v5638_v52, %v5633_v51  ;;  %v321_v56 = vrot.slane %v5638_v52, %v5641_v53 }
 0x11f   :  { %2585 = vmatpush1.bf16.msra.mxu0 %v5027_v57  ;;  %2667 = vmatpush1.bf16.msra.mxu1 %v5030_v58  ;;  %v329_v57 = vrot.slane %v5638_v52, %v5644_v54 }
 0x120   :  { %2586 = vmatprep.subr.bf16.mxu0 %v5035_v59  ;;  %2668 = vmatprep.subr.bf16.mxu1 %v5038_v60 }
 0x123   :  { %2587 = vmatpush1.bf16.msra.mxu0 %v5033_v61  ;;  %2669 = vmatpush1.bf16.msra.mxu1 %v5036_v62 }
 0x124   :  { %2588 = vmatprep.subr.bf16.mxu0 %v5041_v63  ;;  %2670 = vmatprep.subr.bf16.mxu1 %v5044_v0 }
 0x127   :  { %2589 = vmatpush1.bf16.msra.mxu0 %v5039_v1  ;;  %2671 = vmatpush1.bf16.msra.mxu1 %v5042_v2 }
 0x128   :  { %2590 = vmatprep.subr.bf16.mxu0 %v5047_v3  ;;  %2672 = vmatprep.subr.bf16.mxu1 %v5050_v4 }
 0x12b   :  { %2591 = vmatpush1.bf16.msra.mxu0 %v5045_v5  ;;  %2673 = vmatpush1.bf16.msra.mxu1 %v5048_v6 }
 0x12c   :  { %2592 = vmatprep.subr.bf16.mxu0 %v5053_v7  ;;  %2674 = vmatprep.subr.bf16.mxu1 %v5056_v8 }
 0x12f   :  { %2593 = vmatpush1.bf16.msra.mxu0 %v5051_v9  ;;  %2675 = vmatpush1.bf16.msra.mxu1 %v5054_v10  ;;  %v5111_v9 = vld [vmem:[#allocation4 + $0x200] ss:$16 sps:$4 sm:$0xff]   ;;  %v5114_v10 = vld [vmem:[#allocation4 + $0x208] ss:$16 sps:$4 sm:$0xff]  }
 0x130   :  { %2594 = vmatprep.subr.bf16.mxu0 %v5059_v11  ;;  %2676 = vmatprep.subr.bf16.mxu1 %v5062_v12  ;;  %v5119_v12 = vld [vmem:[#allocation4 + $0x224] ss:$16 sps:$4 sm:$0xff]  }
 0x133   :  { %2595 = vmatpush1.bf16.msra.mxu0 %v5057_v13  ;;  %2677 = vmatpush1.bf16.msra.mxu1 %v5060_v14  ;;  %v5122_v13 = vld [vmem:[#allocation4 + $0x22c] ss:$16 sps:$4 sm:$0xff]  }
 0x134   :  { %2596 = vmatprep.subr.bf16.mxu0 %v5065_v15  ;;  %2678 = vmatprep.subr.bf16.mxu1 %v5068_v16  ;;  %v5117_v15 = vld [vmem:[#allocation4 + $0x220] ss:$16 sps:$4 sm:$0xff]   ;;  %v5120_v16 = vld [vmem:[#allocation4 + $0x228] ss:$16 sps:$4 sm:$0xff]  }
 0x137   :  { %2597 = vmatpush1.bf16.msra.mxu0 %v5063_v17  ;;  %2679 = vmatpush1.bf16.msra.mxu1 %v5066_v18  ;;  %v5125_v17 = vld [vmem:[#allocation4 + $0x244] ss:$16 sps:$4 sm:$0xff]   ;;  %v5128_v18 = vld [vmem:[#allocation4 + $0x24c] ss:$16 sps:$4 sm:$0xff]  }
 0x138   :  { %2598 = vmatprep.subr.bf16.mxu0 %v5071_v19  ;;  %2680 = vmatprep.subr.bf16.mxu1 %v5074_v20  ;;  %v5123_v19 = vld [vmem:[#allocation4 + $0x240] ss:$16 sps:$4 sm:$0xff]   ;;  %v5126_v20 = vld [vmem:[#allocation4 + $0x248] ss:$16 sps:$4 sm:$0xff]  }
 0x13b   :  { %2599 = vmatpush1.bf16.msra.mxu0 %v5069_v21  ;;  %2681 = vmatpush1.bf16.msra.mxu1 %v5072_v22  ;;  %v5131_v21 = vld [vmem:[#allocation4 + $0x264] ss:$16 sps:$4 sm:$0xff]   ;;  %v5134_v22 = vld [vmem:[#allocation4 + $0x26c] ss:$16 sps:$4 sm:$0xff]  }
 0x13c   :  { %2600 = vmatprep.subr.bf16.mxu0 %v5077_v23  ;;  %2682 = vmatprep.subr.bf16.mxu1 %v5080_v24  ;;  %v5129_v23 = vld [vmem:[#allocation4 + $0x260] ss:$16 sps:$4 sm:$0xff]   ;;  %v5132_v24 = vld [vmem:[#allocation4 + $0x268] ss:$16 sps:$4 sm:$0xff]  }
 0x13f   :  { %2601 = vmatpush1.bf16.msra.mxu0 %v5075_v25  ;;  %2683 = vmatpush1.bf16.msra.mxu1 %v5078_v26  ;;  %v5137_v25 = vld [vmem:[#allocation4 + $0x284] ss:$16 sps:$4 sm:$0xff]   ;;  %v5140_v26 = vld [vmem:[#allocation4 + $0x28c] ss:$16 sps:$4 sm:$0xff]  }
 0x140   :  { %2602 = vmatprep.subr.bf16.mxu0 %v5083_v27  ;;  %2684 = vmatprep.subr.bf16.mxu1 %v5086_v28  ;;  %v5135_v27 = vld [vmem:[#allocation4 + $0x280] ss:$16 sps:$4 sm:$0xff]   ;;  %v5138_v28 = vld [vmem:[#allocation4 + $0x288] ss:$16 sps:$4 sm:$0xff]  }
 0x143   :  { %2603 = vmatpush1.bf16.msra.mxu0 %v5081_v29  ;;  %2685 = vmatpush1.bf16.msra.mxu1 %v5084_v30  ;;  %v5143_v29 = vld [vmem:[#allocation4 + $0x2a4] ss:$16 sps:$4 sm:$0xff]   ;;  %v5146_v30 = vld [vmem:[#allocation4 + $0x2ac] ss:$16 sps:$4 sm:$0xff]  }
 0x144   :  { %2604 = vmatprep.subr.bf16.mxu0 %v5089_v31  ;;  %2686 = vmatprep.subr.bf16.mxu1 %v5092_v32  ;;  %v5141_v31 = vld [vmem:[#allocation4 + $0x2a0] ss:$16 sps:$4 sm:$0xff]   ;;  %v5144_v32 = vld [vmem:[#allocation4 + $0x2a8] ss:$16 sps:$4 sm:$0xff]  }
 0x147   :  { %2605 = vmatpush1.bf16.msra.mxu0 %v5087_v33  ;;  %2687 = vmatpush1.bf16.msra.mxu1 %v5090_v34  ;;  %v5149_v33 = vld [vmem:[#allocation4 + $0x2c4] ss:$16 sps:$4 sm:$0xff]   ;;  %v5152_v34 = vld [vmem:[#allocation4 + $0x2cc] ss:$16 sps:$4 sm:$0xff]  }
 0x148   :  { %2606 = vmatprep.subr.bf16.mxu0 %v5095_v35  ;;  %2688 = vmatprep.subr.bf16.mxu1 %v5098_v36  ;;  %v5147_v35 = vld [vmem:[#allocation4 + $0x2c0] ss:$16 sps:$4 sm:$0xff]   ;;  %v5150_v36 = vld [vmem:[#allocation4 + $0x2c8] ss:$16 sps:$4 sm:$0xff]  }
 0x14b   :  { %2607 = vmatpush1.bf16.msra.mxu0 %v5093_v37  ;;  %2689 = vmatpush1.bf16.msra.mxu1 %v5096_v38  ;;  %v5155_v37 = vld [vmem:[#allocation4 + $0x2e4] ss:$16 sps:$4 sm:$0xff]   ;;  %v5158_v38 = vld [vmem:[#allocation4 + $0x2ec] ss:$16 sps:$4 sm:$0xff]  }
 0x14c   :  { %2608 = vmatprep.subr.bf16.mxu0 %v5101_v39  ;;  %2690 = vmatprep.subr.bf16.mxu1 %v5104_v40  ;;  %v5153_v39 = vld [vmem:[#allocation4 + $0x2e0] ss:$16 sps:$4 sm:$0xff]   ;;  %v5156_v40 = vld [vmem:[#allocation4 + $0x2e8] ss:$16 sps:$4 sm:$0xff]  }
 0x14f   :  { %2609 = vmatpush1.bf16.msra.mxu0 %v5099_v41  ;;  %2691 = vmatpush1.bf16.msra.mxu1 %v5102_v42  ;;  %v5161_v41 = vld [vmem:[#allocation4 + $0x304] ss:$16 sps:$4 sm:$0xff]   ;;  %v5164_v42 = vld [vmem:[#allocation4 + $0x30c] ss:$16 sps:$4 sm:$0xff]  }
 0x150   :  { %2610 = vmatprep.subr.bf16.mxu0 %v5107_v43  ;;  %2692 = vmatprep.subr.bf16.mxu1 %v5110_v44  ;;  %v5159_v43 = vld [vmem:[#allocation4 + $0x300] ss:$16 sps:$4 sm:$0xff]   ;;  %v5162_v44 = vld [vmem:[#allocation4 + $0x308] ss:$16 sps:$4 sm:$0xff]  }
 0x153   :  { %2611 = vmatpush1.bf16.msra.mxu0 %v5105_v45  ;;  %2693 = vmatpush1.bf16.msra.mxu1 %v5108_v46  ;;  %v5167_v45 = vld [vmem:[#allocation4 + $0x324] ss:$16 sps:$4 sm:$0xff]   ;;  %v5170_v46 = vld [vmem:[#allocation4 + $0x32c] ss:$16 sps:$4 sm:$0xff]  }
 0x154   :  { %2621 = vmatprep.subr.bf16.mxu0 %v5113_v47  ;;  %2703 = vmatprep.subr.bf16.mxu1 %v5116_v48  ;;  %v5165_v47 = vld [vmem:[#allocation4 + $0x320] ss:$16 sps:$4 sm:$0xff]   ;;  %v5168_v48 = vld [vmem:[#allocation4 + $0x328] ss:$16 sps:$4 sm:$0xff]  }
 0x1e9   :  { %v1611_v58 = vpop.f32.mrb[0].mxu0  ;;  %v5652_v59 = vpop.f32.mrb[0].mxu1 }
 0x1ea   :  { %v4621_v60 = vadd.f32 %v1611_v58, %v317_v55  ;;  %v1613_v61 = vpop.f32.mrb[1].mxu0  ;;  %v1777_v62 = vpop.f32.mrb[1].mxu1  ;;  %v5176_v55 = vld [vmem:[#allocation4 + $0x34c] ss:$16 sps:$4 sm:$0xff]   ;;  %v5179_v58 = vld [vmem:[#allocation4 + $0x364] ss:$16 sps:$4 sm:$0xff]  }
 0x1eb   :  { %v4622_v63 = vadd.f32 %v1613_v61, %v321_v56  ;;  %v4624_v0 = vadd.f32 %v1777_v62, %v329_v57  ;;  %v1615_v1 = vpop.f32.mrb[2].mxu0  ;;  %v1779_v2 = vpop.f32.mrb[2].mxu1  ;;  %v5171_v56 = vld [vmem:[#allocation4 + $0x340] ss:$16 sps:$4 sm:$0xff]   ;;  %v5174_v57 = vld [vmem:[#allocation4 + $0x348] ss:$16 sps:$4 sm:$0xff]  }
 0x1ec   :  { %v1782_v3 = vmax.f32 %v4621_v60, 0.0  ;;  %v1616_v4 = vpop.f32.mrb[3].mxu0  ;;  %v1780_v5 = vpop.f32.mrb[3].mxu1  ;;  %v5182_v60 = vld [vmem:[#allocation4 + $0x36c] ss:$16 sps:$4 sm:$0xff]  }
 0x1ed   :  { %v1783_v6 = vmax.f32 %v4622_v63, 0.0  ;;  %v1785_v7 = vmax.f32 %v4624_v0, 0.0  ;;  %v5177_v61 = vld [vmem:[#allocation4 + $0x360] ss:$16 sps:$4 sm:$0xff]   ;;  %v5180_v62 = vld [vmem:[#allocation4 + $0x368] ss:$16 sps:$4 sm:$0xff]  }
 0x1ee   :  { %v1786_v11 = vpack.c.bf16 %v1782_v3, %v1782_v3  ;;  %v5185_v63 = vld [vmem:[#allocation4 + $0x384] ss:$16 sps:$4 sm:$0xff]   ;;  %v5188_v0 = vld [vmem:[#allocation4 + $0x38c] ss:$16 sps:$4 sm:$0xff]   ;;  %v5183_v1 = vld [vmem:[#allocation4 + $0x380] ss:$16 sps:$4 sm:$0xff]  }
 0x1ef   :  { %v1787_v8 = vpack.c.bf16 %v1783_v6, %v1783_v6  ;;  %v1789_v14 = vpack.c.bf16 %v1785_v7, %v1785_v7  ;;  %v5186_v2 = vld [vmem:[#allocation4 + $0x388] ss:$16 sps:$4 sm:$0xff]   ;;  %v5655_v3 = vsub.s32 2, %v5630_v50  ;;  %v5191_v4 = vld [vmem:[#allocation4 + $0x3a4] ss:$16 sps:$4 sm:$0xff]  }
 0x1f0   :  { %v5194_v5 = vld [vmem:[#allocation4 + $0x3ac] ss:$16 sps:$4 sm:$0xff]   ;;  %v5189_v6 = vld [vmem:[#allocation4 + $0x3a0] ss:$16 sps:$4 sm:$0xff]   ;;  %v5192_v7 = vld [vmem:[#allocation4 + $0x3a8] ss:$16 sps:$4 sm:$0xff]  }
 0x1f1   :  { %2612 = vmatprep.mubr.bf16.mxu0 %v1787_v8  ;;  %2694 = vmatprep.mubr.bf16.mxu1 %v1787_v8  ;;  %v325_v8 = vrot.slane %v5638_v52, %v5655_v3  ;;  %v5198_v50 = vld [vmem:[#allocation4 + $0x3c8] ss:$16 sps:$4 sm:$0xff]   ;;  %v5209_v52 = vld [vmem:[#allocation6 + $0x4] ss:$16 sps:$4 sm:$0xff]  }
 0x1f2   :  { %2613 = vmatmul.mubr.bf16.vlgmr.msra.gmra.mrb[4].mxu0 %v1786_v11  ;;  %2695 = vmatmul.mubr.bf16.vlgmr.msra.gmra.mrb[4].mxu1 %v1786_v11  ;;  %v5195_v11 = vld [vmem:[#allocation4 + $0x3c0] ss:$16 sps:$4 sm:$0xff]  }
 0x1f3   :  { %2622 = vmatpush1.bf16.msra.mxu0 %v5111_v9  ;;  %2704 = vmatpush1.bf16.msra.mxu1 %v5114_v10  ;;  %v5197_v9 = vld [vmem:[#allocation4 + $0x3c4] ss:$16 sps:$4 sm:$0xff]   ;;  %v5200_v10 = vld [vmem:[#allocation4 + $0x3cc] ss:$16 sps:$4 sm:$0xff]  }
 0x1f4   :  { %2653 = vmatprep.mubr.bf16.mxu0 %v1789_v14  ;;  %2735 = vmatprep.mubr.bf16.mxu1 %v1789_v14  ;;  %v5206_v14 = vld [vmem:[#allocation4 + $0x3ec] ss:$16 sps:$4 sm:$0xff]  }
 0x1f5   :  { %2623 = vmatprep.subr.bf16.mxu0 %v5119_v12  ;;  %2705 = vmatprep.subr.bf16.mxu1 %v5122_v13  ;;  %v4623_v12 = vadd.f32 %v5652_v59, %v325_v8  ;;  %v5203_v13 = vld [vmem:[#allocation4 + $0x3e4] ss:$16 sps:$4 sm:$0xff]  }
 0x1f6   :  { %v5215_v59 = vld [vmem:[#allocation6 + $0x24] ss:$16 sps:$4 sm:$0xff]  }
 0x1f7   :  { %2624 = vmatpush1.bf16.msra.mxu0 %v5117_v15  ;;  %2706 = vmatpush1.bf16.msra.mxu1 %v5120_v16  ;;  %v5201_v15 = vld [vmem:[#allocation4 + $0x3e0] ss:$16 sps:$4 sm:$0xff]   ;;  %v5204_v16 = vld [vmem:[#allocation4 + $0x3e8] ss:$16 sps:$4 sm:$0xff]   ;;  %v5281_v8 = vld [vmem:[#allocation6 + $0x184] ss:$16 sps:$4 sm:$0xff]  }
 0x1f8   :  { %2625 = vmatprep.subr.bf16.mxu0 %v5125_v17  ;;  %2707 = vmatprep.subr.bf16.mxu1 %v5128_v18  ;;  %v1784_v17 = vmax.f32 %v4623_v12, 0.0  ;;  %v5212_v18 = vld [vmem:[#allocation6 + $0xc] ss:$16 sps:$4 sm:$0xff]  }
 0x1f9   :  { %v5290_v12 = vld [vmem:[#allocation6 + $0x1ac] ss:$16 sps:$4 sm:$0xff]  }
 0x1fb   :  { %2626 = vmatpush1.bf16.msra.mxu0 %v5123_v19  ;;  %2708 = vmatpush1.bf16.msra.mxu1 %v5126_v20  ;;  %v5207_v19 = vld [vmem:[#allocation6] ss:$16 sps:$4 sm:$0xff]   ;;  %v5210_v20 = vld [vmem:[#allocation6 + $0x8] ss:$16 sps:$4 sm:$0xff]  }
 0x1fc   :  { %2627 = vmatprep.subr.bf16.mxu0 %v5131_v21  ;;  %2709 = vmatprep.subr.bf16.mxu1 %v5134_v22  ;;  %v1788_v21 = vpack.c.bf16 %v1784_v17, %v1784_v17  ;;  %v5218_v22 = vld [vmem:[#allocation6 + $0x2c] ss:$16 sps:$4 sm:$0xff]   ;;  %v5291_v17 = vld [vmem:[#allocation6 + $0x1c0] ss:$16 sps:$4 sm:$0xff]  }
 0x1ff   :  { %2628 = vmatpush1.bf16.msra.mxu0 %v5129_v23  ;;  %2710 = vmatpush1.bf16.msra.mxu1 %v5132_v24  ;;  %v5213_v23 = vld [vmem:[#allocation6 + $0x20] ss:$16 sps:$4 sm:$0xff]   ;;  %v5216_v24 = vld [vmem:[#allocation6 + $0x28] ss:$16 sps:$4 sm:$0xff]  }
 0x200   :  { %2629 = vmatprep.subr.bf16.mxu0 %v5137_v25  ;;  %2711 = vmatprep.subr.bf16.mxu1 %v5140_v26  ;;  %v5221_v25 = vld [vmem:[#allocation6 + $0x44] ss:$16 sps:$4 sm:$0xff]   ;;  %v5224_v26 = vld [vmem:[#allocation6 + $0x4c] ss:$16 sps:$4 sm:$0xff]  }
 0x203   :  { %2630 = vmatpush1.bf16.msra.mxu0 %v5135_v27  ;;  %2712 = vmatpush1.bf16.msra.mxu1 %v5138_v28  ;;  %v5219_v27 = vld [vmem:[#allocation6 + $0x40] ss:$16 sps:$4 sm:$0xff]   ;;  %v5222_v28 = vld [vmem:[#allocation6 + $0x48] ss:$16 sps:$4 sm:$0xff]  }
 0x204   :  { %2631 = vmatprep.subr.bf16.mxu0 %v5143_v29  ;;  %2713 = vmatprep.subr.bf16.mxu1 %v5146_v30  ;;  %v5227_v29 = vld [vmem:[#allocation6 + $0x64] ss:$16 sps:$4 sm:$0xff]   ;;  %v5230_v30 = vld [vmem:[#allocation6 + $0x6c] ss:$16 sps:$4 sm:$0xff]  }
 0x207   :  { %2632 = vmatpush1.bf16.msra.mxu0 %v5141_v31  ;;  %2714 = vmatpush1.bf16.msra.mxu1 %v5144_v32  ;;  %v5225_v31 = vld [vmem:[#allocation6 + $0x60] ss:$16 sps:$4 sm:$0xff]   ;;  %v5228_v32 = vld [vmem:[#allocation6 + $0x68] ss:$16 sps:$4 sm:$0xff]  }
 0x208   :  { %2633 = vmatprep.subr.bf16.mxu0 %v5149_v33  ;;  %2715 = vmatprep.subr.bf16.mxu1 %v5152_v34  ;;  %v5233_v33 = vld [vmem:[#allocation6 + $0x84] ss:$16 sps:$4 sm:$0xff]   ;;  %v5236_v34 = vld [vmem:[#allocation6 + $0x8c] ss:$16 sps:$4 sm:$0xff]  }
 0x20b   :  { %2634 = vmatpush1.bf16.msra.mxu0 %v5147_v35  ;;  %2716 = vmatpush1.bf16.msra.mxu1 %v5150_v36  ;;  %v5231_v35 = vld [vmem:[#allocation6 + $0x80] ss:$16 sps:$4 sm:$0xff]   ;;  %v5234_v36 = vld [vmem:[#allocation6 + $0x88] ss:$16 sps:$4 sm:$0xff]  }
 0x20c   :  { %2635 = vmatprep.subr.bf16.mxu0 %v5155_v37  ;;  %2717 = vmatprep.subr.bf16.mxu1 %v5158_v38  ;;  %v5239_v37 = vld [vmem:[#allocation6 + $0xa4] ss:$16 sps:$4 sm:$0xff]   ;;  %v5242_v38 = vld [vmem:[#allocation6 + $0xac] ss:$16 sps:$4 sm:$0xff]  }
 0x20f   :  { %2636 = vmatpush1.bf16.msra.mxu0 %v5153_v39  ;;  %2718 = vmatpush1.bf16.msra.mxu1 %v5156_v40  ;;  %v5237_v39 = vld [vmem:[#allocation6 + $0xa0] ss:$16 sps:$4 sm:$0xff]   ;;  %v5240_v40 = vld [vmem:[#allocation6 + $0xa8] ss:$16 sps:$4 sm:$0xff]  }
 0x210   :  { %2637 = vmatprep.subr.bf16.mxu0 %v5161_v41  ;;  %2719 = vmatprep.subr.bf16.mxu1 %v5164_v42  ;;  %v5245_v41 = vld [vmem:[#allocation6 + $0xc4] ss:$16 sps:$4 sm:$0xff]   ;;  %v5248_v42 = vld [vmem:[#allocation6 + $0xcc] ss:$16 sps:$4 sm:$0xff]  }
 0x213   :  { %2638 = vmatpush1.bf16.msra.mxu0 %v5159_v43  ;;  %2720 = vmatpush1.bf16.msra.mxu1 %v5162_v44  ;;  %v5243_v43 = vld [vmem:[#allocation6 + $0xc0] ss:$16 sps:$4 sm:$0xff]   ;;  %v5246_v44 = vld [vmem:[#allocation6 + $0xc8] ss:$16 sps:$4 sm:$0xff]  }
 0x214   :  { %2639 = vmatprep.subr.bf16.mxu0 %v5167_v45  ;;  %2721 = vmatprep.subr.bf16.mxu1 %v5170_v46  ;;  %v5251_v45 = vld [vmem:[#allocation6 + $0xe4] ss:$16 sps:$4 sm:$0xff]   ;;  %v5254_v46 = vld [vmem:[#allocation6 + $0xec] ss:$16 sps:$4 sm:$0xff]  }
 0x217   :  { %2640 = vmatpush1.bf16.msra.mxu0 %v5165_v47  ;;  %2722 = vmatpush1.bf16.msra.mxu1 %v5168_v48  ;;  %v5249_v47 = vld [vmem:[#allocation6 + $0xe0] ss:$16 sps:$4 sm:$0xff]   ;;  %v5252_v48 = vld [vmem:[#allocation6 + $0xe8] ss:$16 sps:$4 sm:$0xff]  }
 0x218   :  { %2641 = vmatprep.subr.bf16.mxu0 %v5173_v49  ;;  %2723 = vmatprep.subr.bf16.mxu1 %v5176_v55  ;;  %v5257_v49 = vld [vmem:[#allocation6 + $0x104] ss:$16 sps:$4 sm:$0xff]   ;;  %v5260_v55 = vld [vmem:[#allocation6 + $0x10c] ss:$16 sps:$4 sm:$0xff]  }
 0x21b   :  { %2642 = vmatpush1.bf16.msra.mxu0 %v5171_v56  ;;  %2724 = vmatpush1.bf16.msra.mxu1 %v5174_v57  ;;  %v5255_v56 = vld [vmem:[#allocation6 + $0x100] ss:$16 sps:$4 sm:$0xff]   ;;  %v5258_v57 = vld [vmem:[#allocation6 + $0x108] ss:$16 sps:$4 sm:$0xff]  }
 0x21c   :  { %2643 = vmatprep.subr.bf16.mxu0 %v5179_v58  ;;  %2725 = vmatprep.subr.bf16.mxu1 %v5182_v60  ;;  %v5263_v58 = vld [vmem:[#allocation6 + $0x124] ss:$16 sps:$4 sm:$0xff]   ;;  %v5266_v60 = vld [vmem:[#allocation6 + $0x12c] ss:$16 sps:$4 sm:$0xff]  }
 0x21f   :  { %2644 = vmatpush1.bf16.msra.mxu0 %v5177_v61  ;;  %2726 = vmatpush1.bf16.msra.mxu1 %v5180_v62  ;;  %v5261_v61 = vld [vmem:[#allocation6 + $0x120] ss:$16 sps:$4 sm:$0xff]   ;;  %v5264_v62 = vld [vmem:[#allocation6 + $0x128] ss:$16 sps:$4 sm:$0xff]  }
 0x220   :  { %2645 = vmatprep.subr.bf16.mxu0 %v5185_v63  ;;  %2727 = vmatprep.subr.bf16.mxu1 %v5188_v0  ;;  %v5269_v63 = vld [vmem:[#allocation6 + $0x144] ss:$16 sps:$4 sm:$0xff]   ;;  %v5272_v0 = vld [vmem:[#allocation6 + $0x14c] ss:$16 sps:$4 sm:$0xff]  }
 0x223   :  { %2646 = vmatpush1.bf16.msra.mxu0 %v5183_v1  ;;  %2728 = vmatpush1.bf16.msra.mxu1 %v5186_v2  ;;  %v5267_v1 = vld [vmem:[#allocation6 + $0x140] ss:$16 sps:$4 sm:$0xff]   ;;  %v5270_v2 = vld [vmem:[#allocation6 + $0x148] ss:$16 sps:$4 sm:$0xff]  }
 0x224   :  { %2647 = vmatprep.subr.bf16.mxu0 %v5191_v4  ;;  %2729 = vmatprep.subr.bf16.mxu1 %v5194_v5  ;;  %v5275_v4 = vld [vmem:[#allocation6 + $0x164] ss:$16 sps:$4 sm:$0xff]   ;;  %v5278_v5 = vld [vmem:[#allocation6 + $0x16c] ss:$16 sps:$4 sm:$0xff]  }
 0x227   :  { %2648 = vmatpush1.bf16.msra.mxu0 %v5189_v6  ;;  %2730 = vmatpush1.bf16.msra.mxu1 %v5192_v7  ;;  %v5273_v6 = vld [vmem:[#allocation6 + $0x160] ss:$16 sps:$4 sm:$0xff]   ;;  %v5276_v7 = vld [vmem:[#allocation6 + $0x168] ss:$16 sps:$4 sm:$0xff]  }
 0x228   :  { %2649 = vmatprep.subr.bf16.mxu0 %v5197_v9  ;;  %2731 = vmatprep.subr.bf16.mxu1 %v5200_v10  ;;  %v5284_v9 = vld [vmem:[#allocation6 + $0x18c] ss:$16 sps:$4 sm:$0xff]   ;;  %v5279_v10 = vld [vmem:[#allocation6 + $0x180] ss:$16 sps:$4 sm:$0xff]  }
 0x22b   :  { %2650 = vmatpush1.bf16.msra.mxu0 %v5195_v11  ;;  %2732 = vmatpush1.bf16.msra.mxu1 %v5198_v50  ;;  %v5282_v11 = vld [vmem:[#allocation6 + $0x188] ss:$16 sps:$4 sm:$0xff]   ;;  %v5287_v50 = vld [vmem:[#allocation6 + $0x1a4] ss:$16 sps:$4 sm:$0xff]  }
 0x22c   :  { %2651 = vmatprep.subr.bf16.mxu0 %v5203_v13  ;;  %2733 = vmatprep.subr.bf16.mxu1 %v5206_v14  ;;  %v5285_v13 = vld [vmem:[#allocation6 + $0x1a0] ss:$16 sps:$4 sm:$0xff]   ;;  %v5288_v14 = vld [vmem:[#allocation6 + $0x1a8] ss:$16 sps:$4 sm:$0xff]  }
 0x22f   :  { %2652 = vmatpush1.bf16.msra.mxu0 %v5201_v15  ;;  %2734 = vmatpush1.bf16.msra.mxu1 %v5204_v16  ;;  %v5293_v15 = vld [vmem:[#allocation6 + $0x1c4] ss:$16 sps:$4 sm:$0xff]   ;;  %v5296_v16 = vld [vmem:[#allocation6 + $0x1cc] ss:$16 sps:$4 sm:$0xff]  }
 0x230   :  { %3542 = vmatprep.subr.bf16.mxu0 %v5209_v52  ;;  %3624 = vmatprep.subr.bf16.mxu1 %v5212_v18  ;;  %v5294_v52 = vld [vmem:[#allocation6 + $0x1c8] ss:$16 sps:$4 sm:$0xff]   ;;  %v5299_v18 = vld [vmem:[#allocation6 + $0x1e4] ss:$16 sps:$4 sm:$0xff]  }
 0x232   :  { %2654 = vmatmul.mubr.bf16.vlgmr.msra.gmra.mrb[4].mxu0 %v1788_v21  ;;  %2736 = vmatmul.mubr.bf16.vlgmr.msra.gmra.mrb[4].mxu1 %v1788_v21  ;;  %v5300_v21 = vld [vmem:[#allocation6 + $0x1e8] ss:$16 sps:$4 sm:$0xff]  }
 0x233   :  { %3543 = vmatpush1.bf16.msra.mxu0 %v5207_v19  ;;  %3625 = vmatpush1.bf16.msra.mxu1 %v5210_v20  ;;  %v5302_v19 = vld [vmem:[#allocation6 + $0x1ec] ss:$16 sps:$4 sm:$0xff]   ;;  %v5297_v20 = vld [vmem:[#allocation6 + $0x1e0] ss:$16 sps:$4 sm:$0xff]  }
 0x234   :  { %3544 = vmatprep.subr.bf16.mxu0 %v5215_v59  ;;  %3626 = vmatprep.subr.bf16.mxu1 %v5218_v22  ;;  %v5305_v59 = vld [vmem:[#allocation6 + $0x204] ss:$16 sps:$4 sm:$0xff]   ;;  %v5308_v22 = vld [vmem:[#allocation6 + $0x20c] ss:$16 sps:$4 sm:$0xff]  }
 0x237   :  { %3545 = vmatpush1.bf16.msra.mxu0 %v5213_v23  ;;  %3627 = vmatpush1.bf16.msra.mxu1 %v5216_v24  ;;  %v5663_v23 = vld [vmem:[%s5789_s4] sm:$0xf] }
 0x238   :  { %3546 = vmatprep.subr.bf16.mxu0 %v5221_v25  ;;  %3628 = vmatprep.subr.bf16.mxu1 %v5224_v26  ;;  %v1923_v24 = vrot.slane %v5663_v23, %v5633_v51  ;;  %v1927_v25 = vrot.slane %v5663_v23, %v5641_v53  ;;  %v1935_v26 = vrot.slane %v5663_v23, %v5644_v54 }
 0x23b   :  { %3547 = vmatpush1.bf16.msra.mxu0 %v5219_v27  ;;  %3629 = vmatpush1.bf16.msra.mxu1 %v5222_v28 }
 0x23c   :  { %3548 = vmatprep.subr.bf16.mxu0 %v5227_v29  ;;  %3630 = vmatprep.subr.bf16.mxu1 %v5230_v30 }
 0x23f   :  { %3549 = vmatpush1.bf16.msra.mxu0 %v5225_v31  ;;  %3631 = vmatpush1.bf16.msra.mxu1 %v5228_v32 }
 0x240   :  { %3550 = vmatprep.subr.bf16.mxu0 %v5233_v33  ;;  %3632 = vmatprep.subr.bf16.mxu1 %v5236_v34 }
 0x243   :  { %3551 = vmatpush1.bf16.msra.mxu0 %v5231_v35  ;;  %3633 = vmatpush1.bf16.msra.mxu1 %v5234_v36 }
 0x244   :  { %3552 = vmatprep.subr.bf16.mxu0 %v5239_v37  ;;  %3634 = vmatprep.subr.bf16.mxu1 %v5242_v38 }
 0x247   :  { %3553 = vmatpush1.bf16.msra.mxu0 %v5237_v39  ;;  %3635 = vmatpush1.bf16.msra.mxu1 %v5240_v40 }
 0x248   :  { %3554 = vmatprep.subr.bf16.mxu0 %v5245_v41  ;;  %3636 = vmatprep.subr.bf16.mxu1 %v5248_v42  ;;  %v5303_v42 = vld [vmem:[#allocation6 + $0x200] ss:$16 sps:$4 sm:$0xff]  }
 0x24b   :  { %3555 = vmatpush1.bf16.msra.mxu0 %v5243_v43  ;;  %3637 = vmatpush1.bf16.msra.mxu1 %v5246_v44  ;;  %v5306_v43 = vld [vmem:[#allocation6 + $0x208] ss:$16 sps:$4 sm:$0xff]  }
 0x24c   :  { %3556 = vmatprep.subr.bf16.mxu0 %v5251_v45  ;;  %3638 = vmatprep.subr.bf16.mxu1 %v5254_v46  ;;  %v5311_v45 = vld [vmem:[#allocation6 + $0x224] ss:$16 sps:$4 sm:$0xff]   ;;  %v5314_v46 = vld [vmem:[#allocation6 + $0x22c] ss:$16 sps:$4 sm:$0xff]  }
 0x24f   :  { %3557 = vmatpush1.bf16.msra.mxu0 %v5249_v47  ;;  %3639 = vmatpush1.bf16.msra.mxu1 %v5252_v48  ;;  %v5309_v48 = vld [vmem:[#allocation6 + $0x220] ss:$16 sps:$4 sm:$0xff]  }
 0x250   :  { %3558 = vmatprep.subr.bf16.mxu0 %v5257_v49  ;;  %3640 = vmatprep.subr.bf16.mxu1 %v5260_v55  ;;  %v5312_v49 = vld [vmem:[#allocation6 + $0x228] ss:$16 sps:$4 sm:$0xff]   ;;  %v5317_v55 = vld [vmem:[#allocation6 + $0x244] ss:$16 sps:$4 sm:$0xff]  }
 0x253   :  { %3559 = vmatpush1.bf16.msra.mxu0 %v5255_v56  ;;  %3641 = vmatpush1.bf16.msra.mxu1 %v5258_v57  ;;  %v5320_v56 = vld [vmem:[#allocation6 + $0x24c] ss:$16 sps:$4 sm:$0xff]   ;;  %v5315_v57 = vld [vmem:[#allocation6 + $0x240] ss:$16 sps:$4 sm:$0xff]  }
 0x254   :  { %3560 = vmatprep.subr.bf16.mxu0 %v5263_v58  ;;  %3642 = vmatprep.subr.bf16.mxu1 %v5266_v60  ;;  %v5318_v58 = vld [vmem:[#allocation6 + $0x248] ss:$16 sps:$4 sm:$0xff]   ;;  %v5323_v60 = vld [vmem:[#allocation6 + $0x264] ss:$16 sps:$4 sm:$0xff]  }
 0x257   :  { %3561 = vmatpush1.bf16.msra.mxu0 %v5261_v61  ;;  %3643 = vmatpush1.bf16.msra.mxu1 %v5264_v62  ;;  %v5326_v61 = vld [vmem:[#allocation6 + $0x26c] ss:$16 sps:$4 sm:$0xff]   ;;  %v5321_v62 = vld [vmem:[#allocation6 + $0x260] ss:$16 sps:$4 sm:$0xff]  }
 0x258   :  { %3562 = vmatprep.subr.bf16.mxu0 %v5269_v63  ;;  %3644 = vmatprep.subr.bf16.mxu1 %v5272_v0  ;;  %v5324_v63 = vld [vmem:[#allocation6 + $0x268] ss:$16 sps:$4 sm:$0xff]   ;;  %v5329_v0 = vld [vmem:[#allocation6 + $0x284] ss:$16 sps:$4 sm:$0xff]  }
 0x25b   :  { %3563 = vmatpush1.bf16.msra.mxu0 %v5267_v1  ;;  %3645 = vmatpush1.bf16.msra.mxu1 %v5270_v2  ;;  %v5332_v1 = vld [vmem:[#allocation6 + $0x28c] ss:$16 sps:$4 sm:$0xff]   ;;  %v5327_v2 = vld [vmem:[#allocation6 + $0x280] ss:$16 sps:$4 sm:$0xff]  }
 0x25c   :  { %3564 = vmatprep.subr.bf16.mxu0 %v5275_v4  ;;  %3646 = vmatprep.subr.bf16.mxu1 %v5278_v5  ;;  %v5330_v4 = vld [vmem:[#allocation6 + $0x288] ss:$16 sps:$4 sm:$0xff]   ;;  %v5335_v5 = vld [vmem:[#allocation6 + $0x2a4] ss:$16 sps:$4 sm:$0xff]  }
 0x25f   :  { %3565 = vmatpush1.bf16.msra.mxu0 %v5273_v6  ;;  %3647 = vmatpush1.bf16.msra.mxu1 %v5276_v7  ;;  %v5338_v6 = vld [vmem:[#allocation6 + $0x2ac] ss:$16 sps:$4 sm:$0xff]   ;;  %v5333_v7 = vld [vmem:[#allocation6 + $0x2a0] ss:$16 sps:$4 sm:$0xff]  }
 0x260   :  { %3566 = vmatprep.subr.bf16.mxu0 %v5281_v8  ;;  %3648 = vmatprep.subr.bf16.mxu1 %v5284_v9  ;;  %v5336_v8 = vld [vmem:[#allocation6 + $0x2a8] ss:$16 sps:$4 sm:$0xff]   ;;  %v5341_v9 = vld [vmem:[#allocation6 + $0x2c4] ss:$16 sps:$4 sm:$0xff]  }
 0x263   :  { %3567 = vmatpush1.bf16.msra.mxu0 %v5279_v10  ;;  %3649 = vmatpush1.bf16.msra.mxu1 %v5282_v11  ;;  %v5344_v10 = vld [vmem:[#allocation6 + $0x2cc] ss:$16 sps:$4 sm:$0xff]   ;;  %v5339_v11 = vld [vmem:[#allocation6 + $0x2c0] ss:$16 sps:$4 sm:$0xff]  }
 0x264   :  { %3568 = vmatprep.subr.bf16.mxu0 %v5287_v50  ;;  %3650 = vmatprep.subr.bf16.mxu1 %v5290_v12  ;;  %v5342_v50 = vld [vmem:[#allocation6 + $0x2c8] ss:$16 sps:$4 sm:$0xff]   ;;  %v5347_v12 = vld [vmem:[#allocation6 + $0x2e4] ss:$16 sps:$4 sm:$0xff]  }
 0x267   :  { %3569 = vmatpush1.bf16.msra.mxu0 %v5285_v13  ;;  %3651 = vmatpush1.bf16.msra.mxu1 %v5288_v14  ;;  %v5350_v13 = vld [vmem:[#allocation6 + $0x2ec] ss:$16 sps:$4 sm:$0xff]   ;;  %v5345_v14 = vld [vmem:[#allocation6 + $0x2e0] ss:$16 sps:$4 sm:$0xff]  }
 0x268   :  { %3570 = vmatprep.subr.bf16.mxu0 %v5293_v15  ;;  %3652 = vmatprep.subr.bf16.mxu1 %v5296_v16  ;;  %v5348_v15 = vld [vmem:[#allocation6 + $0x2e8] ss:$16 sps:$4 sm:$0xff]   ;;  %v5353_v16 = vld [vmem:[#allocation6 + $0x304] ss:$16 sps:$4 sm:$0xff]  }
 0x26b   :  { %3571 = vmatpush1.bf16.msra.mxu0 %v5291_v17  ;;  %3653 = vmatpush1.bf16.msra.mxu1 %v5294_v52  ;;  %v5356_v17 = vld [vmem:[#allocation6 + $0x30c] ss:$16 sps:$4 sm:$0xff]   ;;  %v5351_v52 = vld [vmem:[#allocation6 + $0x300] ss:$16 sps:$4 sm:$0xff]  }
 0x26c   :  { %3572 = vmatprep.subr.bf16.mxu0 %v5299_v18  ;;  %3654 = vmatprep.subr.bf16.mxu1 %v5302_v19  ;;  %v5354_v18 = vld [vmem:[#allocation6 + $0x308] ss:$16 sps:$4 sm:$0xff]   ;;  %v5359_v19 = vld [vmem:[#allocation6 + $0x324] ss:$16 sps:$4 sm:$0xff]  }
 0x26f   :  { %3573 = vmatpush1.bf16.msra.mxu0 %v5297_v20  ;;  %3655 = vmatpush1.bf16.msra.mxu1 %v5300_v21  ;;  %v5362_v20 = vld [vmem:[#allocation6 + $0x32c] ss:$16 sps:$4 sm:$0xff]   ;;  %v5357_v21 = vld [vmem:[#allocation6 + $0x320] ss:$16 sps:$4 sm:$0xff]  }
 0x270   :  { %3583 = vmatprep.subr.bf16.mxu0 %v5305_v59  ;;  %3665 = vmatprep.subr.bf16.mxu1 %v5308_v22  ;;  %v5360_v59 = vld [vmem:[#allocation6 + $0x328] ss:$16 sps:$4 sm:$0xff]   ;;  %v5365_v22 = vld [vmem:[#allocation6 + $0x344] ss:$16 sps:$4 sm:$0xff]  }
 0x305   :  { %v2655_v27 = vpop.f32.mrb[4].mxu0  ;;  %v5671_v28 = vpop.f32.mrb[4].mxu1 }
 0x306   :  { %v4625_v29 = vadd.f32 %v2655_v27, %v1923_v24  ;;  %v2657_v30 = vpop.f32.mrb[5].mxu0  ;;  %v2739_v31 = vpop.f32.mrb[5].mxu1  ;;  %v5368_v24 = vld [vmem:[#allocation6 + $0x34c] ss:$16 sps:$4 sm:$0xff]   ;;  %v5371_v27 = vld [vmem:[#allocation6 + $0x364] ss:$16 sps:$4 sm:$0xff]  }
 0x307   :  { %v4626_v32 = vadd.f32 %v2657_v30, %v1927_v25  ;;  %v4628_v33 = vadd.f32 %v2739_v31, %v1935_v26  ;;  %v2659_v34 = vpop.f32.mrb[6].mxu0  ;;  %v2741_v35 = vpop.f32.mrb[6].mxu1  ;;  %v5363_v25 = vld [vmem:[#allocation6 + $0x340] ss:$16 sps:$4 sm:$0xff]   ;;  %v5366_v26 = vld [vmem:[#allocation6 + $0x348] ss:$16 sps:$4 sm:$0xff]  }
 0x308   :  { %v2744_v36 = vmax.f32 %v4625_v29, 0.0  ;;  %v2660_v37 = vpop.f32.mrb[7].mxu0  ;;  %v2742_v38 = vpop.f32.mrb[7].mxu1  ;;  %v5374_v29 = vld [vmem:[#allocation6 + $0x36c] ss:$16 sps:$4 sm:$0xff]  }
 0x309   :  { %v2745_v39 = vmax.f32 %v4626_v32, 0.0  ;;  %v2747_v40 = vmax.f32 %v4628_v33, 0.0  ;;  %v5369_v30 = vld [vmem:[#allocation6 + $0x360] ss:$16 sps:$4 sm:$0xff]   ;;  %v5372_v31 = vld [vmem:[#allocation6 + $0x368] ss:$16 sps:$4 sm:$0xff]  }
 0x30a   :  { %v2748_v44 = vpack.c.bf16 %v2744_v36, %v2744_v36  ;;  %v5377_v32 = vld [vmem:[#allocation6 + $0x384] ss:$16 sps:$4 sm:$0xff]   ;;  %v5380_v33 = vld [vmem:[#allocation6 + $0x38c] ss:$16 sps:$4 sm:$0xff]   ;;  %v5375_v34 = vld [vmem:[#allocation6 + $0x380] ss:$16 sps:$4 sm:$0xff]  }
 0x30b   :  { %v2749_v41 = vpack.c.bf16 %v2745_v39, %v2745_v39  ;;  %v2751_v47 = vpack.c.bf16 %v2747_v40, %v2747_v40  ;;  %v5378_v35 = vld [vmem:[#allocation6 + $0x388] ss:$16 sps:$4 sm:$0xff]   ;;  %v5383_v36 = vld [vmem:[#allocation6 + $0x3a4] ss:$16 sps:$4 sm:$0xff]   ;;  %v5386_v37 = vld [vmem:[#allocation6 + $0x3ac] ss:$16 sps:$4 sm:$0xff]   ;;  %v1931_v40 = vrot.slane %v5663_v23, %v5655_v3 }
 0x30c   :  { %v5381_v38 = vld [vmem:[#allocation6 + $0x3a0] ss:$16 sps:$4 sm:$0xff]   ;;  %v5384_v39 = vld [vmem:[#allocation6 + $0x3a8] ss:$16 sps:$4 sm:$0xff]  }
 0x30d   :  { %3574 = vmatprep.mubr.bf16.mxu0 %v2749_v41  ;;  %3656 = vmatprep.mubr.bf16.mxu1 %v2749_v41  ;;  %v5389_v41 = vld [vmem:[#allocation6 + $0x3c4] ss:$16 sps:$4 sm:$0xff]  }
 0x30e   :  { %3575 = vmatmul.mubr.bf16.vlgmr.msra.gmra.mrb[8].mxu0 %v2748_v44  ;;  %3657 = vmatmul.mubr.bf16.vlgmr.msra.gmra.mrb[8].mxu1 %v2748_v44  ;;  %v5390_v44 = vld [vmem:[#allocation6 + $0x3c8] ss:$16 sps:$4 sm:$0xff]   ;;  %v5399_v23 = vld [vmem:[%s5792_s7 + $0x40] sm:$0xff]  }
 0x30f   :  { %3584 = vmatpush1.bf16.msra.mxu0 %v5303_v42  ;;  %3666 = vmatpush1.bf16.msra.mxu1 %v5306_v43  ;;  %v5392_v42 = vld [vmem:[#allocation6 + $0x3cc] ss:$16 sps:$4 sm:$0xff]   ;;  %v5387_v43 = vld [vmem:[#allocation6 + $0x3c0] ss:$16 sps:$4 sm:$0xff]  }
 0x310   :  { %3615 = vmatprep.mubr.bf16.mxu0 %v2751_v47  ;;  %3697 = vmatprep.mubr.bf16.mxu1 %v2751_v47  ;;  %v5398_v47 = vld [vmem:[#allocation6 + $0x3ec] ss:$16 sps:$4 sm:$0xff]  }
 0x311   :  { %3585 = vmatprep.subr.bf16.mxu0 %v5311_v45  ;;  %3667 = vmatprep.subr.bf16.mxu1 %v5314_v46  ;;  %v4627_v45 = vadd.f32 %v5671_v28, %v1931_v40  ;;  %v5395_v46 = vld [vmem:[#allocation6 + $0x3e4] ss:$16 sps:$4 sm:$0xff]  }
 0x312   :  { %v5401_v28 = vld [vmem:[%s5792_s7] sm:$0xff]  }
 0x313   :  { %3586 = vmatpush1.bf16.msra.mxu0 %v5309_v48  ;;  %3668 = vmatpush1.bf16.msra.mxu1 %v5312_v49  ;;  %v5393_v48 = vld [vmem:[#allocation6 + $0x3e0] ss:$16 sps:$4 sm:$0xff]   ;;  %v5396_v49 = vld [vmem:[#allocation6 + $0x3e8] ss:$16 sps:$4 sm:$0xff]  }
 0x314   :  { %3587 = vmatprep.subr.bf16.mxu0 %v5317_v55  ;;  %3669 = vmatprep.subr.bf16.mxu1 %v5320_v56  ;;  %v2746_v55 = vmax.f32 %v4627_v45, 0.0  ;;  %v5400_v56 = vld [vmem:[%s5792_s7 + $0xc0] sm:$0xff]  }
 0x317   :  { %3588 = vmatpush1.bf16.msra.mxu0 %v5315_v57  ;;  %3670 = vmatpush1.bf16.msra.mxu1 %v5318_v58  ;;  %v5402_v57 = vld [vmem:[%s5792_s7 + $0x80] sm:$0xff]   ;;  %v2750_v58 = vpack.c.bf16 %v2746_v55, %v2746_v55 }
 0x318   :  { %3589 = vmatprep.subr.bf16.mxu0 %v5323_v60  ;;  %3671 = vmatprep.subr.bf16.mxu1 %v5326_v61  ;;  %v5403_v60 = vld [vmem:[%s5792_s7 + $0x48] sm:$0xff]  }
 0x319   :  { %v5404_v61 = vld [vmem:[%s5792_s7 + $0xc8] sm:$0xff]  }
 0x31b   :  { %3590 = vmatpush1.bf16.msra.mxu0 %v5321_v62  ;;  %3672 = vmatpush1.bf16.msra.mxu1 %v5324_v63  ;;  %v5405_v62 = vld [vmem:[%s5792_s7 + $0x8] sm:$0xff]  }
 0x31c   :  { %3591 = vmatprep.subr.bf16.mxu0 %v5329_v0  ;;  %3673 = vmatprep.subr.bf16.mxu1 %v5332_v1  ;;  %v5406_v63 = vld [vmem:[%s5792_s7 + $0x88] sm:$0xff]   ;;  %v5407_v0 = vld [vmem:[%s5792_s7 + $0x50] sm:$0xff]  }
 0x31d   :  { %v5408_v1 = vld [vmem:[%s5792_s7 + $0xd0] sm:$0xff]  }
 0x31f   :  { %3592 = vmatpush1.bf16.msra.mxu0 %v5327_v2  ;;  %3674 = vmatpush1.bf16.msra.mxu1 %v5330_v4  ;;  %v5409_v2 = vld [vmem:[%s5792_s7 + $0x10] sm:$0xff]  }
 0x320   :  { %3593 = vmatprep.subr.bf16.mxu0 %v5335_v5  ;;  %3675 = vmatprep.subr.bf16.mxu1 %v5338_v6  ;;  %v5410_v4 = vld [vmem:[%s5792_s7 + $0x90] sm:$0xff]   ;;  %v5411_v5 = vld [vmem:[%s5792_s7 + $0x58] sm:$0xff]  }
 0x321   :  { %v5412_v6 = vld [vmem:[%s5792_s7 + $0xd8] sm:$0xff]  }
 0x323   :  { %3594 = vmatpush1.bf16.msra.mxu0 %v5333_v7  ;;  %3676 = vmatpush1.bf16.msra.mxu1 %v5336_v8  ;;  %v5413_v7 = vld [vmem:[%s5792_s7 + $0x18] sm:$0xff]  }
 0x324   :  { %3595 = vmatprep.subr.bf16.mxu0 %v5341_v9  ;;  %3677 = vmatprep.subr.bf16.mxu1 %v5344_v10  ;;  %v5414_v8 = vld [vmem:[%s5792_s7 + $0x98] sm:$0xff]   ;;  %v5415_v9 = vld [vmem:[%s5792_s7 + $0x60] sm:$0xff]  }
 0x325   :  { %v5416_v10 = vld [vmem:[%s5792_s7 + $0xe0] sm:$0xff]  }
 0x327   :  { %3596 = vmatpush1.bf16.msra.mxu0 %v5339_v11  ;;  %3678 = vmatpush1.bf16.msra.mxu1 %v5342_v50  ;;  %v5417_v11 = vld [vmem:[%s5792_s7 + $0x20] sm:$0xff]  }
 0x328   :  { %3597 = vmatprep.subr.bf16.mxu0 %v5347_v12  ;;  %3679 = vmatprep.subr.bf16.mxu1 %v5350_v13  ;;  %v5418_v50 = vld [vmem:[%s5792_s7 + $0xa0] sm:$0xff]   ;;  %v5419_v12 = vld [vmem:[%s5792_s7 + $0x68] sm:$0xff]  }
 0x329   :  { %v5420_v13 = vld [vmem:[%s5792_s7 + $0xe8] sm:$0xff]  }
 0x32b   :  { %3598 = vmatpush1.bf16.msra.mxu0 %v5345_v14  ;;  %3680 = vmatpush1.bf16.msra.mxu1 %v5348_v15  ;;  %v5421_v14 = vld [vmem:[%s5792_s7 + $0x28] sm:$0xff]  }
 0x32c   :  { %3599 = vmatprep.subr.bf16.mxu0 %v5353_v16  ;;  %3681 = vmatprep.subr.bf16.mxu1 %v5356_v17  ;;  %v5422_v15 = vld [vmem:[%s5792_s7 + $0xa8] sm:$0xff]   ;;  %v5423_v16 = vld [vmem:[%s5792_s7 + $0x70] sm:$0xff]  }
 0x32d   :  { %v5424_v17 = vld [vmem:[%s5792_s7 + $0xf0] sm:$0xff]  }
 0x32f   :  { %3600 = vmatpush1.bf16.msra.mxu0 %v5351_v52  ;;  %3682 = vmatpush1.bf16.msra.mxu1 %v5354_v18  ;;  %v5425_v52 = vld [vmem:[%s5792_s7 + $0x30] sm:$0xff]  }
 0x330   :  { %3601 = vmatprep.subr.bf16.mxu0 %v5359_v19  ;;  %3683 = vmatprep.subr.bf16.mxu1 %v5362_v20  ;;  %v5426_v18 = vld [vmem:[%s5792_s7 + $0xb0] sm:$0xff]   ;;  %v5427_v19 = vld [vmem:[%s5792_s7 + $0x78] sm:$0xff]  }
 0x331   :  { %v5428_v20 = vld [vmem:[%s5792_s7 + $0xf8] sm:$0xff]  }
 0x333   :  { %3602 = vmatpush1.bf16.msra.mxu0 %v5357_v21  ;;  %3684 = vmatpush1.bf16.msra.mxu1 %v5360_v59  ;;  %v5429_v21 = vld [vmem:[%s5792_s7 + $0x38] sm:$0xff]  }
 0x334   :  { %3603 = vmatprep.subr.bf16.mxu0 %v5365_v22  ;;  %3685 = vmatprep.subr.bf16.mxu1 %v5368_v24  ;;  %v5430_v59 = vld [vmem:[%s5792_s7 + $0xb8] sm:$0xff]   ;;  %v2880_v22 = vld [vmem:[%s5791_s6] sm:$0xf] }
 0x335   :  { %v2885_v24 = vrot.slane %v2880_v22, %v5633_v51 }
 0x337   :  { %3604 = vmatpush1.bf16.msra.mxu0 %v5363_v25  ;;  %3686 = vmatpush1.bf16.msra.mxu1 %v5366_v26  ;;  %v2893_v25 = vrot.slane %v2880_v22, %v5655_v3  ;;  %v2889_v26 = vrot.slane %v2880_v22, %v5641_v53 }
 0x338   :  { %3605 = vmatprep.subr.bf16.mxu0 %v5371_v27  ;;  %3687 = vmatprep.subr.bf16.mxu1 %v5374_v29  ;;  %v2897_v27 = vrot.slane %v2880_v22, %v5644_v54 }
 0x33b   :  { %3606 = vmatpush1.bf16.msra.mxu0 %v5369_v30  ;;  %3688 = vmatpush1.bf16.msra.mxu1 %v5372_v31 }
 0x33c   :  { %3607 = vmatprep.subr.bf16.mxu0 %v5377_v32  ;;  %3689 = vmatprep.subr.bf16.mxu1 %v5380_v33 }
 0x33f   :  { %3608 = vmatpush1.bf16.msra.mxu0 %v5375_v34  ;;  %3690 = vmatpush1.bf16.msra.mxu1 %v5378_v35 }
 0x340   :  { %3609 = vmatprep.subr.bf16.mxu0 %v5383_v36  ;;  %3691 = vmatprep.subr.bf16.mxu1 %v5386_v37 }
 0x343   :  { %3610 = vmatpush1.bf16.msra.mxu0 %v5381_v38  ;;  %3692 = vmatpush1.bf16.msra.mxu1 %v5384_v39 }
 0x344   :  { %3611 = vmatprep.subr.bf16.mxu0 %v5389_v41  ;;  %3693 = vmatprep.subr.bf16.mxu1 %v5392_v42 }
 0x347   :  { %3612 = vmatpush1.bf16.msra.mxu0 %v5387_v43  ;;  %3694 = vmatpush1.bf16.msra.mxu1 %v5390_v44 }
 0x348   :  { %3613 = vmatprep.subr.bf16.mxu0 %v5395_v46  ;;  %3695 = vmatprep.subr.bf16.mxu1 %v5398_v47  ;;  %v4544_v47 = vld [vmem:[%s5793_s8] ss:$0 sm:$0xff] }
 0x34b   :  { %3614 = vmatpush1.bf16.msra.mxu0 %v5393_v48  ;;  %3696 = vmatpush1.bf16.msra.mxu1 %v5396_v49 }
 0x34c   :  { %4577 = vmatprep.subr.bf16.mxu0 %v5399_v23  ;;  %4599 = vmatprep.subr.bf16.mxu1 %v5400_v56 }
 0x34e   :  { %3616 = vmatmul.mubr.bf16.vlgmr.msra.gmra.mrb[8].mxu0 %v2750_v58  ;;  %3698 = vmatmul.mubr.bf16.vlgmr.msra.gmra.mrb[8].mxu1 %v2750_v58 }
 0x34f   :  { %4578 = vmatpush3.bf16.msra.mxu0 %v5401_v28  ;;  %4600 = vmatpush3.bf16.msra.mxu1 %v5402_v57 }
 0x350   :  { %4579 = vmatprep.subr.bf16.mxu0 %v5403_v60  ;;  %4601 = vmatprep.subr.bf16.mxu1 %v5404_v61 }
 0x353   :  { %4580 = vmatpush3.bf16.msra.mxu0 %v5405_v62  ;;  %4602 = vmatpush3.bf16.msra.mxu1 %v5406_v63 }
 0x354   :  { %4581 = vmatprep.subr.bf16.mxu0 %v5407_v0  ;;  %4603 = vmatprep.subr.bf16.mxu1 %v5408_v1 }
 0x357   :  { %4582 = vmatpush3.bf16.msra.mxu0 %v5409_v2  ;;  %4604 = vmatpush3.bf16.msra.mxu1 %v5410_v4 }
 0x358   :  { %4583 = vmatprep.subr.bf16.mxu0 %v5411_v5  ;;  %4605 = vmatprep.subr.bf16.mxu1 %v5412_v6 }
 0x35b   :  { %4584 = vmatpush3.bf16.msra.mxu0 %v5413_v7  ;;  %4606 = vmatpush3.bf16.msra.mxu1 %v5414_v8 }
 0x35c   :  { %4585 = vmatprep.subr.bf16.mxu0 %v5415_v9  ;;  %4607 = vmatprep.subr.bf16.mxu1 %v5416_v10 }
 0x35f   :  { %4586 = vmatpush3.bf16.msra.mxu0 %v5417_v11  ;;  %4608 = vmatpush3.bf16.msra.mxu1 %v5418_v50 }
 0x360   :  { %4587 = vmatprep.subr.bf16.mxu0 %v5419_v12  ;;  %4609 = vmatprep.subr.bf16.mxu1 %v5420_v13 }
 0x363   :  { %4588 = vmatpush3.bf16.msra.mxu0 %v5421_v14  ;;  %4610 = vmatpush3.bf16.msra.mxu1 %v5422_v15 }
 0x364   :  { %4589 = vmatprep.subr.bf16.mxu0 %v5423_v16  ;;  %4611 = vmatprep.subr.bf16.mxu1 %v5424_v17 }
 0x367   :  { %4590 = vmatpush3.bf16.msra.mxu0 %v5425_v52  ;;  %4612 = vmatpush3.bf16.msra.mxu1 %v5426_v18 }
 0x368   :  { %4591 = vmatprep.subr.bf16.mxu0 %v5427_v19  ;;  %4613 = vmatprep.subr.bf16.mxu1 %v5428_v20 }
 0x36b   :  { %4592 = vmatpush3.bf16.msra.mxu0 %v5429_v21  ;;  %4614 = vmatpush3.bf16.msra.mxu1 %v5430_v59 }
 0x421   :  { %v3617_v29 = vpop.f32.mrb[8].mxu0  ;;  %v3699_v30 = vpop.f32.mrb[8].mxu1 }
 0x422   :  { %v4629_v31 = vadd.f32 %v3617_v29, %v2885_v24  ;;  %v4631_v32 = vadd.f32 %v3699_v30, %v2893_v25  ;;  %v3619_v33 = vpop.f32.mrb[9].mxu0  ;;  %v3701_v34 = vpop.f32.mrb[9].mxu1 }
 0x423   :  { %v4630_v35 = vadd.f32 %v3619_v33, %v2889_v26  ;;  %v4632_v36 = vadd.f32 %v3701_v34, %v2897_v27  ;;  %v3621_v37 = vpop.f32.mrb[10].mxu0  ;;  %v3703_v38 = vpop.f32.mrb[10].mxu1 }
 0x424   :  { %v3706_v39 = vmax.f32 %v4629_v31, 0.0  ;;  %v3708_v40 = vmax.f32 %v4631_v32, 0.0  ;;  %v3622_v41 = vpop.f32.mrb[11].mxu0  ;;  %v3704_v51 = vpop.f32.mrb[11].mxu1 }
 0x425   :  { %v3707_v42 = vmax.f32 %v4630_v35, 0.0  ;;  %v3709_v3 = vmax.f32 %v4632_v36, 0.0 }
 0x426   :  { %v3710_v44 = vpack.c.bf16 %v3706_v39, %v3706_v39  ;;  %v3712_v54 = vpack.c.bf16 %v3708_v40, %v3708_v40 }
 0x427   :  { %v3711_v43 = vpack.c.bf16 %v3707_v42, %v3707_v42  ;;  %v3713_v53 = vpack.c.bf16 %v3709_v3, %v3709_v3 }
 0x429   :  { %4009 = vmatprep.mubr.bf16.mxu0 %v3711_v43  ;;  %4049 = vmatprep.mubr.bf16.mxu1 %v3713_v53 }
 0x42a   :  { %4010 = vmatmul.mubr.bf16.vlgmr.msra.gmra.mrb[12].mxu0 %v3710_v44  ;;  %4050 = vmatmul.mubr.bf16.vlgmr.msra.gmra.mrb[12].mxu1 %v3712_v54 }
 0x4fd   :  { %v4593_v45 = vpop.f32.mrb[12].mxu0  ;;  %v4615_v46 = vpop.f32.mrb[12].mxu1 }
 0x4fe   :  { %v4594_v48 = vpop.f32.mrb[13].mxu0  ;;  %v4616_v49 = vpop.f32.mrb[13].mxu1 }
 0x4ff   :  { %v4595_v55 = vadd.f32 %v4594_v48, %v4593_v45  ;;  %v4617_v23 = vadd.f32 %v4616_v49, %v4615_v46  ;;  %v4596_v56 = vpop.f32.mrb[14].mxu0  ;;  %v4618_v28 = vpop.f32.mrb[14].mxu1 }
 0x500   :  { %v4597_v57 = vpop.f32.mrb[15].mxu0  ;;  %v4619_v58 = vpop.f32.mrb[15].mxu1 }
 0x501   :  { %v4012_v60 = vadd.f32 %v4595_v55, %v4544_v47 }
 0x503   :  { %v4052_v61 = vadd.f32 %v4617_v23, %v4012_v60 }
 0x505   :  { %4057 = vst [vmem:[%s5794_s9] sm:$0xff] %v4052_v61 }
 0x506   :  { %4062 = vsyncpa [#allocation3], 1 }
 0x507   :  { %4063 = vsyncpa [#allocation5], 1 }

</bundles_post_ra>
